<compile_context>
chip_gen: v5e
topology: v5e:2x2
jax: 0.10.0
libtpu: 0.0.40
codegen_flags: <defaults>
</compile_context>

<pallas_src>
import functools
import math

import jax
import jax.numpy as jnp
from jax.experimental import pallas as pl
from jax.experimental.pallas import tpu as pltpu

_NEG_INF = -1e30


# ----------------------------- fused Pallas kernel ---------------------------

def _nmt_fused_kernel(
    xt_ref, yt_ref,
    qkv_w_ref, qkv_b_ref, out_w_ref, out_b_ref,
    ln_w_ref, ln_b_ref,
    ffn_w1_ref, ffn_b1_ref, ffn_w2_ref, ffn_b2_ref,
    fcc_w_ref, fcc_b_ref,
    logits_ref,
    *, d_model, nhead, seq_len):
    f32 = jnp.float32
    D = d_model
    H = nhead
    dh = D // H
    S = seq_len
    scale = dh ** -0.5

    # Causal mask for ENCODER self-attention (reference bug: tgt_mask passed as
    # src_mask), built in-kernel from iota, replicated per head along the
    # stacked-head sublane axis.  Decoder self/cross attention is unmasked.
    q_pos = jax.lax.broadcasted_iota(jnp.int32, (S, S), 0)
    k_pos = jax.lax.broadcasted_iota(jnp.int32, (S, S), 1)
    causal = jnp.where(k_pos <= q_pos, 0.0, _NEG_INF).astype(f32)     # (S, S)
    enc_mask = jnp.concatenate([causal] * H, axis=0)                  # (H*S, S)

    def layer_norm(h, i):
        # nn.LayerNorm default eps = 1e-5.
        mu = jnp.mean(h, axis=-1, keepdims=True)
        var = jnp.mean(jnp.square(h - mu), axis=-1, keepdims=True)
        return (h - mu) * jax.lax.rsqrt(var + 1e-5) * ln_w_ref[i] + ln_b_ref[i]

    def mha(q_in, kv_in, mask, i, *, self_attn):
        # Fused QKV projection: one (L, D) @ (D, 3D) matmul per input stream.
        qkv_q = jnp.dot(q_in, qkv_w_ref[i], preferred_element_type=f32) + qkv_b_ref[i]
        if self_attn:
            qkv_kv = qkv_q
        else:
            qkv_kv = jnp.dot(kv_in, qkv_w_ref[i], preferred_element_type=f32) + qkv_b_ref[i]

        q = qkv_q[:, :D]            # (Lq, D)
        k = qkv_kv[:, D:2 * D]      # (Lk, D)
        v = qkv_kv[:, 2 * D:]       # (Lk, D)
        Lq = q_in.shape[0]

        # Real per-head slices: score contraction width is dh (not 3D).  Head
        # score blocks stack along the sublane axis so ONE softmax pass covers
        # all heads (single max/exp/sum/reciprocal per MHA).
        s_list = []
        for h in range(H):                                  # static unroll
            q_h = q[:, h * dh:(h + 1) * dh]                 # (Lq, dh)
            k_h = k[:, h * dh:(h + 1) * dh]                 # (Lk, dh)
            s_list.append(jax.lax.dot_general(
                q_h, k_h, (((1,), (1,)), ((), ())),
                preferred_element_type=f32))                # (Lq, Lk)
        s = jnp.concatenate(s_list, axis=0) * scale         # (H*Lq, Lk)
        if mask is not None:
            s = s + mask
        s = s - jnp.max(s, axis=-1, keepdims=True)
        p = jnp.exp(s)
        p = p * pl.reciprocal(jnp.sum(p, axis=-1, keepdims=True), approx=True)

        # Per-head P @ V into the head's dh-wide column slot, then a plain
        # (D, D) out_proj.
        outs = [jnp.dot(p[h * Lq:(h + 1) * Lq], v[:, h * dh:(h + 1) * dh],
                        preferred_element_type=f32)
                for h in range(H)]
        attn = jnp.concatenate(outs, axis=-1)               # (Lq, D)
        return jnp.dot(attn, out_w_ref[i], preferred_element_type=f32) + out_b_ref[i]

    def ffn(h, i):
        z = jnp.dot(h, ffn_w1_ref[i], preferred_element_type=f32) + ffn_b1_ref[i]
        z = jnp.maximum(z, 0.0)
        return jnp.dot(z, ffn_w2_ref[i], preferred_element_type=f32) + ffn_b2_ref[i]

    # ---- encoder layer (post-norm) + final encoder norm ----------------------
    src = xt_ref[...]
    src = layer_norm(src + mha(src, src, enc_mask, 0, self_attn=True), 0)
    src = layer_norm(src + ffn(src, 0), 1)
    memory = layer_norm(src, 2)

    # ---- decoder layer (post-norm; self-attn unmasked per reference bug) -----
    tgt = yt_ref[...]
    tgt = layer_norm(tgt + mha(tgt, tgt, None, 1, self_attn=True), 3)
    tgt = layer_norm(tgt + mha(tgt, memory, None, 2, self_attn=False), 4)
    tgt = layer_norm(tgt + ffn(tgt, 1), 5)
    out = layer_norm(tgt, 6)

    # ---- fcc projection, lane-dense (vocab padded to multiple of 128) --------
    logits_ref[...] = (
        jnp.dot(out, fcc_w_ref[...], preferred_element_type=f32) + fcc_b_ref[...]
    )


# --------------------------------- forward -----------------------------------

@functools.partial(jax.jit, static_argnames=("nhead", "en_vocab"))
def nmt_forward(kp, x, y, *, nhead, en_vocab):
    """x:(S,B) int32 source tokens, y:(T,B) int32 target tokens -> (B,T,en_vocab)."""
    S, B = x.shape
    T, By = y.shape
    assert By == B
    assert S == T, "original script requires src_len == tgt_len (mask-arg bug)"
    D = kp["en_embed"].shape[1]
    v_pad = kp["fcc_w"].shape[1]

    x_e = jnp.take(kp["en_embed"], x, axis=0)            # (S, B, D)
    y_e = jnp.take(kp["hi_embed"], y, axis=0)            # (T, B, D)
    # NOTE: pe indexed by dim 1 (= batch dim here), exactly as in the reference.
    x_t = x_e + kp["pe"][:, :B]
    y_t = y_e + kp["pe"][:, :B]
    x_bt = jnp.transpose(x_t, (1, 0, 2))                 # (B, S, D) batch-major
    y_bt = jnp.transpose(y_t, (1, 0, 2))                 # (B, T, D)

    def full(shape):
        n = len(shape)
        return pl.BlockSpec(shape, lambda b, n=n: (0,) * n)

    weights = (kp["qkv_w"], kp["qkv_b"], kp["out_w"], kp["out_b"],
               kp["ln_w"], kp["ln_b"],
               kp["ffn_w1"], kp["ffn_b1"], kp["ffn_w2"], kp["ffn_b2"],
               kp["fcc_w"], kp["fcc_b"])

    kernel = functools.partial(_nmt_fused_kernel, d_model=D, nhead=nhead, seq_len=S)
    logits = pl.pallas_call(
        kernel,
        out_shape=jax.ShapeDtypeStruct((B, T, v_pad), jnp.float32),
        grid=(B,),
        in_specs=[pl.BlockSpec((None, S, D), lambda b: (b, 0, 0)),
                  pl.BlockSpec((None, T, D), lambda b: (b, 0, 0))]
                 + [full(w.shape) for w in weights],
        out_specs=pl.BlockSpec((None, T, v_pad), lambda b: (b, 0, 0)),
        compiler_params=pltpu.CompilerParams(
            dimension_semantics=("parallel",)),
    )(x_bt, y_bt, *weights)

    # Output is already (B, T, vocab): the reference's final
    # rearrange('b s d -> s b d') applied to its seq-first (T, B, V) tensor.
    return logits[:, :, :en_vocab]


# --------------------------- parameter init / packing ------------------------

def init_params(key, d_model, en_vocab, hi_vocab, d_ff, max_len):
    """PyTorch-layout parameters (same conventions as nn.Transformer modules)."""
    keys = iter(jax.random.split(key, 64))

    def nrm(shape, scale=0.02):
        return (scale * jax.random.normal(next(keys), shape)).astype(jnp.float32)

    def mha_p():
        return dict(
            in_proj_w=nrm((3 * d_model, d_model)),
            in_proj_b=jnp.zeros((3 * d_model,), jnp.float32),
            out_proj_w=nrm((d_model, d_model)),
            out_proj_b=jnp.zeros((d_model,), jnp.float32),
        )

    def ln_p():
        return dict(w=jnp.ones((d_model,), jnp.float32),
                    b=jnp.zeros((d_model,), jnp.float32))

    def layer_p(cross):
        p = dict(
            self_attn=mha_p(),
            lin1_w=nrm((d_ff, d_model)), lin1_b=jnp.zeros((d_ff,), jnp.float32),
            lin2_w=nrm((d_model, d_ff)), lin2_b=jnp.zeros((d_model,), jnp.float32),
            norm1=ln_p(), norm2=ln_p(),
        )
        if cross:
            p["cross_attn"] = mha_p()
            p["norm3"] = ln_p()
        return p

    # PositionalEncoding buffer, exactly as in the reference module.
    position = jnp.arange(max_len, dtype=jnp.float32)[:, None]
    div_term = jnp.exp(jnp.arange(0, d_model, 2, dtype=jnp.float32)
                       * (-math.log(10000.0) / d_model))
    pe = jnp.zeros((max_len, d_model), jnp.float32)
    pe = pe.at[:, 0::2].set(jnp.sin(position * div_term))
    pe = pe.at[:, 1::2].set(jnp.cos(position * div_term))
    pe = pe[None]                                              # (1, max_len, D)

    return dict(
        en_embed=nrm((en_vocab, d_model), 1.0),
        hi_embed=nrm((hi_vocab, d_model), 1.0),
        pe=pe,
        enc=layer_p(cross=False),
        enc_norm=ln_p(),
        dec=layer_p(cross=True),
        dec_norm=ln_p(),
        fcc_w=nrm((en_vocab, d_model)),
        fcc_b=jnp.zeros((en_vocab,), jnp.float32),
    )


def pack_params(p):
    """One-time conversion into the fused-kernel layout: pre-transposed, stacked
    along a leading index axis, fcc padded to a lane-dense multiple of 128."""
    D = p["en_embed"].shape[1]

    def attn_pack(ap):
        w_qkv = ap["in_proj_w"].T.astype(jnp.float32)                   # (D, 3D)
        b_qkv = ap["in_proj_b"].reshape(1, 3 * D).astype(jnp.float32)
        w_out = ap["out_proj_w"].T.astype(jnp.float32)                  # (D, D)
        b_out = ap["out_proj_b"].reshape(1, D).astype(jnp.float32)
        return w_qkv, b_qkv, w_out, b_out

    packs = [attn_pack(p["enc"]["self_attn"]),
             attn_pack(p["dec"]["self_attn"]),
             attn_pack(p["dec"]["cross_attn"])]
    lns = [p["enc"]["norm1"], p["enc"]["norm2"], p["enc_norm"],
           p["dec"]["norm1"], p["dec"]["norm2"], p["dec"]["norm3"], p["dec_norm"]]
    F = p["enc"]["lin1_w"].shape[0]
    V = p["fcc_w"].shape[0]
    v_pad = ((V + 127) // 128) * 128

    return dict(
        en_embed=p["en_embed"], hi_embed=p["hi_embed"], pe=p["pe"],
        qkv_w=jnp.stack([q[0] for q in packs]),                  # (3, D, 3D)
        qkv_b=jnp.stack([q[1] for q in packs]),                  # (3, 1, 3D)
        out_w=jnp.stack([q[2] for q in packs]),                  # (3, D, D)
        out_b=jnp.stack([q[3] for q in packs]),                  # (3, 1, D)
        ln_w=jnp.stack([l["w"].reshape(1, D) for l in lns]),     # (7, 1, D)
        ln_b=jnp.stack([l["b"].reshape(1, D) for l in lns]),     # (7, 1, D)
        ffn_w1=jnp.stack([p["enc"]["lin1_w"].T, p["dec"]["lin1_w"].T]),   # (2, D, F)
        ffn_b1=jnp.stack([p["enc"]["lin1_b"].reshape(1, F),
                          p["dec"]["lin1_b"].reshape(1, F)]),             # (2, 1, F)
        ffn_w2=jnp.stack([p["enc"]["lin2_w"].T, p["dec"]["lin2_w"].T]),   # (2, F, D)
        ffn_b2=jnp.stack([p["enc"]["lin2_b"].reshape(1, D),
                          p["dec"]["lin2_b"].reshape(1, D)]),             # (2, 1, D)
        fcc_w=jnp.zeros((D, v_pad), jnp.float32).at[:, :V].set(p["fcc_w"].T),
        fcc_b=jnp.zeros((1, v_pad), jnp.float32).at[:, :V].set(p["fcc_b"]),
    )


# ----------------------------------- main ------------------------------------

if __name__ == "__main__":
    d_model, nhead = 32, 8
    en_vocab, hi_vocab = 40, 48
    d_ff, max_len = 64, 50
    S = T = 8
    B = 2

    root = jax.random.PRNGKey(0)
    k_params, k_x, k_y = jax.random.split(root, 3)
    params = init_params(k_params, d_model, en_vocab, hi_vocab, d_ff, max_len)
    kparams = pack_params(params)      # one-time kernel-ready weight layout

    x = jax.random.randint(k_x, (S, B), 0, en_vocab, dtype=jnp.int32)  # source tokens
    y = jax.random.randint(k_y, (T, B), 0, hi_vocab, dtype=jnp.int32)  # target tokens

    out = nmt_forward(kparams, x, y, nhead=nhead, en_vocab=en_vocab)
    out = jax.block_until_ready(out)

    assert out.shape == (B, T, en_vocab), out.shape
    assert jnp.isfinite(out).all()
    print("KERNEL_OK")
</pallas_src>

<mosaic_0001>
module attributes {stable_mosaic.version = 11 : i64} {
  func.func @_nmt_fused_kernel(%arg0: i32, %arg1: memref<1x8x32xf32, #tpu.memory_space<vmem>>, %arg2: memref<1x8x32xf32, #tpu.memory_space<vmem>>, %arg3: memref<3x32x96xf32, #tpu.memory_space<vmem>>, %arg4: memref<3x1x96xf32, #tpu.memory_space<vmem>>, %arg5: memref<3x32x32xf32, #tpu.memory_space<vmem>>, %arg6: memref<3x1x32xf32, #tpu.memory_space<vmem>>, %arg7: memref<7x1x32xf32, #tpu.memory_space<vmem>>, %arg8: memref<7x1x32xf32, #tpu.memory_space<vmem>>, %arg9: memref<2x32x64xf32, #tpu.memory_space<vmem>>, %arg10: memref<2x1x64xf32, #tpu.memory_space<vmem>>, %arg11: memref<2x64x32xf32, #tpu.memory_space<vmem>>, %arg12: memref<2x1x32xf32, #tpu.memory_space<vmem>>, %arg13: memref<32x128xf32, #tpu.memory_space<vmem>>, %arg14: memref<1x128xf32, #tpu.memory_space<vmem>>, %arg15: memref<1x8x128xf32, #tpu.memory_space<vmem>>) attributes {dimension_semantics = [#tpu.dimension_semantics<parallel>], iteration_bounds = array<i64: 2>, scalar_prefetch = 0 : i64, scratch_operands = 0 : i64, tpu.core_type = #tpu.core_type<tc>, window_params = [{transform_indices = @transform_0, window_bounds = array<i64: 1, 8, 32>}, {transform_indices = @transform_1, window_bounds = array<i64: 1, 8, 32>}, {pipeline_mode = #tpu.pipeline_mode<synchronous>, transform_indices = @transform_2, window_bounds = array<i64: 3, 32, 96>}, {pipeline_mode = #tpu.pipeline_mode<synchronous>, transform_indices = @transform_3, window_bounds = array<i64: 3, 1, 96>}, {pipeline_mode = #tpu.pipeline_mode<synchronous>, transform_indices = @transform_4, window_bounds = array<i64: 3, 32, 32>}, {pipeline_mode = #tpu.pipeline_mode<synchronous>, transform_indices = @transform_5, window_bounds = array<i64: 3, 1, 32>}, {pipeline_mode = #tpu.pipeline_mode<synchronous>, transform_indices = @transform_6, window_bounds = array<i64: 7, 1, 32>}, {pipeline_mode = #tpu.pipeline_mode<synchronous>, transform_indices = @transform_7, window_bounds = array<i64: 7, 1, 32>}, {pipeline_mode = #tpu.pipeline_mode<synchronous>, transform_indices = @transform_8, window_bounds = array<i64: 2, 32, 64>}, {pipeline_mode = #tpu.pipeline_mode<synchronous>, transform_indices = @transform_9, window_bounds = array<i64: 2, 1, 64>}, {pipeline_mode = #tpu.pipeline_mode<synchronous>, transform_indices = @transform_10, window_bounds = array<i64: 2, 64, 32>}, {pipeline_mode = #tpu.pipeline_mode<synchronous>, transform_indices = @transform_11, window_bounds = array<i64: 2, 1, 32>}, {pipeline_mode = #tpu.pipeline_mode<synchronous>, transform_indices = @transform_12, window_bounds = array<i64: 32, 128>}, {pipeline_mode = #tpu.pipeline_mode<synchronous>, transform_indices = @transform_13, window_bounds = array<i64: 1, 128>}, {transform_indices = @transform_14, window_bounds = array<i64: 1, 8, 128>}]} {
    %0 = tpu.iota {dimensions = array<i32: 0>} : vector<8x8xi32>
    %1 = tpu.iota {dimensions = array<i32: 1>} : vector<8x8xi32>
    %2 = arith.cmpi sle, %1, %0 : vector<8x8xi32>
    %cst = arith.constant 0.000000e+00 : f32
    %cst_0 = arith.constant -1.000000e+30 : f32
    %3 = vector.broadcast %cst : f32 to vector<8x8xf32>
    %4 = vector.broadcast %cst_0 : f32 to vector<8x8xf32>
    %5 = arith.select %2, %3, %4 : vector<8x8xi1>, vector<8x8xf32>
    %6 = tpu.concatenate %5, %5, %5, %5, %5, %5, %5, %5 in 0 : vector<8x8xf32>, vector<8x8xf32>, vector<8x8xf32>, vector<8x8xf32>, vector<8x8xf32>, vector<8x8xf32>, vector<8x8xf32>, vector<8x8xf32> -> vector<64x8xf32>
    %c0 = arith.constant 0 : index
    %c0_1 = arith.constant 0 : index
    %c0_2 = arith.constant 0 : index
    %7 = vector.load %arg1[%c0, %c0_1, %c0_2] : memref<1x8x32xf32, #tpu.memory_space<vmem>>, vector<1x8x32xf32>
    %8 = vector.shape_cast %7 : vector<1x8x32xf32> to vector<8x32xf32>
    %c0_3 = arith.constant 0 : index
    %c0_4 = arith.constant 0 : index
    %c0_5 = arith.constant 0 : index
    %9 = vector.load %arg3[%c0_3, %c0_4, %c0_5] : memref<3x32x96xf32, #tpu.memory_space<vmem>>, vector<1x32x96xf32>
    %10 = vector.shape_cast %9 : vector<1x32x96xf32> to vector<32x96xf32>
    %cst_6 = arith.constant dense<0.000000e+00> : vector<8x96xf32>
    %11 = tpu.matmul %8, %10, %cst_6 {dimension_numbers = #tpu.dot_dimension_numbers<[1], [0], [0], [1], [0, 0, 1, 1], [], []>} : vector<8x32xf32>, vector<32x96xf32>, vector<8x96xf32> -> vector<8x96xf32>
    %c0_7 = arith.constant 0 : index
    %c0_8 = arith.constant 0 : index
    %c0_9 = arith.constant 0 : index
    %12 = vector.load %arg4[%c0_7, %c0_8, %c0_9] : memref<3x1x96xf32, #tpu.memory_space<vmem>>, vector<1x1x96xf32>
    %13 = vector.shape_cast %12 : vector<1x1x96xf32> to vector<1x96xf32>
    %14 = vector.broadcast %13 : vector<1x96xf32> to vector<8x96xf32>
    %15 = arith.addf %11, %14 : vector<8x96xf32>
    %16 = vector.extract_strided_slice %15 {offsets = [0, 0], sizes = [8, 32], strides = [1, 1]} : vector<8x96xf32> to vector<8x32xf32>
    %17 = vector.extract_strided_slice %15 {offsets = [0, 32], sizes = [8, 32], strides = [1, 1]} : vector<8x96xf32> to vector<8x32xf32>
    %18 = vector.extract_strided_slice %15 {offsets = [0, 64], sizes = [8, 32], strides = [1, 1]} : vector<8x96xf32> to vector<8x32xf32>
    %19 = vector.extract_strided_slice %16 {offsets = [0, 0], sizes = [8, 4], strides = [1, 1]} : vector<8x32xf32> to vector<8x4xf32>
    %20 = vector.extract_strided_slice %17 {offsets = [0, 0], sizes = [8, 4], strides = [1, 1]} : vector<8x32xf32> to vector<8x4xf32>
    %cst_10 = arith.constant dense<0.000000e+00> : vector<8x8xf32>
    %21 = tpu.matmul %19, %20, %cst_10 {dimension_numbers = #tpu.dot_dimension_numbers<[1], [1], [0], [0], [0, 0, 1, 0], [], []>} : vector<8x4xf32>, vector<8x4xf32>, vector<8x8xf32> -> vector<8x8xf32>
    %22 = vector.extract_strided_slice %16 {offsets = [0, 4], sizes = [8, 4], strides = [1, 1]} : vector<8x32xf32> to vector<8x4xf32>
    %23 = vector.extract_strided_slice %17 {offsets = [0, 4], sizes = [8, 4], strides = [1, 1]} : vector<8x32xf32> to vector<8x4xf32>
    %cst_11 = arith.constant dense<0.000000e+00> : vector<8x8xf32>
    %24 = tpu.matmul %22, %23, %cst_11 {dimension_numbers = #tpu.dot_dimension_numbers<[1], [1], [0], [0], [0, 0, 1, 0], [], []>} : vector<8x4xf32>, vector<8x4xf32>, vector<8x8xf32> -> vector<8x8xf32>
    %25 = vector.extract_strided_slice %16 {offsets = [0, 8], sizes = [8, 4], strides = [1, 1]} : vector<8x32xf32> to vector<8x4xf32>
    %26 = vector.extract_strided_slice %17 {offsets = [0, 8], sizes = [8, 4], strides = [1, 1]} : vector<8x32xf32> to vector<8x4xf32>
    %cst_12 = arith.constant dense<0.000000e+00> : vector<8x8xf32>
    %27 = tpu.matmul %25, %26, %cst_12 {dimension_numbers = #tpu.dot_dimension_numbers<[1], [1], [0], [0], [0, 0, 1, 0], [], []>} : vector<8x4xf32>, vector<8x4xf32>, vector<8x8xf32> -> vector<8x8xf32>
    %28 = vector.extract_strided_slice %16 {offsets = [0, 12], sizes = [8, 4], strides = [1, 1]} : vector<8x32xf32> to vector<8x4xf32>
    %29 = vector.extract_strided_slice %17 {offsets = [0, 12], sizes = [8, 4], strides = [1, 1]} : vector<8x32xf32> to vector<8x4xf32>
    %cst_13 = arith.constant dense<0.000000e+00> : vector<8x8xf32>
    %30 = tpu.matmul %28, %29, %cst_13 {dimension_numbers = #tpu.dot_dimension_numbers<[1], [1], [0], [0], [0, 0, 1, 0], [], []>} : vector<8x4xf32>, vector<8x4xf32>, vector<8x8xf32> -> vector<8x8xf32>
    %31 = vector.extract_strided_slice %16 {offsets = [0, 16], sizes = [8, 4], strides = [1, 1]} : vector<8x32xf32> to vector<8x4xf32>
    %32 = vector.extract_strided_slice %17 {offsets = [0, 16], sizes = [8, 4], strides = [1, 1]} : vector<8x32xf32> to vector<8x4xf32>
    %cst_14 = arith.constant dense<0.000000e+00> : vector<8x8xf32>
    %33 = tpu.matmul %31, %32, %cst_14 {dimension_numbers = #tpu.dot_dimension_numbers<[1], [1], [0], [0], [0, 0, 1, 0], [], []>} : vector<8x4xf32>, vector<8x4xf32>, vector<8x8xf32> -> vector<8x8xf32>
    %34 = vector.extract_strided_slice %16 {offsets = [0, 20], sizes = [8, 4], strides = [1, 1]} : vector<8x32xf32> to vector<8x4xf32>
    %35 = vector.extract_strided_slice %17 {offsets = [0, 20], sizes = [8, 4], strides = [1, 1]} : vector<8x32xf32> to vector<8x4xf32>
    %cst_15 = arith.constant dense<0.000000e+00> : vector<8x8xf32>
    %36 = tpu.matmul %34, %35, %cst_15 {dimension_numbers = #tpu.dot_dimension_numbers<[1], [1], [0], [0], [0, 0, 1, 0], [], []>} : vector<8x4xf32>, vector<8x4xf32>, vector<8x8xf32> -> vector<8x8xf32>
    %37 = vector.extract_strided_slice %16 {offsets = [0, 24], sizes = [8, 4], strides = [1, 1]} : vector<8x32xf32> to vector<8x4xf32>
    %38 = vector.extract_strided_slice %17 {offsets = [0, 24], sizes = [8, 4], strides = [1, 1]} : vector<8x32xf32> to vector<8x4xf32>
    %cst_16 = arith.constant dense<0.000000e+00> : vector<8x8xf32>
    %39 = tpu.matmul %37, %38, %cst_16 {dimension_numbers = #tpu.dot_dimension_numbers<[1], [1], [0], [0], [0, 0, 1, 0], [], []>} : vector<8x4xf32>, vector<8x4xf32>, vector<8x8xf32> -> vector<8x8xf32>
    %40 = vector.extract_strided_slice %16 {offsets = [0, 28], sizes = [8, 4], strides = [1, 1]} : vector<8x32xf32> to vector<8x4xf32>
    %41 = vector.extract_strided_slice %17 {offsets = [0, 28], sizes = [8, 4], strides = [1, 1]} : vector<8x32xf32> to vector<8x4xf32>
    %cst_17 = arith.constant dense<0.000000e+00> : vector<8x8xf32>
    %42 = tpu.matmul %40, %41, %cst_17 {dimension_numbers = #tpu.dot_dimension_numbers<[1], [1], [0], [0], [0, 0, 1, 0], [], []>} : vector<8x4xf32>, vector<8x4xf32>, vector<8x8xf32> -> vector<8x8xf32>
    %43 = tpu.concatenate %21, %24, %27, %30, %33, %36, %39, %42 in 0 : vector<8x8xf32>, vector<8x8xf32>, vector<8x8xf32>, vector<8x8xf32>, vector<8x8xf32>, vector<8x8xf32>, vector<8x8xf32>, vector<8x8xf32> -> vector<64x8xf32>
    %cst_18 = arith.constant 5.000000e-01 : f32
    %44 = vector.broadcast %cst_18 : f32 to vector<64x8xf32>
    %45 = arith.mulf %43, %44 : vector<64x8xf32>
    %46 = arith.addf %45, %6 : vector<64x8xf32>
    %cst_19 = arith.constant dense<0xFF800000> : vector<64xf32>
    %47 = vector.multi_reduction <maximumf>, %46, %cst_19 [1] : vector<64x8xf32> to vector<64xf32>
    %48 = vector.shape_cast %47 : vector<64xf32> to vector<64x1xf32>
    %49 = vector.broadcast %48 : vector<64x1xf32> to vector<64x8xf32>
    %50 = arith.subf %46, %49 : vector<64x8xf32>
    %51 = math.exp %50 : vector<64x8xf32>
    %cst_20 = arith.constant dense<0.000000e+00> : vector<64xf32>
    %52 = vector.multi_reduction <add>, %51, %cst_20 [1] : vector<64x8xf32> to vector<64xf32>
    %53 = vector.shape_cast %52 : vector<64xf32> to vector<64x1xf32>
    %54 = tpu.reciprocal %53 {approx = true} : vector<64x1xf32> -> vector<64x1xf32>
    %55 = vector.broadcast %54 : vector<64x1xf32> to vector<64x8xf32>
    %56 = arith.mulf %51, %55 : vector<64x8xf32>
    %57 = vector.extract_strided_slice %56 {offsets = [0, 0], sizes = [8, 8], strides = [1, 1]} : vector<64x8xf32> to vector<8x8xf32>
    %58 = vector.extract_strided_slice %18 {offsets = [0, 0], sizes = [8, 4], strides = [1, 1]} : vector<8x32xf32> to vector<8x4xf32>
    %cst_21 = arith.constant dense<0.000000e+00> : vector<8x4xf32>
    %59 = tpu.matmul %57, %58, %cst_21 {dimension_numbers = #tpu.dot_dimension_numbers<[1], [0], [0], [1], [0, 0, 1, 1], [], []>} : vector<8x8xf32>, vector<8x4xf32>, vector<8x4xf32> -> vector<8x4xf32>
    %60 = vector.extract_strided_slice %56 {offsets = [8, 0], sizes = [8, 8], strides = [1, 1]} : vector<64x8xf32> to vector<8x8xf32>
    %61 = vector.extract_strided_slice %18 {offsets = [0, 4], sizes = [8, 4], strides = [1, 1]} : vector<8x32xf32> to vector<8x4xf32>
    %cst_22 = arith.constant dense<0.000000e+00> : vector<8x4xf32>
    %62 = tpu.matmul %60, %61, %cst_22 {dimension_numbers = #tpu.dot_dimension_numbers<[1], [0], [0], [1], [0, 0, 1, 1], [], []>} : vector<8x8xf32>, vector<8x4xf32>, vector<8x4xf32> -> vector<8x4xf32>
    %63 = vector.extract_strided_slice %56 {offsets = [16, 0], sizes = [8, 8], strides = [1, 1]} : vector<64x8xf32> to vector<8x8xf32>
    %64 = vector.extract_strided_slice %18 {offsets = [0, 8], sizes = [8, 4], strides = [1, 1]} : vector<8x32xf32> to vector<8x4xf32>
    %cst_23 = arith.constant dense<0.000000e+00> : vector<8x4xf32>
    %65 = tpu.matmul %63, %64, %cst_23 {dimension_numbers = #tpu.dot_dimension_numbers<[1], [0], [0], [1], [0, 0, 1, 1], [], []>} : vector<8x8xf32>, vector<8x4xf32>, vector<8x4xf32> -> vector<8x4xf32>
    %66 = vector.extract_strided_slice %56 {offsets = [24, 0], sizes = [8, 8], strides = [1, 1]} : vector<64x8xf32> to vector<8x8xf32>
    %67 = vector.extract_strided_slice %18 {offsets = [0, 12], sizes = [8, 4], strides = [1, 1]} : vector<8x32xf32> to vector<8x4xf32>
    %cst_24 = arith.constant dense<0.000000e+00> : vector<8x4xf32>
    %68 = tpu.matmul %66, %67, %cst_24 {dimension_numbers = #tpu.dot_dimension_numbers<[1], [0], [0], [1], [0, 0, 1, 1], [], []>} : vector<8x8xf32>, vector<8x4xf32>, vector<8x4xf32> -> vector<8x4xf32>
    %69 = vector.extract_strided_slice %56 {offsets = [32, 0], sizes = [8, 8], strides = [1, 1]} : vector<64x8xf32> to vector<8x8xf32>
    %70 = vector.extract_strided_slice %18 {offsets = [0, 16], sizes = [8, 4], strides = [1, 1]} : vector<8x32xf32> to vector<8x4xf32>
    %cst_25 = arith.constant dense<0.000000e+00> : vector<8x4xf32>
    %71 = tpu.matmul %69, %70, %cst_25 {dimension_numbers = #tpu.dot_dimension_numbers<[1], [0], [0], [1], [0, 0, 1, 1], [], []>} : vector<8x8xf32>, vector<8x4xf32>, vector<8x4xf32> -> vector<8x4xf32>
    %72 = vector.extract_strided_slice %56 {offsets = [40, 0], sizes = [8, 8], strides = [1, 1]} : vector<64x8xf32> to vector<8x8xf32>
    %73 = vector.extract_strided_slice %18 {offsets = [0, 20], sizes = [8, 4], strides = [1, 1]} : vector<8x32xf32> to vector<8x4xf32>
    %cst_26 = arith.constant dense<0.000000e+00> : vector<8x4xf32>
    %74 = tpu.matmul %72, %73, %cst_26 {dimension_numbers = #tpu.dot_dimension_numbers<[1], [0], [0], [1], [0, 0, 1, 1], [], []>} : vector<8x8xf32>, vector<8x4xf32>, vector<8x4xf32> -> vector<8x4xf32>
    %75 = vector.extract_strided_slice %56 {offsets = [48, 0], sizes = [8, 8], strides = [1, 1]} : vector<64x8xf32> to vector<8x8xf32>
    %76 = vector.extract_strided_slice %18 {offsets = [0, 24], sizes = [8, 4], strides = [1, 1]} : vector<8x32xf32> to vector<8x4xf32>
    %cst_27 = arith.constant dense<0.000000e+00> : vector<8x4xf32>
    %77 = tpu.matmul %75, %76, %cst_27 {dimension_numbers = #tpu.dot_dimension_numbers<[1], [0], [0], [1], [0, 0, 1, 1], [], []>} : vector<8x8xf32>, vector<8x4xf32>, vector<8x4xf32> -> vector<8x4xf32>
    %78 = vector.extract_strided_slice %56 {offsets = [56, 0], sizes = [8, 8], strides = [1, 1]} : vector<64x8xf32> to vector<8x8xf32>
    %79 = vector.extract_strided_slice %18 {offsets = [0, 28], sizes = [8, 4], strides = [1, 1]} : vector<8x32xf32> to vector<8x4xf32>
    %cst_28 = arith.constant dense<0.000000e+00> : vector<8x4xf32>
    %80 = tpu.matmul %78, %79, %cst_28 {dimension_numbers = #tpu.dot_dimension_numbers<[1], [0], [0], [1], [0, 0, 1, 1], [], []>} : vector<8x8xf32>, vector<8x4xf32>, vector<8x4xf32> -> vector<8x4xf32>
    %81 = tpu.concatenate %59, %62, %65, %68, %71, %74, %77, %80 in 1 : vector<8x4xf32>, vector<8x4xf32>, vector<8x4xf32>, vector<8x4xf32>, vector<8x4xf32>, vector<8x4xf32>, vector<8x4xf32>, vector<8x4xf32> -> vector<8x32xf32>
    %c0_29 = arith.constant 0 : index
    %c0_30 = arith.constant 0 : index
    %c0_31 = arith.constant 0 : index
    %82 = vector.load %arg5[%c0_29, %c0_30, %c0_31] : memref<3x32x32xf32, #tpu.memory_space<vmem>>, vector<1x32x32xf32>
    %83 = vector.shape_cast %82 : vector<1x32x32xf32> to vector<32x32xf32>
    %cst_32 = arith.constant dense<0.000000e+00> : vector<8x32xf32>
    %84 = tpu.matmul %81, %83, %cst_32 {dimension_numbers = #tpu.dot_dimension_numbers<[1], [0], [0], [1], [0, 0, 1, 1], [], []>} : vector<8x32xf32>, vector<32x32xf32>, vector<8x32xf32> -> vector<8x32xf32>
    %c0_33 = arith.constant 0 : index
    %c0_34 = arith.constant 0 : index
    %c0_35 = arith.constant 0 : index
    %85 = vector.load %arg6[%c0_33, %c0_34, %c0_35] : memref<3x1x32xf32, #tpu.memory_space<vmem>>, vector<1x1x32xf32>
    %86 = vector.shape_cast %85 : vector<1x1x32xf32> to vector<1x32xf32>
    %87 = vector.broadcast %86 : vector<1x32xf32> to vector<8x32xf32>
    %88 = arith.addf %84, %87 : vector<8x32xf32>
    %89 = arith.addf %8, %88 : vector<8x32xf32>
    %cst_36 = arith.constant dense<0.000000e+00> : vector<8xf32>
    %90 = vector.multi_reduction <add>, %89, %cst_36 [1] : vector<8x32xf32> to vector<8xf32>
    %91 = vector.shape_cast %90 : vector<8xf32> to vector<8x1xf32>
    %cst_37 = arith.constant 3.200000e+01 : f32
    %92 = vector.broadcast %cst_37 : f32 to vector<8x1xf32>
    %93 = arith.divf %91, %92 : vector<8x1xf32>
    %94 = vector.broadcast %93 : vector<8x1xf32> to vector<8x32xf32>
    %95 = arith.subf %89, %94 : vector<8x32xf32>
    %96 = arith.mulf %95, %95 : vector<8x32xf32>
    %cst_38 = arith.constant dense<0.000000e+00> : vector<8xf32>
    %97 = vector.multi_reduction <add>, %96, %cst_38 [1] : vector<8x32xf32> to vector<8xf32>
    %98 = vector.shape_cast %97 : vector<8xf32> to vector<8x1xf32>
    %cst_39 = arith.constant 3.200000e+01 : f32
    %99 = vector.broadcast %cst_39 : f32 to vector<8x1xf32>
    %100 = arith.divf %98, %99 : vector<8x1xf32>
    %101 = vector.broadcast %93 : vector<8x1xf32> to vector<8x32xf32>
    %102 = arith.subf %89, %101 : vector<8x32xf32>
    %cst_40 = arith.constant 9.99999974E-6 : f32
    %103 = vector.broadcast %cst_40 : f32 to vector<8x1xf32>
    %104 = arith.addf %100, %103 : vector<8x1xf32>
    %105 = math.rsqrt %104 : vector<8x1xf32>
    %106 = vector.broadcast %105 : vector<8x1xf32> to vector<8x32xf32>
    %107 = arith.mulf %102, %106 : vector<8x32xf32>
    %c0_41 = arith.constant 0 : index
    %c0_42 = arith.constant 0 : index
    %c0_43 = arith.constant 0 : index
    %108 = vector.load %arg7[%c0_41, %c0_42, %c0_43] : memref<7x1x32xf32, #tpu.memory_space<vmem>>, vector<1x1x32xf32>
    %109 = vector.shape_cast %108 : vector<1x1x32xf32> to vector<1x32xf32>
    %110 = vector.broadcast %109 : vector<1x32xf32> to vector<8x32xf32>
    %111 = arith.mulf %107, %110 : vector<8x32xf32>
    %c0_44 = arith.constant 0 : index
    %c0_45 = arith.constant 0 : index
    %c0_46 = arith.constant 0 : index
    %112 = vector.load %arg8[%c0_44, %c0_45, %c0_46] : memref<7x1x32xf32, #tpu.memory_space<vmem>>, vector<1x1x32xf32>
    %113 = vector.shape_cast %112 : vector<1x1x32xf32> to vector<1x32xf32>
    %114 = vector.broadcast %113 : vector<1x32xf32> to vector<8x32xf32>
    %115 = arith.addf %111, %114 : vector<8x32xf32>
    %c0_47 = arith.constant 0 : index
    %c0_48 = arith.constant 0 : index
    %c0_49 = arith.constant 0 : index
    %116 = vector.load %arg9[%c0_47, %c0_48, %c0_49] : memref<2x32x64xf32, #tpu.memory_space<vmem>>, vector<1x32x64xf32>
    %117 = vector.shape_cast %116 : vector<1x32x64xf32> to vector<32x64xf32>
    %cst_50 = arith.constant dense<0.000000e+00> : vector<8x64xf32>
    %118 = tpu.matmul %115, %117, %cst_50 {dimension_numbers = #tpu.dot_dimension_numbers<[1], [0], [0], [1], [0, 0, 1, 1], [], []>} : vector<8x32xf32>, vector<32x64xf32>, vector<8x64xf32> -> vector<8x64xf32>
    %c0_51 = arith.constant 0 : index
    %c0_52 = arith.constant 0 : index
    %c0_53 = arith.constant 0 : index
    %119 = vector.load %arg10[%c0_51, %c0_52, %c0_53] : memref<2x1x64xf32, #tpu.memory_space<vmem>>, vector<1x1x64xf32>
    %120 = vector.shape_cast %119 : vector<1x1x64xf32> to vector<1x64xf32>
    %121 = vector.broadcast %120 : vector<1x64xf32> to vector<8x64xf32>
    %122 = arith.addf %118, %121 : vector<8x64xf32>
    %cst_54 = arith.constant 0.000000e+00 : f32
    %123 = vector.broadcast %cst_54 : f32 to vector<8x64xf32>
    %124 = arith.maximumf %122, %123 : vector<8x64xf32>
    %c0_55 = arith.constant 0 : index
    %c0_56 = arith.constant 0 : index
    %c0_57 = arith.constant 0 : index
    %125 = vector.load %arg11[%c0_55, %c0_56, %c0_57] : memref<2x64x32xf32, #tpu.memory_space<vmem>>, vector<1x64x32xf32>
    %126 = vector.shape_cast %125 : vector<1x64x32xf32> to vector<64x32xf32>
    %cst_58 = arith.constant dense<0.000000e+00> : vector<8x32xf32>
    %127 = tpu.matmul %124, %126, %cst_58 {dimension_numbers = #tpu.dot_dimension_numbers<[1], [0], [0], [1], [0, 0, 1, 1], [], []>} : vector<8x64xf32>, vector<64x32xf32>, vector<8x32xf32> -> vector<8x32xf32>
    %c0_59 = arith.constant 0 : index
    %c0_60 = arith.constant 0 : index
    %c0_61 = arith.constant 0 : index
    %128 = vector.load %arg12[%c0_59, %c0_60, %c0_61] : memref<2x1x32xf32, #tpu.memory_space<vmem>>, vector<1x1x32xf32>
    %129 = vector.shape_cast %128 : vector<1x1x32xf32> to vector<1x32xf32>
    %130 = vector.broadcast %129 : vector<1x32xf32> to vector<8x32xf32>
    %131 = arith.addf %127, %130 : vector<8x32xf32>
    %132 = arith.addf %115, %131 : vector<8x32xf32>
    %cst_62 = arith.constant dense<0.000000e+00> : vector<8xf32>
    %133 = vector.multi_reduction <add>, %132, %cst_62 [1] : vector<8x32xf32> to vector<8xf32>
    %134 = vector.shape_cast %133 : vector<8xf32> to vector<8x1xf32>
    %cst_63 = arith.constant 3.200000e+01 : f32
    %135 = vector.broadcast %cst_63 : f32 to vector<8x1xf32>
    %136 = arith.divf %134, %135 : vector<8x1xf32>
    %137 = vector.broadcast %136 : vector<8x1xf32> to vector<8x32xf32>
    %138 = arith.subf %132, %137 : vector<8x32xf32>
    %139 = arith.mulf %138, %138 : vector<8x32xf32>
    %cst_64 = arith.constant dense<0.000000e+00> : vector<8xf32>
    %140 = vector.multi_reduction <add>, %139, %cst_64 [1] : vector<8x32xf32> to vector<8xf32>
    %141 = vector.shape_cast %140 : vector<8xf32> to vector<8x1xf32>
    %cst_65 = arith.constant 3.200000e+01 : f32
    %142 = vector.broadcast %cst_65 : f32 to vector<8x1xf32>
    %143 = arith.divf %141, %142 : vector<8x1xf32>
    %144 = vector.broadcast %136 : vector<8x1xf32> to vector<8x32xf32>
    %145 = arith.subf %132, %144 : vector<8x32xf32>
    %cst_66 = arith.constant 9.99999974E-6 : f32
    %146 = vector.broadcast %cst_66 : f32 to vector<8x1xf32>
    %147 = arith.addf %143, %146 : vector<8x1xf32>
    %148 = math.rsqrt %147 : vector<8x1xf32>
    %149 = vector.broadcast %148 : vector<8x1xf32> to vector<8x32xf32>
    %150 = arith.mulf %145, %149 : vector<8x32xf32>
    %c1 = arith.constant 1 : index
    %c0_67 = arith.constant 0 : index
    %c0_68 = arith.constant 0 : index
    %151 = vector.load %arg7[%c1, %c0_67, %c0_68] : memref<7x1x32xf32, #tpu.memory_space<vmem>>, vector<1x1x32xf32>
    %152 = vector.shape_cast %151 : vector<1x1x32xf32> to vector<1x32xf32>
    %153 = vector.broadcast %152 : vector<1x32xf32> to vector<8x32xf32>
    %154 = arith.mulf %150, %153 : vector<8x32xf32>
    %c1_69 = arith.constant 1 : index
    %c0_70 = arith.constant 0 : index
    %c0_71 = arith.constant 0 : index
    %155 = vector.load %arg8[%c1_69, %c0_70, %c0_71] : memref<7x1x32xf32, #tpu.memory_space<vmem>>, vector<1x1x32xf32>
    %156 = vector.shape_cast %155 : vector<1x1x32xf32> to vector<1x32xf32>
    %157 = vector.broadcast %156 : vector<1x32xf32> to vector<8x32xf32>
    %158 = arith.addf %154, %157 : vector<8x32xf32>
    %cst_72 = arith.constant dense<0.000000e+00> : vector<8xf32>
    %159 = vector.multi_reduction <add>, %158, %cst_72 [1] : vector<8x32xf32> to vector<8xf32>
    %160 = vector.shape_cast %159 : vector<8xf32> to vector<8x1xf32>
    %cst_73 = arith.constant 3.200000e+01 : f32
    %161 = vector.broadcast %cst_73 : f32 to vector<8x1xf32>
    %162 = arith.divf %160, %161 : vector<8x1xf32>
    %163 = vector.broadcast %162 : vector<8x1xf32> to vector<8x32xf32>
    %164 = arith.subf %158, %163 : vector<8x32xf32>
    %165 = arith.mulf %164, %164 : vector<8x32xf32>
    %cst_74 = arith.constant dense<0.000000e+00> : vector<8xf32>
    %166 = vector.multi_reduction <add>, %165, %cst_74 [1] : vector<8x32xf32> to vector<8xf32>
    %167 = vector.shape_cast %166 : vector<8xf32> to vector<8x1xf32>
    %cst_75 = arith.constant 3.200000e+01 : f32
    %168 = vector.broadcast %cst_75 : f32 to vector<8x1xf32>
    %169 = arith.divf %167, %168 : vector<8x1xf32>
    %170 = vector.broadcast %162 : vector<8x1xf32> to vector<8x32xf32>
    %171 = arith.subf %158, %170 : vector<8x32xf32>
    %cst_76 = arith.constant 9.99999974E-6 : f32
    %172 = vector.broadcast %cst_76 : f32 to vector<8x1xf32>
    %173 = arith.addf %169, %172 : vector<8x1xf32>
    %174 = math.rsqrt %173 : vector<8x1xf32>
    %175 = vector.broadcast %174 : vector<8x1xf32> to vector<8x32xf32>
    %176 = arith.mulf %171, %175 : vector<8x32xf32>
    %c2 = arith.constant 2 : index
    %c0_77 = arith.constant 0 : index
    %c0_78 = arith.constant 0 : index
    %177 = vector.load %arg7[%c2, %c0_77, %c0_78] : memref<7x1x32xf32, #tpu.memory_space<vmem>>, vector<1x1x32xf32>
    %178 = vector.shape_cast %177 : vector<1x1x32xf32> to vector<1x32xf32>
    %179 = vector.broadcast %178 : vector<1x32xf32> to vector<8x32xf32>
    %180 = arith.mulf %176, %179 : vector<8x32xf32>
    %c2_79 = arith.constant 2 : index
    %c0_80 = arith.constant 0 : index
    %c0_81 = arith.constant 0 : index
    %181 = vector.load %arg8[%c2_79, %c0_80, %c0_81] : memref<7x1x32xf32, #tpu.memory_space<vmem>>, vector<1x1x32xf32>
    %182 = vector.shape_cast %181 : vector<1x1x32xf32> to vector<1x32xf32>
    %183 = vector.broadcast %182 : vector<1x32xf32> to vector<8x32xf32>
    %184 = arith.addf %180, %183 : vector<8x32xf32>
    %c0_82 = arith.constant 0 : index
    %c0_83 = arith.constant 0 : index
    %c0_84 = arith.constant 0 : index
    %185 = vector.load %arg2[%c0_82, %c0_83, %c0_84] : memref<1x8x32xf32, #tpu.memory_space<vmem>>, vector<1x8x32xf32>
    %186 = vector.shape_cast %185 : vector<1x8x32xf32> to vector<8x32xf32>
    %c1_85 = arith.constant 1 : index
    %c0_86 = arith.constant 0 : index
    %c0_87 = arith.constant 0 : index
    %187 = vector.load %arg3[%c1_85, %c0_86, %c0_87] : memref<3x32x96xf32, #tpu.memory_space<vmem>>, vector<1x32x96xf32>
    %188 = vector.shape_cast %187 : vector<1x32x96xf32> to vector<32x96xf32>
    %cst_88 = arith.constant dense<0.000000e+00> : vector<8x96xf32>
    %189 = tpu.matmul %186, %188, %cst_88 {dimension_numbers = #tpu.dot_dimension_numbers<[1], [0], [0], [1], [0, 0, 1, 1], [], []>} : vector<8x32xf32>, vector<32x96xf32>, vector<8x96xf32> -> vector<8x96xf32>
    %c1_89 = arith.constant 1 : index
    %c0_90 = arith.constant 0 : index
    %c0_91 = arith.constant 0 : index
    %190 = vector.load %arg4[%c1_89, %c0_90, %c0_91] : memref<3x1x96xf32, #tpu.memory_space<vmem>>, vector<1x1x96xf32>
    %191 = vector.shape_cast %190 : vector<1x1x96xf32> to vector<1x96xf32>
    %192 = vector.broadcast %191 : vector<1x96xf32> to vector<8x96xf32>
    %193 = arith.addf %189, %192 : vector<8x96xf32>
    %194 = vector.extract_strided_slice %193 {offsets = [0, 0], sizes = [8, 32], strides = [1, 1]} : vector<8x96xf32> to vector<8x32xf32>
    %195 = vector.extract_strided_slice %193 {offsets = [0, 32], sizes = [8, 32], strides = [1, 1]} : vector<8x96xf32> to vector<8x32xf32>
    %196 = vector.extract_strided_slice %193 {offsets = [0, 64], sizes = [8, 32], strides = [1, 1]} : vector<8x96xf32> to vector<8x32xf32>
    %197 = vector.extract_strided_slice %194 {offsets = [0, 0], sizes = [8, 4], strides = [1, 1]} : vector<8x32xf32> to vector<8x4xf32>
    %198 = vector.extract_strided_slice %195 {offsets = [0, 0], sizes = [8, 4], strides = [1, 1]} : vector<8x32xf32> to vector<8x4xf32>
    %cst_92 = arith.constant dense<0.000000e+00> : vector<8x8xf32>
    %199 = tpu.matmul %197, %198, %cst_92 {dimension_numbers = #tpu.dot_dimension_numbers<[1], [1], [0], [0], [0, 0, 1, 0], [], []>} : vector<8x4xf32>, vector<8x4xf32>, vector<8x8xf32> -> vector<8x8xf32>
    %200 = vector.extract_strided_slice %194 {offsets = [0, 4], sizes = [8, 4], strides = [1, 1]} : vector<8x32xf32> to vector<8x4xf32>
    %201 = vector.extract_strided_slice %195 {offsets = [0, 4], sizes = [8, 4], strides = [1, 1]} : vector<8x32xf32> to vector<8x4xf32>
    %cst_93 = arith.constant dense<0.000000e+00> : vector<8x8xf32>
    %202 = tpu.matmul %200, %201, %cst_93 {dimension_numbers = #tpu.dot_dimension_numbers<[1], [1], [0], [0], [0, 0, 1, 0], [], []>} : vector<8x4xf32>, vector<8x4xf32>, vector<8x8xf32> -> vector<8x8xf32>
    %203 = vector.extract_strided_slice %194 {offsets = [0, 8], sizes = [8, 4], strides = [1, 1]} : vector<8x32xf32> to vector<8x4xf32>
    %204 = vector.extract_strided_slice %195 {offsets = [0, 8], sizes = [8, 4], strides = [1, 1]} : vector<8x32xf32> to vector<8x4xf32>
    %cst_94 = arith.constant dense<0.000000e+00> : vector<8x8xf32>
    %205 = tpu.matmul %203, %204, %cst_94 {dimension_numbers = #tpu.dot_dimension_numbers<[1], [1], [0], [0], [0, 0, 1, 0], [], []>} : vector<8x4xf32>, vector<8x4xf32>, vector<8x8xf32> -> vector<8x8xf32>
    %206 = vector.extract_strided_slice %194 {offsets = [0, 12], sizes = [8, 4], strides = [1, 1]} : vector<8x32xf32> to vector<8x4xf32>
    %207 = vector.extract_strided_slice %195 {offsets = [0, 12], sizes = [8, 4], strides = [1, 1]} : vector<8x32xf32> to vector<8x4xf32>
    %cst_95 = arith.constant dense<0.000000e+00> : vector<8x8xf32>
    %208 = tpu.matmul %206, %207, %cst_95 {dimension_numbers = #tpu.dot_dimension_numbers<[1], [1], [0], [0], [0, 0, 1, 0], [], []>} : vector<8x4xf32>, vector<8x4xf32>, vector<8x8xf32> -> vector<8x8xf32>
    %209 = vector.extract_strided_slice %194 {offsets = [0, 16], sizes = [8, 4], strides = [1, 1]} : vector<8x32xf32> to vector<8x4xf32>
    %210 = vector.extract_strided_slice %195 {offsets = [0, 16], sizes = [8, 4], strides = [1, 1]} : vector<8x32xf32> to vector<8x4xf32>
    %cst_96 = arith.constant dense<0.000000e+00> : vector<8x8xf32>
    %211 = tpu.matmul %209, %210, %cst_96 {dimension_numbers = #tpu.dot_dimension_numbers<[1], [1], [0], [0], [0, 0, 1, 0], [], []>} : vector<8x4xf32>, vector<8x4xf32>, vector<8x8xf32> -> vector<8x8xf32>
    %212 = vector.extract_strided_slice %194 {offsets = [0, 20], sizes = [8, 4], strides = [1, 1]} : vector<8x32xf32> to vector<8x4xf32>
    %213 = vector.extract_strided_slice %195 {offsets = [0, 20], sizes = [8, 4], strides = [1, 1]} : vector<8x32xf32> to vector<8x4xf32>
    %cst_97 = arith.constant dense<0.000000e+00> : vector<8x8xf32>
    %214 = tpu.matmul %212, %213, %cst_97 {dimension_numbers = #tpu.dot_dimension_numbers<[1], [1], [0], [0], [0, 0, 1, 0], [], []>} : vector<8x4xf32>, vector<8x4xf32>, vector<8x8xf32> -> vector<8x8xf32>
    %215 = vector.extract_strided_slice %194 {offsets = [0, 24], sizes = [8, 4], strides = [1, 1]} : vector<8x32xf32> to vector<8x4xf32>
    %216 = vector.extract_strided_slice %195 {offsets = [0, 24], sizes = [8, 4], strides = [1, 1]} : vector<8x32xf32> to vector<8x4xf32>
    %cst_98 = arith.constant dense<0.000000e+00> : vector<8x8xf32>
    %217 = tpu.matmul %215, %216, %cst_98 {dimension_numbers = #tpu.dot_dimension_numbers<[1], [1], [0], [0], [0, 0, 1, 0], [], []>} : vector<8x4xf32>, vector<8x4xf32>, vector<8x8xf32> -> vector<8x8xf32>
    %218 = vector.extract_strided_slice %194 {offsets = [0, 28], sizes = [8, 4], strides = [1, 1]} : vector<8x32xf32> to vector<8x4xf32>
    %219 = vector.extract_strided_slice %195 {offsets = [0, 28], sizes = [8, 4], strides = [1, 1]} : vector<8x32xf32> to vector<8x4xf32>
    %cst_99 = arith.constant dense<0.000000e+00> : vector<8x8xf32>
    %220 = tpu.matmul %218, %219, %cst_99 {dimension_numbers = #tpu.dot_dimension_numbers<[1], [1], [0], [0], [0, 0, 1, 0], [], []>} : vector<8x4xf32>, vector<8x4xf32>, vector<8x8xf32> -> vector<8x8xf32>
    %221 = tpu.concatenate %199, %202, %205, %208, %211, %214, %217, %220 in 0 : vector<8x8xf32>, vector<8x8xf32>, vector<8x8xf32>, vector<8x8xf32>, vector<8x8xf32>, vector<8x8xf32>, vector<8x8xf32>, vector<8x8xf32> -> vector<64x8xf32>
    %cst_100 = arith.constant 5.000000e-01 : f32
    %222 = vector.broadcast %cst_100 : f32 to vector<64x8xf32>
    %223 = arith.mulf %221, %222 : vector<64x8xf32>
    %cst_101 = arith.constant dense<0xFF800000> : vector<64xf32>
    %224 = vector.multi_reduction <maximumf>, %223, %cst_101 [1] : vector<64x8xf32> to vector<64xf32>
    %225 = vector.shape_cast %224 : vector<64xf32> to vector<64x1xf32>
    %226 = vector.broadcast %225 : vector<64x1xf32> to vector<64x8xf32>
    %227 = arith.subf %223, %226 : vector<64x8xf32>
    %228 = math.exp %227 : vector<64x8xf32>
    %cst_102 = arith.constant dense<0.000000e+00> : vector<64xf32>
    %229 = vector.multi_reduction <add>, %228, %cst_102 [1] : vector<64x8xf32> to vector<64xf32>
    %230 = vector.shape_cast %229 : vector<64xf32> to vector<64x1xf32>
    %231 = tpu.reciprocal %230 {approx = true} : vector<64x1xf32> -> vector<64x1xf32>
    %232 = vector.broadcast %231 : vector<64x1xf32> to vector<64x8xf32>
    %233 = arith.mulf %228, %232 : vector<64x8xf32>
    %234 = vector.extract_strided_slice %233 {offsets = [0, 0], sizes = [8, 8], strides = [1, 1]} : vector<64x8xf32> to vector<8x8xf32>
    %235 = vector.extract_strided_slice %196 {offsets = [0, 0], sizes = [8, 4], strides = [1, 1]} : vector<8x32xf32> to vector<8x4xf32>
    %cst_103 = arith.constant dense<0.000000e+00> : vector<8x4xf32>
    %236 = tpu.matmul %234, %235, %cst_103 {dimension_numbers = #tpu.dot_dimension_numbers<[1], [0], [0], [1], [0, 0, 1, 1], [], []>} : vector<8x8xf32>, vector<8x4xf32>, vector<8x4xf32> -> vector<8x4xf32>
    %237 = vector.extract_strided_slice %233 {offsets = [8, 0], sizes = [8, 8], strides = [1, 1]} : vector<64x8xf32> to vector<8x8xf32>
    %238 = vector.extract_strided_slice %196 {offsets = [0, 4], sizes = [8, 4], strides = [1, 1]} : vector<8x32xf32> to vector<8x4xf32>
    %cst_104 = arith.constant dense<0.000000e+00> : vector<8x4xf32>
    %239 = tpu.matmul %237, %238, %cst_104 {dimension_numbers = #tpu.dot_dimension_numbers<[1], [0], [0], [1], [0, 0, 1, 1], [], []>} : vector<8x8xf32>, vector<8x4xf32>, vector<8x4xf32> -> vector<8x4xf32>
    %240 = vector.extract_strided_slice %233 {offsets = [16, 0], sizes = [8, 8], strides = [1, 1]} : vector<64x8xf32> to vector<8x8xf32>
    %241 = vector.extract_strided_slice %196 {offsets = [0, 8], sizes = [8, 4], strides = [1, 1]} : vector<8x32xf32> to vector<8x4xf32>
    %cst_105 = arith.constant dense<0.000000e+00> : vector<8x4xf32>
    %242 = tpu.matmul %240, %241, %cst_105 {dimension_numbers = #tpu.dot_dimension_numbers<[1], [0], [0], [1], [0, 0, 1, 1], [], []>} : vector<8x8xf32>, vector<8x4xf32>, vector<8x4xf32> -> vector<8x4xf32>
    %243 = vector.extract_strided_slice %233 {offsets = [24, 0], sizes = [8, 8], strides = [1, 1]} : vector<64x8xf32> to vector<8x8xf32>
    %244 = vector.extract_strided_slice %196 {offsets = [0, 12], sizes = [8, 4], strides = [1, 1]} : vector<8x32xf32> to vector<8x4xf32>
    %cst_106 = arith.constant dense<0.000000e+00> : vector<8x4xf32>
    %245 = tpu.matmul %243, %244, %cst_106 {dimension_numbers = #tpu.dot_dimension_numbers<[1], [0], [0], [1], [0, 0, 1, 1], [], []>} : vector<8x8xf32>, vector<8x4xf32>, vector<8x4xf32> -> vector<8x4xf32>
    %246 = vector.extract_strided_slice %233 {offsets = [32, 0], sizes = [8, 8], strides = [1, 1]} : vector<64x8xf32> to vector<8x8xf32>
    %247 = vector.extract_strided_slice %196 {offsets = [0, 16], sizes = [8, 4], strides = [1, 1]} : vector<8x32xf32> to vector<8x4xf32>
    %cst_107 = arith.constant dense<0.000000e+00> : vector<8x4xf32>
    %248 = tpu.matmul %246, %247, %cst_107 {dimension_numbers = #tpu.dot_dimension_numbers<[1], [0], [0], [1], [0, 0, 1, 1], [], []>} : vector<8x8xf32>, vector<8x4xf32>, vector<8x4xf32> -> vector<8x4xf32>
    %249 = vector.extract_strided_slice %233 {offsets = [40, 0], sizes = [8, 8], strides = [1, 1]} : vector<64x8xf32> to vector<8x8xf32>
    %250 = vector.extract_strided_slice %196 {offsets = [0, 20], sizes = [8, 4], strides = [1, 1]} : vector<8x32xf32> to vector<8x4xf32>
    %cst_108 = arith.constant dense<0.000000e+00> : vector<8x4xf32>
    %251 = tpu.matmul %249, %250, %cst_108 {dimension_numbers = #tpu.dot_dimension_numbers<[1], [0], [0], [1], [0, 0, 1, 1], [], []>} : vector<8x8xf32>, vector<8x4xf32>, vector<8x4xf32> -> vector<8x4xf32>
    %252 = vector.extract_strided_slice %233 {offsets = [48, 0], sizes = [8, 8], strides = [1, 1]} : vector<64x8xf32> to vector<8x8xf32>
    %253 = vector.extract_strided_slice %196 {offsets = [0, 24], sizes = [8, 4], strides = [1, 1]} : vector<8x32xf32> to vector<8x4xf32>
    %cst_109 = arith.constant dense<0.000000e+00> : vector<8x4xf32>
    %254 = tpu.matmul %252, %253, %cst_109 {dimension_numbers = #tpu.dot_dimension_numbers<[1], [0], [0], [1], [0, 0, 1, 1], [], []>} : vector<8x8xf32>, vector<8x4xf32>, vector<8x4xf32> -> vector<8x4xf32>
    %255 = vector.extract_strided_slice %233 {offsets = [56, 0], sizes = [8, 8], strides = [1, 1]} : vector<64x8xf32> to vector<8x8xf32>
    %256 = vector.extract_strided_slice %196 {offsets = [0, 28], sizes = [8, 4], strides = [1, 1]} : vector<8x32xf32> to vector<8x4xf32>
    %cst_110 = arith.constant dense<0.000000e+00> : vector<8x4xf32>
    %257 = tpu.matmul %255, %256, %cst_110 {dimension_numbers = #tpu.dot_dimension_numbers<[1], [0], [0], [1], [0, 0, 1, 1], [], []>} : vector<8x8xf32>, vector<8x4xf32>, vector<8x4xf32> -> vector<8x4xf32>
    %258 = tpu.concatenate %236, %239, %242, %245, %248, %251, %254, %257 in 1 : vector<8x4xf32>, vector<8x4xf32>, vector<8x4xf32>, vector<8x4xf32>, vector<8x4xf32>, vector<8x4xf32>, vector<8x4xf32>, vector<8x4xf32> -> vector<8x32xf32>
    %c1_111 = arith.constant 1 : index
    %c0_112 = arith.constant 0 : index
    %c0_113 = arith.constant 0 : index
    %259 = vector.load %arg5[%c1_111, %c0_112, %c0_113] : memref<3x32x32xf32, #tpu.memory_space<vmem>>, vector<1x32x32xf32>
    %260 = vector.shape_cast %259 : vector<1x32x32xf32> to vector<32x32xf32>
    %cst_114 = arith.constant dense<0.000000e+00> : vector<8x32xf32>
    %261 = tpu.matmul %258, %260, %cst_114 {dimension_numbers = #tpu.dot_dimension_numbers<[1], [0], [0], [1], [0, 0, 1, 1], [], []>} : vector<8x32xf32>, vector<32x32xf32>, vector<8x32xf32> -> vector<8x32xf32>
    %c1_115 = arith.constant 1 : index
    %c0_116 = arith.constant 0 : index
    %c0_117 = arith.constant 0 : index
    %262 = vector.load %arg6[%c1_115, %c0_116, %c0_117] : memref<3x1x32xf32, #tpu.memory_space<vmem>>, vector<1x1x32xf32>
    %263 = vector.shape_cast %262 : vector<1x1x32xf32> to vector<1x32xf32>
    %264 = vector.broadcast %263 : vector<1x32xf32> to vector<8x32xf32>
    %265 = arith.addf %261, %264 : vector<8x32xf32>
    %266 = arith.addf %186, %265 : vector<8x32xf32>
    %cst_118 = arith.constant dense<0.000000e+00> : vector<8xf32>
    %267 = vector.multi_reduction <add>, %266, %cst_118 [1] : vector<8x32xf32> to vector<8xf32>
    %268 = vector.shape_cast %267 : vector<8xf32> to vector<8x1xf32>
    %cst_119 = arith.constant 3.200000e+01 : f32
    %269 = vector.broadcast %cst_119 : f32 to vector<8x1xf32>
    %270 = arith.divf %268, %269 : vector<8x1xf32>
    %271 = vector.broadcast %270 : vector<8x1xf32> to vector<8x32xf32>
    %272 = arith.subf %266, %271 : vector<8x32xf32>
    %273 = arith.mulf %272, %272 : vector<8x32xf32>
    %cst_120 = arith.constant dense<0.000000e+00> : vector<8xf32>
    %274 = vector.multi_reduction <add>, %273, %cst_120 [1] : vector<8x32xf32> to vector<8xf32>
    %275 = vector.shape_cast %274 : vector<8xf32> to vector<8x1xf32>
    %cst_121 = arith.constant 3.200000e+01 : f32
    %276 = vector.broadcast %cst_121 : f32 to vector<8x1xf32>
    %277 = arith.divf %275, %276 : vector<8x1xf32>
    %278 = vector.broadcast %270 : vector<8x1xf32> to vector<8x32xf32>
    %279 = arith.subf %266, %278 : vector<8x32xf32>
    %cst_122 = arith.constant 9.99999974E-6 : f32
    %280 = vector.broadcast %cst_122 : f32 to vector<8x1xf32>
    %281 = arith.addf %277, %280 : vector<8x1xf32>
    %282 = math.rsqrt %281 : vector<8x1xf32>
    %283 = vector.broadcast %282 : vector<8x1xf32> to vector<8x32xf32>
    %284 = arith.mulf %279, %283 : vector<8x32xf32>
    %c3 = arith.constant 3 : index
    %c0_123 = arith.constant 0 : index
    %c0_124 = arith.constant 0 : index
    %285 = vector.load %arg7[%c3, %c0_123, %c0_124] : memref<7x1x32xf32, #tpu.memory_space<vmem>>, vector<1x1x32xf32>
    %286 = vector.shape_cast %285 : vector<1x1x32xf32> to vector<1x32xf32>
    %287 = vector.broadcast %286 : vector<1x32xf32> to vector<8x32xf32>
    %288 = arith.mulf %284, %287 : vector<8x32xf32>
    %c3_125 = arith.constant 3 : index
    %c0_126 = arith.constant 0 : index
    %c0_127 = arith.constant 0 : index
    %289 = vector.load %arg8[%c3_125, %c0_126, %c0_127] : memref<7x1x32xf32, #tpu.memory_space<vmem>>, vector<1x1x32xf32>
    %290 = vector.shape_cast %289 : vector<1x1x32xf32> to vector<1x32xf32>
    %291 = vector.broadcast %290 : vector<1x32xf32> to vector<8x32xf32>
    %292 = arith.addf %288, %291 : vector<8x32xf32>
    %c2_128 = arith.constant 2 : index
    %c0_129 = arith.constant 0 : index
    %c0_130 = arith.constant 0 : index
    %293 = vector.load %arg3[%c2_128, %c0_129, %c0_130] : memref<3x32x96xf32, #tpu.memory_space<vmem>>, vector<1x32x96xf32>
    %294 = vector.shape_cast %293 : vector<1x32x96xf32> to vector<32x96xf32>
    %cst_131 = arith.constant dense<0.000000e+00> : vector<8x96xf32>
    %295 = tpu.matmul %292, %294, %cst_131 {dimension_numbers = #tpu.dot_dimension_numbers<[1], [0], [0], [1], [0, 0, 1, 1], [], []>} : vector<8x32xf32>, vector<32x96xf32>, vector<8x96xf32> -> vector<8x96xf32>
    %c2_132 = arith.constant 2 : index
    %c0_133 = arith.constant 0 : index
    %c0_134 = arith.constant 0 : index
    %296 = vector.load %arg4[%c2_132, %c0_133, %c0_134] : memref<3x1x96xf32, #tpu.memory_space<vmem>>, vector<1x1x96xf32>
    %297 = vector.shape_cast %296 : vector<1x1x96xf32> to vector<1x96xf32>
    %298 = vector.broadcast %297 : vector<1x96xf32> to vector<8x96xf32>
    %299 = arith.addf %295, %298 : vector<8x96xf32>
    %c2_135 = arith.constant 2 : index
    %c0_136 = arith.constant 0 : index
    %c0_137 = arith.constant 0 : index
    %300 = vector.load %arg3[%c2_135, %c0_136, %c0_137] : memref<3x32x96xf32, #tpu.memory_space<vmem>>, vector<1x32x96xf32>
    %301 = vector.shape_cast %300 : vector<1x32x96xf32> to vector<32x96xf32>
    %cst_138 = arith.constant dense<0.000000e+00> : vector<8x96xf32>
    %302 = tpu.matmul %184, %301, %cst_138 {dimension_numbers = #tpu.dot_dimension_numbers<[1], [0], [0], [1], [0, 0, 1, 1], [], []>} : vector<8x32xf32>, vector<32x96xf32>, vector<8x96xf32> -> vector<8x96xf32>
    %c2_139 = arith.constant 2 : index
    %c0_140 = arith.constant 0 : index
    %c0_141 = arith.constant 0 : index
    %303 = vector.load %arg4[%c2_139, %c0_140, %c0_141] : memref<3x1x96xf32, #tpu.memory_space<vmem>>, vector<1x1x96xf32>
    %304 = vector.shape_cast %303 : vector<1x1x96xf32> to vector<1x96xf32>
    %305 = vector.broadcast %304 : vector<1x96xf32> to vector<8x96xf32>
    %306 = arith.addf %302, %305 : vector<8x96xf32>
    %307 = vector.extract_strided_slice %299 {offsets = [0, 0], sizes = [8, 32], strides = [1, 1]} : vector<8x96xf32> to vector<8x32xf32>
    %308 = vector.extract_strided_slice %306 {offsets = [0, 32], sizes = [8, 32], strides = [1, 1]} : vector<8x96xf32> to vector<8x32xf32>
    %309 = vector.extract_strided_slice %306 {offsets = [0, 64], sizes = [8, 32], strides = [1, 1]} : vector<8x96xf32> to vector<8x32xf32>
    %310 = vector.extract_strided_slice %307 {offsets = [0, 0], sizes = [8, 4], strides = [1, 1]} : vector<8x32xf32> to vector<8x4xf32>
    %311 = vector.extract_strided_slice %308 {offsets = [0, 0], sizes = [8, 4], strides = [1, 1]} : vector<8x32xf32> to vector<8x4xf32>
    %cst_142 = arith.constant dense<0.000000e+00> : vector<8x8xf32>
    %312 = tpu.matmul %310, %311, %cst_142 {dimension_numbers = #tpu.dot_dimension_numbers<[1], [1], [0], [0], [0, 0, 1, 0], [], []>} : vector<8x4xf32>, vector<8x4xf32>, vector<8x8xf32> -> vector<8x8xf32>
    %313 = vector.extract_strided_slice %307 {offsets = [0, 4], sizes = [8, 4], strides = [1, 1]} : vector<8x32xf32> to vector<8x4xf32>
    %314 = vector.extract_strided_slice %308 {offsets = [0, 4], sizes = [8, 4], strides = [1, 1]} : vector<8x32xf32> to vector<8x4xf32>
    %cst_143 = arith.constant dense<0.000000e+00> : vector<8x8xf32>
    %315 = tpu.matmul %313, %314, %cst_143 {dimension_numbers = #tpu.dot_dimension_numbers<[1], [1], [0], [0], [0, 0, 1, 0], [], []>} : vector<8x4xf32>, vector<8x4xf32>, vector<8x8xf32> -> vector<8x8xf32>
    %316 = vector.extract_strided_slice %307 {offsets = [0, 8], sizes = [8, 4], strides = [1, 1]} : vector<8x32xf32> to vector<8x4xf32>
    %317 = vector.extract_strided_slice %308 {offsets = [0, 8], sizes = [8, 4], strides = [1, 1]} : vector<8x32xf32> to vector<8x4xf32>
    %cst_144 = arith.constant dense<0.000000e+00> : vector<8x8xf32>
    %318 = tpu.matmul %316, %317, %cst_144 {dimension_numbers = #tpu.dot_dimension_numbers<[1], [1], [0], [0], [0, 0, 1, 0], [], []>} : vector<8x4xf32>, vector<8x4xf32>, vector<8x8xf32> -> vector<8x8xf32>
    %319 = vector.extract_strided_slice %307 {offsets = [0, 12], sizes = [8, 4], strides = [1, 1]} : vector<8x32xf32> to vector<8x4xf32>
    %320 = vector.extract_strided_slice %308 {offsets = [0, 12], sizes = [8, 4], strides = [1, 1]} : vector<8x32xf32> to vector<8x4xf32>
    %cst_145 = arith.constant dense<0.000000e+00> : vector<8x8xf32>
    %321 = tpu.matmul %319, %320, %cst_145 {dimension_numbers = #tpu.dot_dimension_numbers<[1], [1], [0], [0], [0, 0, 1, 0], [], []>} : vector<8x4xf32>, vector<8x4xf32>, vector<8x8xf32> -> vector<8x8xf32>
    %322 = vector.extract_strided_slice %307 {offsets = [0, 16], sizes = [8, 4], strides = [1, 1]} : vector<8x32xf32> to vector<8x4xf32>
    %323 = vector.extract_strided_slice %308 {offsets = [0, 16], sizes = [8, 4], strides = [1, 1]} : vector<8x32xf32> to vector<8x4xf32>
    %cst_146 = arith.constant dense<0.000000e+00> : vector<8x8xf32>
    %324 = tpu.matmul %322, %323, %cst_146 {dimension_numbers = #tpu.dot_dimension_numbers<[1], [1], [0], [0], [0, 0, 1, 0], [], []>} : vector<8x4xf32>, vector<8x4xf32>, vector<8x8xf32> -> vector<8x8xf32>
    %325 = vector.extract_strided_slice %307 {offsets = [0, 20], sizes = [8, 4], strides = [1, 1]} : vector<8x32xf32> to vector<8x4xf32>
    %326 = vector.extract_strided_slice %308 {offsets = [0, 20], sizes = [8, 4], strides = [1, 1]} : vector<8x32xf32> to vector<8x4xf32>
    %cst_147 = arith.constant dense<0.000000e+00> : vector<8x8xf32>
    %327 = tpu.matmul %325, %326, %cst_147 {dimension_numbers = #tpu.dot_dimension_numbers<[1], [1], [0], [0], [0, 0, 1, 0], [], []>} : vector<8x4xf32>, vector<8x4xf32>, vector<8x8xf32> -> vector<8x8xf32>
    %328 = vector.extract_strided_slice %307 {offsets = [0, 24], sizes = [8, 4], strides = [1, 1]} : vector<8x32xf32> to vector<8x4xf32>
    %329 = vector.extract_strided_slice %308 {offsets = [0, 24], sizes = [8, 4], strides = [1, 1]} : vector<8x32xf32> to vector<8x4xf32>
    %cst_148 = arith.constant dense<0.000000e+00> : vector<8x8xf32>
    %330 = tpu.matmul %328, %329, %cst_148 {dimension_numbers = #tpu.dot_dimension_numbers<[1], [1], [0], [0], [0, 0, 1, 0], [], []>} : vector<8x4xf32>, vector<8x4xf32>, vector<8x8xf32> -> vector<8x8xf32>
    %331 = vector.extract_strided_slice %307 {offsets = [0, 28], sizes = [8, 4], strides = [1, 1]} : vector<8x32xf32> to vector<8x4xf32>
    %332 = vector.extract_strided_slice %308 {offsets = [0, 28], sizes = [8, 4], strides = [1, 1]} : vector<8x32xf32> to vector<8x4xf32>
    %cst_149 = arith.constant dense<0.000000e+00> : vector<8x8xf32>
    %333 = tpu.matmul %331, %332, %cst_149 {dimension_numbers = #tpu.dot_dimension_numbers<[1], [1], [0], [0], [0, 0, 1, 0], [], []>} : vector<8x4xf32>, vector<8x4xf32>, vector<8x8xf32> -> vector<8x8xf32>
    %334 = tpu.concatenate %312, %315, %318, %321, %324, %327, %330, %333 in 0 : vector<8x8xf32>, vector<8x8xf32>, vector<8x8xf32>, vector<8x8xf32>, vector<8x8xf32>, vector<8x8xf32>, vector<8x8xf32>, vector<8x8xf32> -> vector<64x8xf32>
    %cst_150 = arith.constant 5.000000e-01 : f32
    %335 = vector.broadcast %cst_150 : f32 to vector<64x8xf32>
    %336 = arith.mulf %334, %335 : vector<64x8xf32>
    %cst_151 = arith.constant dense<0xFF800000> : vector<64xf32>
    %337 = vector.multi_reduction <maximumf>, %336, %cst_151 [1] : vector<64x8xf32> to vector<64xf32>
    %338 = vector.shape_cast %337 : vector<64xf32> to vector<64x1xf32>
    %339 = vector.broadcast %338 : vector<64x1xf32> to vector<64x8xf32>
    %340 = arith.subf %336, %339 : vector<64x8xf32>
    %341 = math.exp %340 : vector<64x8xf32>
    %cst_152 = arith.constant dense<0.000000e+00> : vector<64xf32>
    %342 = vector.multi_reduction <add>, %341, %cst_152 [1] : vector<64x8xf32> to vector<64xf32>
    %343 = vector.shape_cast %342 : vector<64xf32> to vector<64x1xf32>
    %344 = tpu.reciprocal %343 {approx = true} : vector<64x1xf32> -> vector<64x1xf32>
    %345 = vector.broadcast %344 : vector<64x1xf32> to vector<64x8xf32>
    %346 = arith.mulf %341, %345 : vector<64x8xf32>
    %347 = vector.extract_strided_slice %346 {offsets = [0, 0], sizes = [8, 8], strides = [1, 1]} : vector<64x8xf32> to vector<8x8xf32>
    %348 = vector.extract_strided_slice %309 {offsets = [0, 0], sizes = [8, 4], strides = [1, 1]} : vector<8x32xf32> to vector<8x4xf32>
    %cst_153 = arith.constant dense<0.000000e+00> : vector<8x4xf32>
    %349 = tpu.matmul %347, %348, %cst_153 {dimension_numbers = #tpu.dot_dimension_numbers<[1], [0], [0], [1], [0, 0, 1, 1], [], []>} : vector<8x8xf32>, vector<8x4xf32>, vector<8x4xf32> -> vector<8x4xf32>
    %350 = vector.extract_strided_slice %346 {offsets = [8, 0], sizes = [8, 8], strides = [1, 1]} : vector<64x8xf32> to vector<8x8xf32>
    %351 = vector.extract_strided_slice %309 {offsets = [0, 4], sizes = [8, 4], strides = [1, 1]} : vector<8x32xf32> to vector<8x4xf32>
    %cst_154 = arith.constant dense<0.000000e+00> : vector<8x4xf32>
    %352 = tpu.matmul %350, %351, %cst_154 {dimension_numbers = #tpu.dot_dimension_numbers<[1], [0], [0], [1], [0, 0, 1, 1], [], []>} : vector<8x8xf32>, vector<8x4xf32>, vector<8x4xf32> -> vector<8x4xf32>
    %353 = vector.extract_strided_slice %346 {offsets = [16, 0], sizes = [8, 8], strides = [1, 1]} : vector<64x8xf32> to vector<8x8xf32>
    %354 = vector.extract_strided_slice %309 {offsets = [0, 8], sizes = [8, 4], strides = [1, 1]} : vector<8x32xf32> to vector<8x4xf32>
    %cst_155 = arith.constant dense<0.000000e+00> : vector<8x4xf32>
    %355 = tpu.matmul %353, %354, %cst_155 {dimension_numbers = #tpu.dot_dimension_numbers<[1], [0], [0], [1], [0, 0, 1, 1], [], []>} : vector<8x8xf32>, vector<8x4xf32>, vector<8x4xf32> -> vector<8x4xf32>
    %356 = vector.extract_strided_slice %346 {offsets = [24, 0], sizes = [8, 8], strides = [1, 1]} : vector<64x8xf32> to vector<8x8xf32>
    %357 = vector.extract_strided_slice %309 {offsets = [0, 12], sizes = [8, 4], strides = [1, 1]} : vector<8x32xf32> to vector<8x4xf32>
    %cst_156 = arith.constant dense<0.000000e+00> : vector<8x4xf32>
    %358 = tpu.matmul %356, %357, %cst_156 {dimension_numbers = #tpu.dot_dimension_numbers<[1], [0], [0], [1], [0, 0, 1, 1], [], []>} : vector<8x8xf32>, vector<8x4xf32>, vector<8x4xf32> -> vector<8x4xf32>
    %359 = vector.extract_strided_slice %346 {offsets = [32, 0], sizes = [8, 8], strides = [1, 1]} : vector<64x8xf32> to vector<8x8xf32>
    %360 = vector.extract_strided_slice %309 {offsets = [0, 16], sizes = [8, 4], strides = [1, 1]} : vector<8x32xf32> to vector<8x4xf32>
    %cst_157 = arith.constant dense<0.000000e+00> : vector<8x4xf32>
    %361 = tpu.matmul %359, %360, %cst_157 {dimension_numbers = #tpu.dot_dimension_numbers<[1], [0], [0], [1], [0, 0, 1, 1], [], []>} : vector<8x8xf32>, vector<8x4xf32>, vector<8x4xf32> -> vector<8x4xf32>
    %362 = vector.extract_strided_slice %346 {offsets = [40, 0], sizes = [8, 8], strides = [1, 1]} : vector<64x8xf32> to vector<8x8xf32>
    %363 = vector.extract_strided_slice %309 {offsets = [0, 20], sizes = [8, 4], strides = [1, 1]} : vector<8x32xf32> to vector<8x4xf32>
    %cst_158 = arith.constant dense<0.000000e+00> : vector<8x4xf32>
    %364 = tpu.matmul %362, %363, %cst_158 {dimension_numbers = #tpu.dot_dimension_numbers<[1], [0], [0], [1], [0, 0, 1, 1], [], []>} : vector<8x8xf32>, vector<8x4xf32>, vector<8x4xf32> -> vector<8x4xf32>
    %365 = vector.extract_strided_slice %346 {offsets = [48, 0], sizes = [8, 8], strides = [1, 1]} : vector<64x8xf32> to vector<8x8xf32>
    %366 = vector.extract_strided_slice %309 {offsets = [0, 24], sizes = [8, 4], strides = [1, 1]} : vector<8x32xf32> to vector<8x4xf32>
    %cst_159 = arith.constant dense<0.000000e+00> : vector<8x4xf32>
    %367 = tpu.matmul %365, %366, %cst_159 {dimension_numbers = #tpu.dot_dimension_numbers<[1], [0], [0], [1], [0, 0, 1, 1], [], []>} : vector<8x8xf32>, vector<8x4xf32>, vector<8x4xf32> -> vector<8x4xf32>
    %368 = vector.extract_strided_slice %346 {offsets = [56, 0], sizes = [8, 8], strides = [1, 1]} : vector<64x8xf32> to vector<8x8xf32>
    %369 = vector.extract_strided_slice %309 {offsets = [0, 28], sizes = [8, 4], strides = [1, 1]} : vector<8x32xf32> to vector<8x4xf32>
    %cst_160 = arith.constant dense<0.000000e+00> : vector<8x4xf32>
    %370 = tpu.matmul %368, %369, %cst_160 {dimension_numbers = #tpu.dot_dimension_numbers<[1], [0], [0], [1], [0, 0, 1, 1], [], []>} : vector<8x8xf32>, vector<8x4xf32>, vector<8x4xf32> -> vector<8x4xf32>
    %371 = tpu.concatenate %349, %352, %355, %358, %361, %364, %367, %370 in 1 : vector<8x4xf32>, vector<8x4xf32>, vector<8x4xf32>, vector<8x4xf32>, vector<8x4xf32>, vector<8x4xf32>, vector<8x4xf32>, vector<8x4xf32> -> vector<8x32xf32>
    %c2_161 = arith.constant 2 : index
    %c0_162 = arith.constant 0 : index
    %c0_163 = arith.constant 0 : index
    %372 = vector.load %arg5[%c2_161, %c0_162, %c0_163] : memref<3x32x32xf32, #tpu.memory_space<vmem>>, vector<1x32x32xf32>
    %373 = vector.shape_cast %372 : vector<1x32x32xf32> to vector<32x32xf32>
    %cst_164 = arith.constant dense<0.000000e+00> : vector<8x32xf32>
    %374 = tpu.matmul %371, %373, %cst_164 {dimension_numbers = #tpu.dot_dimension_numbers<[1], [0], [0], [1], [0, 0, 1, 1], [], []>} : vector<8x32xf32>, vector<32x32xf32>, vector<8x32xf32> -> vector<8x32xf32>
    %c2_165 = arith.constant 2 : index
    %c0_166 = arith.constant 0 : index
    %c0_167 = arith.constant 0 : index
    %375 = vector.load %arg6[%c2_165, %c0_166, %c0_167] : memref<3x1x32xf32, #tpu.memory_space<vmem>>, vector<1x1x32xf32>
    %376 = vector.shape_cast %375 : vector<1x1x32xf32> to vector<1x32xf32>
    %377 = vector.broadcast %376 : vector<1x32xf32> to vector<8x32xf32>
    %378 = arith.addf %374, %377 : vector<8x32xf32>
    %379 = arith.addf %292, %378 : vector<8x32xf32>
    %cst_168 = arith.constant dense<0.000000e+00> : vector<8xf32>
    %380 = vector.multi_reduction <add>, %379, %cst_168 [1] : vector<8x32xf32> to vector<8xf32>
    %381 = vector.shape_cast %380 : vector<8xf32> to vector<8x1xf32>
    %cst_169 = arith.constant 3.200000e+01 : f32
    %382 = vector.broadcast %cst_169 : f32 to vector<8x1xf32>
    %383 = arith.divf %381, %382 : vector<8x1xf32>
    %384 = vector.broadcast %383 : vector<8x1xf32> to vector<8x32xf32>
    %385 = arith.subf %379, %384 : vector<8x32xf32>
    %386 = arith.mulf %385, %385 : vector<8x32xf32>
    %cst_170 = arith.constant dense<0.000000e+00> : vector<8xf32>
    %387 = vector.multi_reduction <add>, %386, %cst_170 [1] : vector<8x32xf32> to vector<8xf32>
    %388 = vector.shape_cast %387 : vector<8xf32> to vector<8x1xf32>
    %cst_171 = arith.constant 3.200000e+01 : f32
    %389 = vector.broadcast %cst_171 : f32 to vector<8x1xf32>
    %390 = arith.divf %388, %389 : vector<8x1xf32>
    %391 = vector.broadcast %383 : vector<8x1xf32> to vector<8x32xf32>
    %392 = arith.subf %379, %391 : vector<8x32xf32>
    %cst_172 = arith.constant 9.99999974E-6 : f32
    %393 = vector.broadcast %cst_172 : f32 to vector<8x1xf32>
    %394 = arith.addf %390, %393 : vector<8x1xf32>
    %395 = math.rsqrt %394 : vector<8x1xf32>
    %396 = vector.broadcast %395 : vector<8x1xf32> to vector<8x32xf32>
    %397 = arith.mulf %392, %396 : vector<8x32xf32>
    %c4 = arith.constant 4 : index
    %c0_173 = arith.constant 0 : index
    %c0_174 = arith.constant 0 : index
    %398 = vector.load %arg7[%c4, %c0_173, %c0_174] : memref<7x1x32xf32, #tpu.memory_space<vmem>>, vector<1x1x32xf32>
    %399 = vector.shape_cast %398 : vector<1x1x32xf32> to vector<1x32xf32>
    %400 = vector.broadcast %399 : vector<1x32xf32> to vector<8x32xf32>
    %401 = arith.mulf %397, %400 : vector<8x32xf32>
    %c4_175 = arith.constant 4 : index
    %c0_176 = arith.constant 0 : index
    %c0_177 = arith.constant 0 : index
    %402 = vector.load %arg8[%c4_175, %c0_176, %c0_177] : memref<7x1x32xf32, #tpu.memory_space<vmem>>, vector<1x1x32xf32>
    %403 = vector.shape_cast %402 : vector<1x1x32xf32> to vector<1x32xf32>
    %404 = vector.broadcast %403 : vector<1x32xf32> to vector<8x32xf32>
    %405 = arith.addf %401, %404 : vector<8x32xf32>
    %c1_178 = arith.constant 1 : index
    %c0_179 = arith.constant 0 : index
    %c0_180 = arith.constant 0 : index
    %406 = vector.load %arg9[%c1_178, %c0_179, %c0_180] : memref<2x32x64xf32, #tpu.memory_space<vmem>>, vector<1x32x64xf32>
    %407 = vector.shape_cast %406 : vector<1x32x64xf32> to vector<32x64xf32>
    %cst_181 = arith.constant dense<0.000000e+00> : vector<8x64xf32>
    %408 = tpu.matmul %405, %407, %cst_181 {dimension_numbers = #tpu.dot_dimension_numbers<[1], [0], [0], [1], [0, 0, 1, 1], [], []>} : vector<8x32xf32>, vector<32x64xf32>, vector<8x64xf32> -> vector<8x64xf32>
    %c1_182 = arith.constant 1 : index
    %c0_183 = arith.constant 0 : index
    %c0_184 = arith.constant 0 : index
    %409 = vector.load %arg10[%c1_182, %c0_183, %c0_184] : memref<2x1x64xf32, #tpu.memory_space<vmem>>, vector<1x1x64xf32>
    %410 = vector.shape_cast %409 : vector<1x1x64xf32> to vector<1x64xf32>
    %411 = vector.broadcast %410 : vector<1x64xf32> to vector<8x64xf32>
    %412 = arith.addf %408, %411 : vector<8x64xf32>
    %cst_185 = arith.constant 0.000000e+00 : f32
    %413 = vector.broadcast %cst_185 : f32 to vector<8x64xf32>
    %414 = arith.maximumf %412, %413 : vector<8x64xf32>
    %c1_186 = arith.constant 1 : index
    %c0_187 = arith.constant 0 : index
    %c0_188 = arith.constant 0 : index
    %415 = vector.load %arg11[%c1_186, %c0_187, %c0_188] : memref<2x64x32xf32, #tpu.memory_space<vmem>>, vector<1x64x32xf32>
    %416 = vector.shape_cast %415 : vector<1x64x32xf32> to vector<64x32xf32>
    %cst_189 = arith.constant dense<0.000000e+00> : vector<8x32xf32>
    %417 = tpu.matmul %414, %416, %cst_189 {dimension_numbers = #tpu.dot_dimension_numbers<[1], [0], [0], [1], [0, 0, 1, 1], [], []>} : vector<8x64xf32>, vector<64x32xf32>, vector<8x32xf32> -> vector<8x32xf32>
    %c1_190 = arith.constant 1 : index
    %c0_191 = arith.constant 0 : index
    %c0_192 = arith.constant 0 : index
    %418 = vector.load %arg12[%c1_190, %c0_191, %c0_192] : memref<2x1x32xf32, #tpu.memory_space<vmem>>, vector<1x1x32xf32>
    %419 = vector.shape_cast %418 : vector<1x1x32xf32> to vector<1x32xf32>
    %420 = vector.broadcast %419 : vector<1x32xf32> to vector<8x32xf32>
    %421 = arith.addf %417, %420 : vector<8x32xf32>
    %422 = arith.addf %405, %421 : vector<8x32xf32>
    %cst_193 = arith.constant dense<0.000000e+00> : vector<8xf32>
    %423 = vector.multi_reduction <add>, %422, %cst_193 [1] : vector<8x32xf32> to vector<8xf32>
    %424 = vector.shape_cast %423 : vector<8xf32> to vector<8x1xf32>
    %cst_194 = arith.constant 3.200000e+01 : f32
    %425 = vector.broadcast %cst_194 : f32 to vector<8x1xf32>
    %426 = arith.divf %424, %425 : vector<8x1xf32>
    %427 = vector.broadcast %426 : vector<8x1xf32> to vector<8x32xf32>
    %428 = arith.subf %422, %427 : vector<8x32xf32>
    %429 = arith.mulf %428, %428 : vector<8x32xf32>
    %cst_195 = arith.constant dense<0.000000e+00> : vector<8xf32>
    %430 = vector.multi_reduction <add>, %429, %cst_195 [1] : vector<8x32xf32> to vector<8xf32>
    %431 = vector.shape_cast %430 : vector<8xf32> to vector<8x1xf32>
    %cst_196 = arith.constant 3.200000e+01 : f32
    %432 = vector.broadcast %cst_196 : f32 to vector<8x1xf32>
    %433 = arith.divf %431, %432 : vector<8x1xf32>
    %434 = vector.broadcast %426 : vector<8x1xf32> to vector<8x32xf32>
    %435 = arith.subf %422, %434 : vector<8x32xf32>
    %cst_197 = arith.constant 9.99999974E-6 : f32
    %436 = vector.broadcast %cst_197 : f32 to vector<8x1xf32>
    %437 = arith.addf %433, %436 : vector<8x1xf32>
    %438 = math.rsqrt %437 : vector<8x1xf32>
    %439 = vector.broadcast %438 : vector<8x1xf32> to vector<8x32xf32>
    %440 = arith.mulf %435, %439 : vector<8x32xf32>
    %c5 = arith.constant 5 : index
    %c0_198 = arith.constant 0 : index
    %c0_199 = arith.constant 0 : index
    %441 = vector.load %arg7[%c5, %c0_198, %c0_199] : memref<7x1x32xf32, #tpu.memory_space<vmem>>, vector<1x1x32xf32>
    %442 = vector.shape_cast %441 : vector<1x1x32xf32> to vector<1x32xf32>
    %443 = vector.broadcast %442 : vector<1x32xf32> to vector<8x32xf32>
    %444 = arith.mulf %440, %443 : vector<8x32xf32>
    %c5_200 = arith.constant 5 : index
    %c0_201 = arith.constant 0 : index
    %c0_202 = arith.constant 0 : index
    %445 = vector.load %arg8[%c5_200, %c0_201, %c0_202] : memref<7x1x32xf32, #tpu.memory_space<vmem>>, vector<1x1x32xf32>
    %446 = vector.shape_cast %445 : vector<1x1x32xf32> to vector<1x32xf32>
    %447 = vector.broadcast %446 : vector<1x32xf32> to vector<8x32xf32>
    %448 = arith.addf %444, %447 : vector<8x32xf32>
    %cst_203 = arith.constant dense<0.000000e+00> : vector<8xf32>
    %449 = vector.multi_reduction <add>, %448, %cst_203 [1] : vector<8x32xf32> to vector<8xf32>
    %450 = vector.shape_cast %449 : vector<8xf32> to vector<8x1xf32>
    %cst_204 = arith.constant 3.200000e+01 : f32
    %451 = vector.broadcast %cst_204 : f32 to vector<8x1xf32>
    %452 = arith.divf %450, %451 : vector<8x1xf32>
    %453 = vector.broadcast %452 : vector<8x1xf32> to vector<8x32xf32>
    %454 = arith.subf %448, %453 : vector<8x32xf32>
    %455 = arith.mulf %454, %454 : vector<8x32xf32>
    %cst_205 = arith.constant dense<0.000000e+00> : vector<8xf32>
    %456 = vector.multi_reduction <add>, %455, %cst_205 [1] : vector<8x32xf32> to vector<8xf32>
    %457 = vector.shape_cast %456 : vector<8xf32> to vector<8x1xf32>
    %cst_206 = arith.constant 3.200000e+01 : f32
    %458 = vector.broadcast %cst_206 : f32 to vector<8x1xf32>
    %459 = arith.divf %457, %458 : vector<8x1xf32>
    %460 = vector.broadcast %452 : vector<8x1xf32> to vector<8x32xf32>
    %461 = arith.subf %448, %460 : vector<8x32xf32>
    %cst_207 = arith.constant 9.99999974E-6 : f32
    %462 = vector.broadcast %cst_207 : f32 to vector<8x1xf32>
    %463 = arith.addf %459, %462 : vector<8x1xf32>
    %464 = math.rsqrt %463 : vector<8x1xf32>
    %465 = vector.broadcast %464 : vector<8x1xf32> to vector<8x32xf32>
    %466 = arith.mulf %461, %465 : vector<8x32xf32>
    %c6 = arith.constant 6 : index
    %c0_208 = arith.constant 0 : index
    %c0_209 = arith.constant 0 : index
    %467 = vector.load %arg7[%c6, %c0_208, %c0_209] : memref<7x1x32xf32, #tpu.memory_space<vmem>>, vector<1x1x32xf32>
    %468 = vector.shape_cast %467 : vector<1x1x32xf32> to vector<1x32xf32>
    %469 = vector.broadcast %468 : vector<1x32xf32> to vector<8x32xf32>
    %470 = arith.mulf %466, %469 : vector<8x32xf32>
    %c6_210 = arith.constant 6 : index
    %c0_211 = arith.constant 0 : index
    %c0_212 = arith.constant 0 : index
    %471 = vector.load %arg8[%c6_210, %c0_211, %c0_212] : memref<7x1x32xf32, #tpu.memory_space<vmem>>, vector<1x1x32xf32>
    %472 = vector.shape_cast %471 : vector<1x1x32xf32> to vector<1x32xf32>
    %473 = vector.broadcast %472 : vector<1x32xf32> to vector<8x32xf32>
    %474 = arith.addf %470, %473 : vector<8x32xf32>
    %c0_213 = arith.constant 0 : index
    %c0_214 = arith.constant 0 : index
    %475 = vector.load %arg13[%c0_213, %c0_214] : memref<32x128xf32, #tpu.memory_space<vmem>>, vector<32x128xf32>
    %cst_215 = arith.constant dense<0.000000e+00> : vector<8x128xf32>
    %476 = tpu.matmul %474, %475, %cst_215 {dimension_numbers = #tpu.dot_dimension_numbers<[1], [0], [0], [1], [0, 0, 1, 1], [], []>} : vector<8x32xf32>, vector<32x128xf32>, vector<8x128xf32> -> vector<8x128xf32>
    %c0_216 = arith.constant 0 : index
    %c0_217 = arith.constant 0 : index
    %477 = vector.load %arg14[%c0_216, %c0_217] : memref<1x128xf32, #tpu.memory_space<vmem>>, vector<1x128xf32>
    %478 = vector.broadcast %477 : vector<1x128xf32> to vector<8x128xf32>
    %479 = arith.addf %476, %478 : vector<8x128xf32>
    %c0_218 = arith.constant 0 : index
    %c0_219 = arith.constant 0 : index
    %c0_220 = arith.constant 0 : index
    %480 = vector.load %arg15[%c0_218, %c0_219, %c0_220] : memref<1x8x128xf32, #tpu.memory_space<vmem>>, vector<1x8x128xf32>
    %481 = vector.shape_cast %480 : vector<1x8x128xf32> to vector<8x128xf32>
    %482 = vector.shape_cast %479 : vector<8x128xf32> to vector<1x8x128xf32>
    tpu.vector_store %arg15[%c0_218, %c0_219, %c0_220], %482 {strides = array<i32>} : memref<1x8x128xf32, #tpu.memory_space<vmem>>, vector<1x8x128xf32>,
    return
  }
  func.func @transform_0(%arg0: i32) -> (i32, i32, i32) {
    %c0_i32 = arith.constant 0 : i32
    %c0_i32_0 = arith.constant 0 : i32
    %c0_i32_1 = arith.constant 0 : i32
    return %arg0, %c0_i32, %c0_i32_0 : i32, i32, i32
  }
  func.func @transform_1(%arg0: i32) -> (i32, i32, i32) {
    %c0_i32 = arith.constant 0 : i32
    %c0_i32_0 = arith.constant 0 : i32
    %c0_i32_1 = arith.constant 0 : i32
    return %arg0, %c0_i32, %c0_i32_0 : i32, i32, i32
  }
  func.func @transform_2(%arg0: i32) -> (i32, i32, i32) {
    %c0_i32 = arith.constant 0 : i32
    %c0_i32_0 = arith.constant 0 : i32
    %c0_i32_1 = arith.constant 0 : i32
    %c0_i32_2 = arith.constant 0 : i32
    return %c0_i32, %c0_i32_0, %c0_i32_1 : i32, i32, i32
  }
  func.func @transform_3(%arg0: i32) -> (i32, i32, i32) {
    %c0_i32 = arith.constant 0 : i32
    %c0_i32_0 = arith.constant 0 : i32
    %c0_i32_1 = arith.constant 0 : i32
    %c0_i32_2 = arith.constant 0 : i32
    return %c0_i32, %c0_i32_0, %c0_i32_1 : i32, i32, i32
  }
  func.func @transform_4(%arg0: i32) -> (i32, i32, i32) {
    %c0_i32 = arith.constant 0 : i32
    %c0_i32_0 = arith.constant 0 : i32
    %c0_i32_1 = arith.constant 0 : i32
    %c0_i32_2 = arith.constant 0 : i32
    return %c0_i32, %c0_i32_0, %c0_i32_1 : i32, i32, i32
  }
  func.func @transform_5(%arg0: i32) -> (i32, i32, i32) {
    %c0_i32 = arith.constant 0 : i32
    %c0_i32_0 = arith.constant 0 : i32
    %c0_i32_1 = arith.constant 0 : i32
    %c0_i32_2 = arith.constant 0 : i32
    return %c0_i32, %c0_i32_0, %c0_i32_1 : i32, i32, i32
  }
  func.func @transform_6(%arg0: i32) -> (i32, i32, i32) {
    %c0_i32 = arith.constant 0 : i32
    %c0_i32_0 = arith.constant 0 : i32
    %c0_i32_1 = arith.constant 0 : i32
    %c0_i32_2 = arith.constant 0 : i32
    return %c0_i32, %c0_i32_0, %c0_i32_1 : i32, i32, i32
  }
  func.func @transform_7(%arg0: i32) -> (i32, i32, i32) {
    %c0_i32 = arith.constant 0 : i32
    %c0_i32_0 = arith.constant 0 : i32
    %c0_i32_1 = arith.constant 0 : i32
    %c0_i32_2 = arith.constant 0 : i32
    return %c0_i32, %c0_i32_0, %c0_i32_1 : i32, i32, i32
  }
  func.func @transform_8(%arg0: i32) -> (i32, i32, i32) {
    %c0_i32 = arith.constant 0 : i32
    %c0_i32_0 = arith.constant 0 : i32
    %c0_i32_1 = arith.constant 0 : i32
    %c0_i32_2 = arith.constant 0 : i32
    return %c0_i32, %c0_i32_0, %c0_i32_1 : i32, i32, i32
  }
  func.func @transform_9(%arg0: i32) -> (i32, i32, i32) {
    %c0_i32 = arith.constant 0 : i32
    %c0_i32_0 = arith.constant 0 : i32
    %c0_i32_1 = arith.constant 0 : i32
    %c0_i32_2 = arith.constant 0 : i32
    return %c0_i32, %c0_i32_0, %c0_i32_1 : i32, i32, i32
  }
  func.func @transform_10(%arg0: i32) -> (i32, i32, i32) {
    %c0_i32 = arith.constant 0 : i32
    %c0_i32_0 = arith.constant 0 : i32
    %c0_i32_1 = arith.constant 0 : i32
    %c0_i32_2 = arith.constant 0 : i32
    return %c0_i32, %c0_i32_0, %c0_i32_1 : i32, i32, i32
  }
  func.func @transform_11(%arg0: i32) -> (i32, i32, i32) {
    %c0_i32 = arith.constant 0 : i32
    %c0_i32_0 = arith.constant 0 : i32
    %c0_i32_1 = arith.constant 0 : i32
    %c0_i32_2 = arith.constant 0 : i32
    return %c0_i32, %c0_i32_0, %c0_i32_1 : i32, i32, i32
  }
  func.func @transform_12(%arg0: i32) -> (i32, i32) {
    %c0_i32 = arith.constant 0 : i32
    %c0_i32_0 = arith.constant 0 : i32
    %c0_i32_1 = arith.constant 0 : i32
    return %c0_i32, %c0_i32_0 : i32, i32
  }
  func.func @transform_13(%arg0: i32) -> (i32, i32) {
    %c0_i32 = arith.constant 0 : i32
    %c0_i32_0 = arith.constant 0 : i32
    %c0_i32_1 = arith.constant 0 : i32
    return %c0_i32, %c0_i32_0 : i32, i32
  }
  func.func @transform_14(%arg0: i32) -> (i32, i32, i32) {
    %c0_i32 = arith.constant 0 : i32
    %c0_i32_0 = arith.constant 0 : i32
    %c0_i32_1 = arith.constant 0 : i32
    return %arg0, %c0_i32, %c0_i32_0 : i32, i32, i32
  }
}

</mosaic_0001>

<bundles_post_ra>
// kernel: nmt_forward.1
= control target key start
LH: loop header
LB: loop body
LE: loop exit
PB: predicated region body
PF: predicated region fallthrough
CT: control target
= control target key end

     0   :  { %s4198_s0 = inlined_call_operand.vmem [shape: f32[2,8,32], index: 0, kind: input, shape index: {}]   ;;  %s4199_s1 = inlined_call_operand.vmem [shape: f32[2,8,32], index: 1, kind: input, shape index: {}]   ;;  %s4200_s2 = inlined_call_operand.vmem [shape: f32[3,32,96], index: 2, kind: input, shape index: {}]   ;;  %s4201_s3 = inlined_call_operand.vmem [shape: f32[3,1,96], index: 3, kind: input, shape index: {}]   ;;  %s4202_s4 = inlined_call_operand.vmem [shape: f32[3,32,32], index: 4, kind: input, shape index: {}]   ;;  %s4203_s5 = inlined_call_operand.vmem [shape: f32[3,1,32], index: 5, kind: input, shape index: {}]   ;;  %s4204_s6 = inlined_call_operand.vmem [shape: f32[7,1,32], index: 6, kind: input, shape index: {}]   ;;  %s4205_s7 = inlined_call_operand.vmem [shape: f32[7,1,32], index: 7, kind: input, shape index: {}]   ;;  %s4206_s8 = inlined_call_operand.vmem [shape: f32[2,32,64], index: 8, kind: input, shape index: {}]   ;;  %s4207_s9 = inlined_call_operand.vmem [shape: f32[2,1,64], index: 9, kind: input, shape index: {}]   ;;  %s4208_s10 = inlined_call_operand.vmem [shape: f32[2,64,32], index: 10, kind: input, shape index: {}]   ;;  %s4209_s11 = inlined_call_operand.vmem [shape: f32[2,1,32], index: 11, kind: input, shape index: {}]   ;;  %s4210_s12 = inlined_call_operand.vmem [shape: f32[32,128], index: 12, kind: input, shape index: {}]   ;;  %s4211_s13 = inlined_call_operand.vmem [shape: f32[1,128], index: 13, kind: input, shape index: {}]   ;;  %s4212_s14 = inlined_call_operand.hbm [shape: f32[2,8,128], index: 14, kind: output, shape index: {}]  }
   0x1   :  { %4287 = sst [smem:[#allocation14_spill]] %s4198_s0 }
   0x2   :  { %4288 = sst [smem:[#allocation15_spill]] %s4199_s1 }
   0x3   :  { %4289 = sst [smem:[#allocation16_spill]] %s4206_s8 }
   0x4   :  { %4290 = sst [smem:[#allocation17_spill]] %s4207_s9 }
   0x5   :  { %4291 = sst [smem:[#allocation18_spill]] %s4208_s10 }
   0x6   :  { %4292 = sst [smem:[#allocation19_spill]] %s4210_s12 }
   0x7   :  { %4293 = sst [smem:[#allocation20_spill]] %s4211_s13 }
   0x8   :  { %4294 = sst [smem:[#allocation21_spill]] %s4212_s14 }
   0x9   :  { %19 = vsyncpa [#allocation3], 0 }
   0xa   :  { %21 = vsyncpa [#allocation3 + $0x1], 0  ;;  %s3434_s29 = smov 0   ;;  %s3436_s30 = smov 0  }
   0xb   :  { %s3438_s15 = smov 0   ;;  %s3440_s16 = smov 0  }
   0xc LB: > { %4295 = sst [smem:[#allocation5_spill]] %s3313_s29  ;;  %s3455_s17 = sadd.s32 4294967295, %s3325_s16   ;;  %s3325_s16 = sphi %s3440_s16, %s4367_s16   ;;  %s3321_s15 = sphi %s3438_s15, %s4370_s15   ;;  %s3317_s30 = sphi %s3436_s30, %s4369_s30   ;;  %s3313_s29 = sphi %s3434_s29, %s4368_s29  }
   0xd   : > { %4296 = sst [smem:[#allocation6_spill]] %s3317_s30  ;;  %s2914_s18 = sadd.s32 4294967294, %s3325_s16  }
   0xe   : > { %4297 = sst [smem:[#allocation7_spill]] %s3321_s15  ;;  %s3459_s19 = sadd.s32 1, %s3325_s16  }
   0xf   : > { %4298 = sst [smem:[#allocation8_spill]] %s3325_s16  ;;  %s338_s20 = sadd.s32 1, %s3321_s15 }
  0x10   : > { %4299 = sst [smem:[#allocation9_spill]] %s3455_s17  ;;  %s335_s21 = ssub.s32 %s3325_s16, %s3459_s19 }
  0x11   : > { %4300 = sst [smem:[#allocation10_spill]] %s3459_s19  ;;  %p348_p0 = scmp.ne.s32.totalorder %s3321_s15, %s3317_s30 }
  0x12   : > { %p336_p1 = scmp.eq.s32.totalorder %s335_s21, 0  ;;  %p349_p2 = scmp.eq.s32.totalorder %s3455_s17, 1 }
  0x13   : > { %p354_p3 = scmp.ne.s32.totalorder %s3317_s30, %s3313_s29  ;;  %p355_p4 = scmp.eq.s32.totalorder %s2914_s18, 1 }
  0x14   : > { %s3470_s22 = scalar_select %p336_p1, %s3321_s15, %s338_s20  }
  0x15   : > { %p3472_p5 = por %p349_p2, %p348_p0  ;;  %p3476_p6 = por %p355_p4, %p354_p3 }
  0x16   : > { %4301 = sst [smem:[#allocation11_spill]] %s3470_s22  ;;  %p2917_p7 = scmp.ge.s32.totalorder %s3325_s16, 1 }
  0x17   : > { %s4302_s23 = scalar_select %p3472_p5, 1, 0 }
  0x18   : > { %s4304_s24 = scalar_select %p3476_p6, 1, 0 }
  0x19   : > { %4303 = sst [smem:[#allocation12_spill]] %s4302_s23  ;;  %p423_p8 = scmp.lt.s32.totalorder %s3325_s16, 3 }
  0x1a   : > { %4305 = sst [smem:[#allocation13_spill]] %s4304_s24 }
  0x1b   : > { %p424_p9 = pnand %p2917_p7, %p423_p8 }
  0x1c   : > { %p472_p10 = scmp.lt.s32.totalorder (!%p424_p9), %s3455_s17, 1  ;;  %s4306_s0 = sld [smem:[#allocation14_spill]] (!%p424_p9) }
  0x1d   : > { %427 = sbr.rel (%p424_p9) target bundleno = 4910 (0x132e), region = 76  ;;  %s4258_s25 = smov (!%p424_p9), 96  }
  0x1e   : > { %s4214_s26 = smov (!%p424_p9), 124   ;;  %s4218_s27 = smov (!%p424_p9), 80  }
  0x1f   : > { %s4220_s28 = smov (!%p424_p9), 120   ;;  %s4222_s18 = smov (!%p424_p9), 88  }
  0x20   : > { %s4224_s20 = smov (!%p424_p9), 108   ;;  %s4307_s1 = sld [smem:[#allocation15_spill]] (!%p424_p9) }
  0x21   : > { %s4318_s24 = smov (!%p424_p9), 80   ;;  %s4321_s29 = smov (!%p424_p9), 112  }
  0x22   : > { %v490_v0 = vld [vmem:[%s4200_s2 + $0x18] sm:$0xff]  ;;  %v489_v1 = vld [vmem:[%s4200_s2 + $0x10] sm:$0xff]  ;;  %v488_v2 = vld [vmem:[%s4200_s2 + $0x8] sm:$0xff]  ;;  %s3493_s21 = scalar_select %p472_p10, %s3455_s17, 1  ;;  %vm495_vm0 = vcmask 261120   ;;  %vm522_vm1 = vcmask 31744   ;;  %v480_v25 = vlaneseq }
  0x23   : > { %511 = vmatpush.msra.mxu0 %v490_v0  ;;  %v487_v3 = vld [vmem:[%s4200_s2] sm:$0xff]  ;;  %v3344_v29 = vmov -1e+30   ;;  %vm759_vm3 = vcmask 64512   ;;  %vm1086_vm4 = vcmask 97280   ;;  %vm1088_vm5 = vcmask 130048  }
  0x24   : > { %s2919_s22 = sshll.u32 %s3493_s21, 3  ;;  %v3126_v5 = vld [vmem:[%s4201_s3] ss:$0 sm:$0xff]  ;;  %v481_v26 = vshrl.u32 %v480_v25, 7  ;;  %v483_v27 = vand.u32 127, %v480_v25  ;;  %s4268_s21 = smov 12  }
  0x25   : > { %512 = vmatpush.msra.mxu0 %v489_v1  ;;  %s475_s15 = scalar_lea.vmem %s4306_s0, %s2919_s22  ;;  %s4264_s0 = smov 16   ;;  %vm1090_vm6 = vcmask 162816   ;;  %vm1092_vm7 = vcmask 195584   ;;  %vm1094_vm8 = vcmask 228352   ;;  %vm1211_vm13 = vcmask 523264  }
  0x26   : > { %v3504_v4 = vld [vmem:[%s475_s15] sm:$0xff]  ;;  %s4216_s15 = smov 92   ;;  %vm484_vm2 = vcmp.le.s32.totalorder %v483_v27, %v481_v26  ;;  %s479_s19 = scalar_lea.vmem %s4307_s1, %s2919_s22 }
  0x27   : > { %513 = vmatpush.msra.mxu0 %v488_v2  ;;  %v485_v30 = vsel %vm484_vm2, 0.0, %v3344_v29  ;;  %s4266_s22 = smov 28   ;;  %s4319_s1 = smov 120  }
  0x28   : > { %s4322_s16 = smov 72   ;;  %s4323_s10 = sld [smem:[#allocation18_spill]] }
  0x29   : > { %514 = vmatpush.msra.mxu0 %v487_v3  ;;  %s4324_s8 = sld [smem:[#allocation16_spill]]  ;;  %s4326_s13 = smov 64  }
  0x2a   : > { %2921 = vmatmul.msk.f32.vlgmr.msra.gmra.mxu0 %vm495_vm0, %v3504_v4  ;;  %s4325_s9 = sld [smem:[#allocation17_spill]]  ;;  %s4327_s23 = smov 60  }
  0x2b   : > { %s4328_s14 = smov 52   ;;  %s4329_s17 = smov 36  }
  0x2c   : > { %s4330_s12 = smov 40   ;;  %s4331_s30 = smov 48  }
  0xa7   : > { %v516_v6 = vpop.f32.mrf.mxu0 }
  0xa8   : > { %v3511_v7 = vadd.f32 %v3126_v5, %v516_v6 }
  0xaa   : > { %520 = vrot.lane.b32.xlu2 %v3511_v7, %s4258_s25  ;;  %547 = vrot.lane.b32.xlu1 %v3511_v7, %s4214_s26  ;;  %s4226_s26 = smov 112   ;;  %s4272_s25 = smov 20  }
  0xab   : > { %549 = vrot.lane.b32.xlu0 %v3511_v7, %s4216_s15  ;;  %s4228_s15 = smov 76  }
  0xb2   : > { %633 = vrot.lane.b32.xlu2 %v3511_v7, %s4218_s27  ;;  %575 = vrot.lane.b32.xlu1 %v3511_v7, %s4220_s28  ;;  %s4230_s27 = smov 116   ;;  %s4232_s28 = smov 72  }
  0xb3   : > { %577 = vrot.lane.b32.xlu0 %v3511_v7, %s4222_s18  ;;  %s4244_s18 = smov 84  }
  0xba   : > { %659 = vrot.lane.b32.xlu2 %v3511_v7, %s4224_s20  ;;  %631 = vrot.lane.b32.xlu1 %v3511_v7, %s4226_s26  ;;  %s4240_s20 = smov 100   ;;  %s4242_s26 = smov 68  }
  0xbb   : > { %661 = vrot.lane.b32.xlu0 %v3511_v7, %s4228_s15  ;;  %s4238_s15 = smov 104  }
  0xc2   : > { %603 = vrot.lane.b32.xlu2 %v3511_v7, %s4230_s27  ;;  %689 = vrot.lane.b32.xlu1 %v3511_v7, %s4232_s28  ;;  %s4234_s27 = smov 60   ;;  %s4236_s28 = smov 64  }
  0xc3   : > { %605 = vrot.lane.b32.xlu0 %v3511_v7, %s4244_s18  ;;  %s4254_s18 = smov 36  }
  0xca   : > { %715 = vrot.lane.b32.xlu2 %v3511_v7, %s4240_s20  ;;  %717 = vrot.lane.b32.xlu1 %v3511_v7, %s4242_s26  ;;  %s4252_s20 = smov 40   ;;  %s4246_s26 = smov 56  }
  0xcb   : > { %687 = vrot.lane.b32.xlu0 %v3511_v7, %s4238_s15  ;;  %s4248_s15 = smov 44  }
  0xd2   : > { %874 = vrot.lane.b32.xlu2 %v3511_v7, %s4234_s27  ;;  %848 = vrot.lane.b32.xlu1 %v3511_v7, %s4236_s28  ;;  %s4250_s27 = smov 48   ;;  %s4256_s28 = smov 52  }
 0x104   : > { %v521_v8 = vpop.permute.xlu2 %520 }
 0x105   : > { %2922 = vmatpush.xpose.msk.msra.mxu1 %vm522_vm1, %v521_v8 }
 0x108   : > { %2923 = vmatmul.msk.f32.vlgmr.msra.gmra.mxu1 %vm522_vm1, %v3511_v7 }
 0x10c   : > { %v634_v9 = vpop.permute.xlu2 %633 }
 0x114   : > { %v660_v10 = vpop.permute.xlu2 %659 }
 0x11c   : > { %v604_v11 = vpop.permute.xlu2 %603  ;;  %v548_v12 = vpop.permute.xlu1 %547 }
 0x11d   : > { %v550_v13 = vpop.permute.xlu0 %549 }
 0x11e   : > { %2924 = vmatpush.xpose.msk.msra.mxu2 %vm522_vm1, %v550_v13 }
 0x121   : > { %2925 = vmatmul.msk.f32.vlgmr.msra.gmra.mxu2 %vm522_vm1, %v548_v12 }
 0x122   : > { %2930 = vmatpush.xpose.msk.msrb.mxu2 %vm522_vm1, %v634_v9 }
 0x124   : > { %v716_v14 = vpop.permute.xlu2 %715  ;;  %v576_v15 = vpop.permute.xlu1 %575 }
 0x125   : > { %v578_v16 = vpop.permute.xlu0 %577 }
 0x126   : > { %2926 = vmatpush.xpose.msk.msra.mxu3 %vm522_vm1, %v578_v16 }
 0x129   : > { %2927 = vmatmul.msk.f32.vlgmr.msra.gmra.mxu3 %vm522_vm1, %v576_v15 }
 0x12c   : > { %v875_v17 = vpop.permute.xlu2 %874  ;;  %v632_v18 = vpop.permute.xlu1 %631 }
 0x12d   : > { %v662_v19 = vpop.permute.xlu0 %661  ;;  %2931 = vmatmul.msk.f32.vlgmr.msrb.gmra.mxu2 %vm522_vm1, %v632_v18 }
 0x12e   : > { %2932 = vmatpush.xpose.msk.msrb.mxu3 %vm522_vm1, %v662_v19 }
 0x131   : > { %2933 = vmatmul.msk.f32.vlgmr.msrb.gmra.mxu3 %vm522_vm1, %v660_v10 }
 0x132   : > { %895 = vmatpush.msra.mxu3 %v875_v17 }
 0x134   : > { %v690_v20 = vpop.permute.xlu1 %689 }
 0x135   : > { %v606_v21 = vpop.permute.xlu0 %605  ;;  %2934 = vmatpush.xpose.msk.msra.mxu2 %vm522_vm1, %v690_v20 }
 0x136   : > { %2928 = vmatpush.xpose.msk.msrb.mxu1 %vm522_vm1, %v606_v21 }
 0x139   : > { %2929 = vmatmul.msk.f32.vlgmr.msrb.gmra.mxu1 %vm522_vm1, %v604_v11 }
 0x13c   : > { %v718_v22 = vpop.permute.xlu1 %717 }
 0x13d   : > { %v688_v23 = vpop.permute.xlu0 %687  ;;  %2936 = vmatpush.xpose.msk.msra.mxu1 %vm522_vm1, %v718_v22 }
 0x13e   : > { %2935 = vmatmul.msk.f32.vlgmr.msra.gmra.mxu2 %vm522_vm1, %v688_v23 }
 0x141   : > { %2937 = vmatmul.msk.f32.vlgmr.msra.gmra.mxu1 %vm522_vm1, %v716_v14 }
 0x144   : > { %v849_v24 = vpop.permute.xlu1 %848 }
 0x145   : > { %869 = vmatpush.msrb.mxu2 %v849_v24 }
 0x185   : > { %v544_v28 = vpop.f32.mrf.mxu1 }
 0x186   : > { %v743_v31 = vmul.f32 0.5, %v544_v28 }
 0x188   : > { %v751_v32 = vadd.f32 %v743_v31, %v485_v30 }
 0x18a   : > { %v760_v33 = vsel %vm759_vm3, %v751_v32, -inf }
 0x18b   : > { %761 = vmax.xlane.f32.xlu0 %v760_v33 }
 0x1a4   : > { %v572_v34 = vpop.f32.mrf.mxu2 }
 0x1a5   : > { %v744_v35 = vmul.f32 0.5, %v572_v34 }
 0x1a7   : > { %v752_v36 = vadd.f32 %v744_v35, %v485_v30 }
 0x1a9   : > { %v763_v37 = vsel %vm759_vm3, %v752_v36, -inf }
 0x1aa   : > { %764 = vmax.xlane.f32.xlu1 %v763_v37 }
 0x1ac   : > { %v600_v38 = vpop.f32.mrf.mxu3 }
 0x1ad   : > { %v745_v39 = vmul.f32 0.5, %v600_v38 }
 0x1af   : > { %v753_v40 = vadd.f32 %v745_v39, %v485_v30 }
 0x1b0   : > { %v656_v41 = vpop.f32.mrf.mxu2 }
 0x1b1   : > { %v747_v42 = vmul.f32 0.5, %v656_v41  ;;  %v766_v43 = vsel %vm759_vm3, %v753_v40, -inf }
 0x1b2   : > { %767 = vmax.xlane.f32.xlu2 %v766_v43 }
 0x1b3   : > { %v755_v46 = vadd.f32 %v747_v42, %v485_v30 }
 0x1b4   : > { %v684_v44 = vpop.f32.mrf.mxu3 }
 0x1b5   : > { %v748_v45 = vmul.f32 0.5, %v684_v44  ;;  %v772_v50 = vsel %vm759_vm3, %v755_v46, -inf }
 0x1b6   : > { %v628_v47 = vpop.f32.mrf.mxu1 }
 0x1b7   : > { %v746_v48 = vmul.f32 0.5, %v628_v47  ;;  %v756_v49 = vadd.f32 %v748_v45, %v485_v30 }
 0x1b9   : > { %v775_v51 = vsel %vm759_vm3, %v756_v49, -inf  ;;  %v754_v52 = vadd.f32 %v746_v48, %v485_v30 }
 0x1ba   : > { %773 = vmax.xlane.f32.xlu2 %v772_v50  ;;  %776 = vmax.xlane.f32.xlu1 %v775_v51 }
 0x1bb   : > { %v769_v53 = vsel %vm759_vm3, %v754_v52, -inf }
 0x1bc   : > { %770 = vmax.xlane.f32.xlu0 %v769_v53 }
 0x1be   : > { %v740_v54 = vpop.f32.mrf.mxu1 }
 0x1bf   : > { %v750_v55 = vmul.f32 0.5, %v740_v54 }
 0x1c1   : > { %v712_v56 = vpop.f32.mrf.mxu2  ;;  %v758_v57 = vadd.f32 %v750_v55, %v485_v30 }
 0x1c2   : > { %v749_v58 = vmul.f32 0.5, %v712_v56 }
 0x1c3   : > { %v781_v59 = vsel %vm759_vm3, %v758_v57, -inf }
 0x1c4   : > { %782 = vmax.xlane.f32.xlu0 %v781_v59  ;;  %v757_v60 = vadd.f32 %v749_v58, %v485_v30 }
 0x1c6   : > { %v778_v61 = vsel %vm759_vm3, %v757_v60, -inf }
 0x1c7   : > { %779 = vmax.xlane.f32.xlu2 %v778_v61 }
 0x1fe   : > { %v762_v62 = vpop.xlane.xlu0 %761 }
 0x1ff   : > { %v784_v63 = vsub.f32 %v751_v32, %v762_v62 }
 0x201   : > { %v792_v0 = vmul.f32 1.442695, %v784_v63 }
 0x203   : > { %3151 = vpow2.f32 %v792_v0 }
 0x209   : > { %v3572_v1 = vpop.eup %3151 }
 0x20a   : > { %v808_v2 = vsel %vm759_vm3, %v3572_v1, 0.0 }
 0x20b   : > { %809 = vadd.xlane.f32.xlu1 %v808_v2 }
 0x21d   : > { %v765_v3 = vpop.xlane.xlu1 %764 }
 0x21e   : > { %v785_v5 = vsub.f32 %v752_v36, %v765_v3 }
 0x220   : > { %v794_v6 = vmul.f32 1.442695, %v785_v5 }
 0x222   : > { %3153 = vpow2.f32 %v794_v6  ;;  %v2956_v6 = vld [vmem:[%s4200_s2 + $0x38] sm:$0xff] }
 0x225   : > { %v768_v8 = vpop.xlane.xlu2 %767 }
 0x226   : > { %v786_v9 = vsub.f32 %v753_v40, %v768_v8  ;;  %v2955_v8 = vld [vmem:[%s4200_s2 + $0x30] sm:$0xff] }
 0x228   : > { %v3576_v10 = vpop.eup %3153  ;;  %v796_v11 = vmul.f32 1.442695, %v786_v9  ;;  %v2954_v9 = vld [vmem:[%s4200_s2 + $0x28] sm:$0xff] }
 0x229   : > { %v811_v12 = vsel %vm759_vm3, %v3576_v10, 0.0 }
 0x22a   : > { %3155 = vpow2.f32 %v796_v11  ;;  %812 = vadd.xlane.f32.xlu2 %v811_v12  ;;  %v2953_v12 = vld [vmem:[%s4200_s2 + $0x20] sm:$0xff] }
 0x22d   : > { %v774_v13 = vpop.xlane.xlu2 %773  ;;  %v777_v14 = vpop.xlane.xlu1 %776 }
 0x22e   : > { %v788_v15 = vsub.f32 %v755_v46, %v774_v13  ;;  %v789_v16 = vsub.f32 %v756_v49, %v777_v14 }
 0x22f   : > { %v771_v17 = vpop.xlane.xlu0 %770 }
 0x230   : > { %v3580_v18 = vpop.eup %3155  ;;  %v800_v19 = vmul.f32 1.442695, %v788_v15  ;;  %v802_v20 = vmul.f32 1.442695, %v789_v16  ;;  %v787_v21 = vsub.f32 %v754_v52, %v771_v17 }
 0x231   : > { %v814_v22 = vsel %vm759_vm3, %v3580_v18, 0.0 }
 0x232   : > { %3157 = vpow2.f32 %v800_v19  ;;  %v798_v23 = vmul.f32 1.442695, %v787_v21  ;;  %815 = vadd.xlane.f32.xlu0 %v814_v22  ;;  %v3127_v21 = vld [vmem:[%s4201_s3 + $0x1] ss:$0 sm:$0xff]  ;;  %v1098_v22 = vld [vmem:[%s4202_s4 + $0x10] sm:$0xff] }
 0x233   : > { %3159 = vpow2.f32 %v802_v20  ;;  %v1099_v20 = vld [vmem:[%s4202_s4 + $0x18] sm:$0xff] }
 0x234   : > { %3161 = vpow2.f32 %v798_v23 }
 0x237   : > { %v783_v24 = vpop.xlane.xlu0 %782 }
 0x238   : > { %v3158_v25 = vpop.eup %3157  ;;  %v791_v26 = vsub.f32 %v758_v57, %v783_v24  ;;  %v1097_v24 = vld [vmem:[%s4202_s4 + $0x8] sm:$0xff] }
 0x239   : > { %v3584_v27 = vpop.eup %3159  ;;  %v820_v28 = vsel %vm759_vm3, %v3158_v25, 0.0 }
 0x23a   : > { %v3162_v29 = vpop.eup %3161  ;;  %v806_v30 = vmul.f32 1.442695, %v791_v26  ;;  %v823_v31 = vsel %vm759_vm3, %v3584_v27, 0.0  ;;  %v780_v32 = vpop.xlane.xlu2 %779  ;;  %821 = vadd.xlane.f32.xlu1 %v820_v28  ;;  %v1096_v26 = vld [vmem:[%s4202_s4] sm:$0xff] }
 0x23b   : > { %824 = vadd.xlane.f32.xlu0 %v823_v31  ;;  %v790_v33 = vsub.f32 %v757_v60, %v780_v32  ;;  %v817_v34 = vsel %vm759_vm3, %v3162_v29, 0.0 }
 0x23c   : > { %3163 = vpow2.f32 %v806_v30  ;;  %818 = vadd.xlane.f32.xlu2 %v817_v34 }
 0x23d   : > { %v804_v35 = vmul.f32 1.442695, %v790_v33 }
 0x23f   : > { %3165 = vpow2.f32 %v804_v35 }
 0x242   : > { %v3590_v36 = vpop.eup %3163 }
 0x243   : > { %v829_v37 = vsel %vm759_vm3, %v3590_v36, 0.0 }
 0x244   : > { %830 = vadd.xlane.f32.xlu0 %v829_v37 }
 0x245   : > { %v3594_v38 = vpop.eup %3165 }
 0x246   : > { %v826_v39 = vsel %vm759_vm3, %v3594_v38, 0.0 }
 0x24c   : > { %827 = vadd.xlane.f32.xlu0 %v826_v39 }
 0x253   : > { %952 = vrot.lane.b32.xlu1 %v3511_v7, %s4250_s27  ;;  %s4274_s27 = smov 4  }
 0x254   : > { %926 = vrot.lane.b32.xlu2 %v3511_v7, %s4256_s28  ;;  %s4270_s28 = smov 24  }
 0x25b   : > { %978 = vrot.lane.b32.xlu1 %v3511_v7, %s4248_s15  ;;  %s4314_s15 = smov 88  }
 0x25c   : > { %1004 = vrot.lane.b32.xlu2 %v3511_v7, %s4252_s20  ;;  %s4316_s20 = smov 76  }
 0x260   : > { %900 = vrot.lane.b32.xlu0 %v3511_v7, %s4246_s26  ;;  %s4313_s26 = smov 68  }
 0x263   : > { %1030 = vrot.lane.b32.xlu1 %v3511_v7, %s4254_s18  ;;  %s4315_s18 = smov 100  }
 0x27e   : > { %v810_v40 = vpop.xlane.xlu1 %809 }
 0x27f   : > { %3167 = vrcp.f32 %v810_v40 }
 0x285   : > { %v3168_v41 = vpop.eup %3167 }
 0x286   : > { %v840_v42 = vmul.f32 %v3168_v41, %v3572_v1 }
 0x288   : > { %2938 = vmatmul.msk.f32.vlgmr.msrb.gmra.mxu2 %vm759_vm3, %v840_v42 }
 0x29d   : > { %v813_v43 = vpop.xlane.xlu2 %812 }
 0x29e   : > { %3169 = vrcp.f32 %v813_v43 }
 0x2a4   : > { %v3170_v44 = vpop.eup %3169 }
 0x2a5   : > { %v841_v45 = vmul.f32 %v3170_v44, %v3576_v10  ;;  %v816_v46 = vpop.xlane.xlu0 %815  ;;  %v3638_v10 = vld [vmem:[%s479_s19] sm:$0xff]  ;;  %s4262_s19 = smov 8  }
 0x2a7   : > { %2939 = vmatmul.msk.f32.vlgmr.msra.gmra.mxu3 %vm759_vm3, %v841_v45 }
 0x2ad   : > { %v822_v51 = vpop.xlane.xlu1 %821 }
 0x2ae   : > { %v825_v50 = vpop.xlane.xlu0 %824 }
 0x2af   : > { %v819_v47 = vpop.xlane.xlu2 %818 }
 0x2b0   : > { %3171 = vrcp.f32 %v819_v47 }
 0x2b1   : > { %3173 = vrcp.f32 %v822_v51 }
 0x2b2   : > { %3175 = vrcp.f32 %v825_v50 }
 0x2b3   : > { %3177 = vrcp.f32 %v816_v46  ;;  %v3128_v46 = vld [vmem:[%s4203_s5] ss:$0 sm:$0xff] }
 0x2b6   : > { %v3172_v48 = vpop.eup %3171 }
 0x2b7   : > { %v843_v49 = vmul.f32 %v3172_v48, %v3162_v29  ;;  %v927_v7 = vpop.permute.xlu2 %926  ;;  %v831_v52 = vpop.xlane.xlu0 %830 }
 0x2b8   : > { %947 = vmatpush.msrb.mxu1 %v927_v7  ;;  %v3174_v53 = vpop.eup %3173  ;;  %3179 = vrcp.f32 %v831_v52 }
 0x2b9   : > { %2941 = vmatmul.msk.f32.vlgmr.msrb.gmra.mxu1 %vm759_vm3, %v843_v49  ;;  %v844_v54 = vmul.f32 %v3174_v53, %v3158_v25  ;;  %v3176_v56 = vpop.eup %3175 }
 0x2ba   : > { %v845_v58 = vmul.f32 %v3176_v56, %v3584_v27  ;;  %v3178_v60 = vpop.eup %3177 }
 0x2bb   : > { %v842_v63 = vmul.f32 %v3178_v60, %v3580_v18 }
 0x2be   : > { %v3180_v61 = vpop.eup %3179 }
 0x2bf   : > { %v828_v57 = vpop.xlane.xlu0 %827  ;;  %v1005_v0 = vpop.permute.xlu2 %1004  ;;  %v847_v1 = vmul.f32 %v3180_v61, %v3590_v36 }
 0x2c0   : > { %3181 = vrcp.f32 %v828_v57 }
 0x2c5   : > { %v953_v55 = vpop.permute.xlu1 %952 }
 0x2c6   : > { %973 = vmatpush.msra.mxu2 %v953_v55  ;;  %v3182_v3 = vpop.eup %3181 }
 0x2c7   : > { %2942 = vmatmul.msk.f32.vlgmr.msra.gmra.mxu2 %vm759_vm3, %v844_v54  ;;  %v846_v5 = vmul.f32 %v3182_v3, %v3594_v38 }
 0x2c8   : > { %1119 = vmatpush.msrb.mxu2 %v1099_v20  ;;  %v1199_v20 = vld [vmem:[%s4323_s10] sm:$0xff] }
 0x2ca   : > { %1120 = vmatpush.msrb.mxu2 %v1098_v22 }
 0x2cc   : > { %1121 = vmatpush.msrb.mxu2 %v1097_v24 }
 0x2cd   : > { %v979_v59 = vpop.permute.xlu1 %978 }
 0x2ce   : > { %999 = vmatpush.msrb.mxu3 %v979_v59  ;;  %1122 = vmatpush.msrb.mxu2 %v1096_v26 }
 0x2cf   : > { %2943 = vmatmul.msk.f32.vlgmr.msrb.gmra.mxu3 %vm759_vm3, %v845_v58 }
 0x2d2   : > { %v901_v62 = vpop.permute.xlu0 %900 }
 0x2d3   : > { %921 = vmatpush.msrb.mxu0 %v901_v62 }
 0x2d4   : > { %2940 = vmatmul.msk.f32.vlgmr.msrb.gmra.mxu0 %vm759_vm3, %v842_v63 }
 0x2d5   : > { %1025 = vmatpush.msra.mxu0 %v1005_v0  ;;  %v1031_v2 = vpop.permute.xlu1 %1030 }
 0x2d6   : > { %1051 = vmatpush.msra.mxu1 %v1031_v2 }
 0x2d7   : > { %2945 = vmatmul.msk.f32.vlgmr.msra.gmra.mxu1 %vm759_vm3, %v847_v1 }
 0x2d8   : > { %1330 = vmatpush.msrb.mxu1 %v2956_v6 }
 0x2da   : > { %1331 = vmatpush.msrb.mxu1 %v2955_v8  ;;  %v1206_v8 = vld [vmem:[%s4323_s10 + $0x38] sm:$0xff] }
 0x2db   : > { %1223 = vmatpush.msrb.mxu0 %v1206_v8 }
 0x2dc   : > { %2944 = vmatmul.msk.f32.vlgmr.msra.gmra.mxu0 %vm759_vm3, %v846_v5  ;;  %1332 = vmatpush.msrb.mxu1 %v2954_v9  ;;  %v1205_v9 = vld [vmem:[%s4323_s10 + $0x30] sm:$0xff] }
 0x2dd   : > { %1224 = vmatpush.msrb.mxu0 %v1205_v9 }
 0x2de   : > { %1333 = vmatpush.msrb.mxu1 %v2953_v12  ;;  %v1204_v12 = vld [vmem:[%s4323_s10 + $0x28] sm:$0xff] }
 0x2df   : > { %2958 = vmatmul.msk.f32.vlgmr.msrb.gmra.mxu1 %vm495_vm0, %v3638_v10  ;;  %1225 = vmatpush.msrb.mxu0 %v1204_v12 }
 0x30b   : > { %v871_v14 = vpop.f32.mrf.mxu2 }
 0x32a   : > { %v897_v11 = vpop.f32.mrf.mxu3 }
 0x32b   : > { %1057 = vrot.lane.b32.xlu0 %v897_v11, %s4274_s27  ;;  %s4320_s27 = smov 108   ;;  %v1170_v11 = vld [vmem:[%s4324_s8 + $0x18] sm:$0xff] }
 0x32c   : > { %1190 = vmatpush.msra.mxu3 %v1170_v11 }
 0x336   : > { %v949_v13 = vpop.f32.mrf.mxu1 }
 0x337   : > { %1065 = vrot.lane.b32.xlu1 %v949_v13, %s4268_s21  ;;  %s4311_s21 = smov 84   ;;  %v1169_v13 = vld [vmem:[%s4324_s8 + $0x10] sm:$0xff] }
 0x338   : > { %1191 = vmatpush.msra.mxu3 %v1169_v13 }
 0x34a   : > { %v975_v15 = vpop.f32.mrf.mxu2 }
 0x34b   : > { %1069 = vrot.lane.b32.xlu0 %v975_v15, %s4264_s0  ;;  %s4309_s0 = smov 92   ;;  %v1203_v15 = vld [vmem:[%s4323_s10 + $0x20] sm:$0xff] }
 0x34c   : > { %1226 = vmatpush.msrb.mxu0 %v1203_v15 }
 0x351   : > { %v923_v16 = vpop.f32.mrf.mxu0 }
 0x352   : > { %1061 = vrot.lane.b32.xlu2 %v923_v16, %s4262_s19  ;;  %v1001_v18 = vpop.f32.mrf.mxu3  ;;  %s4310_s19 = smov 124   ;;  %v1167_v16 = vld [vmem:[%s4324_s8] sm:$0xff] }
 0x354   : > { %v1053_v17 = vpop.f32.mrf.mxu1 }
 0x355   : > { %1081 = vrot.lane.b32.xlu0 %v1053_v17, %s4266_s22  ;;  %s4312_s22 = smov 116   ;;  %v1202_v17 = vld [vmem:[%s4323_s10 + $0x18] sm:$0xff] }
 0x356   : > { %1227 = vmatpush.msrb.mxu0 %v1202_v17 }
 0x359   : > { %v1027_v19 = vpop.f32.mrf.mxu0 }
 0x35a   : > { %1073 = vrot.lane.b32.xlu2 %v1001_v18, %s4272_s25  ;;  %1077 = vrot.lane.b32.xlu1 %v1027_v19, %s4270_s28  ;;  %s4308_s28 = smov 96   ;;  %s4317_s25 = smov 104   ;;  %v1201_v18 = vld [vmem:[%s4323_s10 + $0x10] sm:$0xff]  ;;  %v1200_v19 = vld [vmem:[%s4323_s10 + $0x8] sm:$0xff] }
 0x35b   : > { %1228 = vmatpush.msrb.mxu0 %v1201_v18  ;;  %s4337_s10 = smov 28  }
 0x35c   : > { %v1335_v23 = vpop.f32.mrf.mxu1 }
 0x35d   : > { %v3664_v25 = vadd.f32 %v3127_v21, %v1335_v23  ;;  %1229 = vmatpush.msrb.mxu0 %v1200_v19 }
 0x35f   : > { %1339 = vrot.lane.b32.xlu0 %v3664_v25, %s4308_s28  ;;  %1230 = vmatpush.msrb.mxu0 %v1199_v20 }
 0x367   : > { %1367 = vrot.lane.b32.xlu0 %v3664_v25, %s4309_s0 }
 0x36f   : > { %1365 = vrot.lane.b32.xlu0 %v3664_v25, %s4310_s19 }
 0x377   : > { %1423 = vrot.lane.b32.xlu0 %v3664_v25, %s4311_s21 }
 0x37f   : > { %1421 = vrot.lane.b32.xlu0 %v3664_v25, %s4312_s22 }
 0x387   : > { %1535 = vrot.lane.b32.xlu0 %v3664_v25, %s4313_s26 }
 0x38f   : > { %1395 = vrot.lane.b32.xlu0 %v3664_v25, %s4314_s15 }
 0x397   : > { %1533 = vrot.lane.b32.xlu0 %v3664_v25, %s4315_s18  ;;  %s4333_s18 = smov 56  }
 0x39d   : > { %v1058_v27 = vpop.permute.xlu0 %1057 }
 0x39e   : > { %v1084_v29 = vsel %vm522_vm1, %v871_v14, %v1058_v27  ;;  %v1168_v14 = vld [vmem:[%s4324_s8 + $0x8] sm:$0xff]  ;;  %s4338_s8 = smov 8  }
 0x39f   : > { %1479 = vrot.lane.b32.xlu0 %v3664_v25, %s4316_s20  ;;  %1192 = vmatpush.msra.mxu3 %v1168_v14 }
 0x3a1   : > { %1193 = vmatpush.msra.mxu3 %v1167_v16 }
 0x3a7   : > { %1505 = vrot.lane.b32.xlu0 %v3664_v25, %s4317_s25  ;;  %s4332_s25 = smov 44  }
 0x3a9   : > { %v1066_v30 = vpop.permute.xlu1 %1065 }
 0x3ac   : > { %v1062_v28 = vpop.permute.xlu2 %1061 }
 0x3ad   : > { %v1085_v31 = vsel %vm759_vm3, %v1084_v29, %v1062_v28 }
 0x3ae   : > { %v1087_v33 = vsel %vm1086_vm4, %v1085_v31, %v1066_v30 }
 0x3b4   : > { %v1074_v35 = vpop.permute.xlu2 %1073 }
 0x3bd   : > { %v1070_v32 = vpop.permute.xlu0 %1069 }
 0x3be   : > { %v1089_v34 = vsel %vm1088_vm5, %v1087_v33, %v1070_v32 }
 0x3bf   : > { %v1091_v37 = vsel %vm1090_vm6, %v1089_v34, %v1074_v35 }
 0x3c7   : > { %v1082_v38 = vpop.permute.xlu0 %1081 }
 0x3cc   : > { %v1078_v36 = vpop.permute.xlu1 %1077 }
 0x3cd   : > { %v1093_v39 = vsel %vm1092_vm7, %v1091_v37, %v1078_v36 }
 0x3ce   : > { %v1095_v40 = vsel %vm1094_vm8, %v1093_v39, %v1082_v38 }
 0x3cf   : > { %2946 = vmatmul.msk.f32.vlgmr.msrb.gmra.mxu2 %vm495_vm0, %v1095_v40 }
 0x3d1   : > { %v1340_v41 = vpop.permute.xlu0 %1339 }
 0x3d2   : > { %2959 = vmatpush.xpose.msk.msra.mxu2 %vm522_vm1, %v1340_v41 }
 0x3d7   : > { %2960 = vmatmul.msk.f32.vlgmr.msra.gmra.mxu2 %vm522_vm1, %v3664_v25 }
 0x3d9   : > { %v3700_v42 = vpop.permute.xlu0 %1367 }
 0x3da   : > { %2961 = vmatpush.xpose.msk.msrb.mxu3 %vm522_vm1, %v3700_v42 }
 0x3e1   : > { %v3702_v43 = vpop.permute.xlu0 %1365 }
 0x3e9   : > { %v1424_v44 = vpop.permute.xlu0 %1423 }
 0x3ea   : > { %2965 = vmatpush.xpose.msk.msrb.mxu2 %vm522_vm1, %v1424_v44  ;;  %v3129_v44 = vld [vmem:[%s4204_s6] ss:$0 sm:$0xff] }
 0x3f1   : > { %v1422_v45 = vpop.permute.xlu0 %1421 }
 0x3f2   : > { %2966 = vmatmul.msk.f32.vlgmr.msrb.gmra.mxu2 %vm522_vm1, %v1422_v45 }
 0x3f9   : > { %v1536_v50 = vpop.permute.xlu0 %1535 }
 0x3fa   : > { %2973 = vmatpush.xpose.msk.msra.mxu2 %vm522_vm1, %v1536_v50 }
 0x401   : > { %v1396_v51 = vpop.permute.xlu0 %1395 }
 0x402   : > { %2963 = vmatpush.xpose.msk.msra.mxu1 %vm522_vm1, %v1396_v51 }
 0x409   : > { %v1534_v52 = vpop.permute.xlu0 %1533 }
 0x40a   : > { %2974 = vmatmul.msk.f32.vlgmr.msra.gmra.mxu2 %vm522_vm1, %v1534_v52 }
 0x411   : > { %v1480_v21 = vpop.permute.xlu0 %1479 }
 0x412   : > { %2969 = vmatpush.xpose.msk.msra.mxu0 %vm522_vm1, %v1480_v21 }
 0x452   : > { %v1124_v47 = vpop.f32.mrf.mxu2 }
 0x453   : > { %v1125_v48 = vadd.f32 %v3128_v46, %v1124_v47 }
 0x455   : > { %v1127_v49 = vadd.f32 %v1125_v48, %v3504_v4  ;;  %v3358_v4 = vmov 32.0   ;;  %v3130_v48 = vld [vmem:[%s4205_s7] ss:$0 sm:$0xff] }
 0x456   : > { %3183 = vrcp.f32 %v3358_v4 }
 0x457   : > { %v1128_v7 = vsel %vm495_vm0, %v1127_v49, 0.0 }
 0x458   : > { %1129 = vadd.xlane.f32.xlu2 %v1128_v7 }
 0x45a   : > { %v1362_v54 = vpop.f32.mrf.mxu2 }
 0x45b   : > { %v1561_v22 = vmul.f32 0.5, %v1362_v54 }
 0x45c   : > { %v3184_v53 = vpop.eup %3183 }
 0x45d   : > { %v1132_v55 = vmul.f32 32.0, %v3184_v53  ;;  %vm1136_vm9 = vweird.f32 %v3184_v53  ;;  %v1569_v23 = vsel %vm759_vm3, %v1561_v22, -inf }
 0x45f   : > { %v1133_v56 = vsub.f32 1.0, %v1132_v55 }
 0x461   : > { %v1134_v57 = vmul.f32 %v3184_v53, %v1133_v56 }
 0x463   : > { %v1135_v60 = vadd.f32 %v3184_v53, %v1134_v57 }
 0x465   : > { %v3721_v62 = vsel %vm1136_vm9, %v3184_v53, %v1135_v60  ;;  %v1506_v53 = vpop.permute.xlu0 %1505 }
 0x470   : > { %1451 = vrot.lane.b32.xlu2 %v3664_v25, %s4318_s24 }
 0x475   : > { %v1446_v58 = vpop.f32.mrf.mxu2 }
 0x476   : > { %v1564_v59 = vmul.f32 0.5, %v1446_v58 }
 0x478   : > { %1393 = vrot.lane.b32.xlu2 %v3664_v25, %s4319_s1  ;;  %v1578_v61 = vsel %vm759_vm3, %v1564_v59, -inf }
 0x480   : > { %1477 = vrot.lane.b32.xlu2 %v3664_v25, %s4320_s27 }
 0x48d   : > { %v1558_v24 = vpop.f32.mrf.mxu2 }
 0x48e   : > { %v3776_v26 = vmul.f32 0.5, %v1558_v24 }
 0x490   : > { %v1590_v27 = vsel %vm759_vm3, %v3776_v26, -inf }
 0x491   : > { %1591 = vmax.xlane.f32.xlu0 %v1590_v27 }
 0x4a9   : > { %1579 = vmax.xlane.f32.xlu2 %v1578_v61 }
 0x4cb   : > { %v1130_v63 = vpop.xlane.xlu2 %1129 }
 0x4cc   : > { %v1138_v0 = vmul.f32 %v3721_v62, %v1130_v63 }
 0x4ce   : > { %v3724_v1 = vsub.f32 %v1127_v49, %v1138_v0 }
 0x4d0   : > { %v1140_v2 = vmul.f32 %v3724_v1, %v3724_v1 }
 0x4d2   : > { %v1141_v3 = vsel %vm495_vm0, %v1140_v2, 0.0 }
 0x4d3   : > { %1142 = vadd.xlane.f32.xlu1 %v1141_v3  ;;  %v3729_v5 = vpop.permute.xlu2 %1451 }
 0x4db   : > { %v1394_v6 = vpop.permute.xlu2 %1393 }
 0x4dc   : > { %2964 = vmatmul.msk.f32.vlgmr.msra.gmra.mxu1 %vm522_vm1, %v1394_v6 }
 0x4e3   : > { %v3780_v28 = vpop.permute.xlu2 %1477 }
 0x4ec   : > { %1449 = vrot.lane.b32.xlu1 %v3664_v25, %s4321_s29  ;;  %s4334_s29 = smov 4  }
 0x4f4   : > { %1507 = vrot.lane.b32.xlu1 %v3664_v25, %s4322_s16  ;;  %s4335_s16 = smov 12  }
 0x51c   : > { %v1580_v32 = vpop.xlane.xlu2 %1579 }
 0x51d   : > { %v1596_v34 = vsub.f32 %v1564_v59, %v1580_v32 }
 0x51e   : > { %1570 = vmax.xlane.f32.xlu1 %v1569_v23 }
 0x51f   : > { %v1607_v37 = vmul.f32 1.442695, %v1596_v34 }
 0x546   : > { %v1143_v29 = vpop.xlane.xlu1 %1142 }
 0x547   : > { %v1144_v30 = vmul.f32 %v1143_v29, %v3721_v62 }
 0x549   : > { %v1145_v31 = vadd.f32 1e-05, %v1144_v30 }
 0x54b   : > { %3185 = vrsqrt.f32 %v1145_v31  ;;  %vm1152_vm11 = vweird.f32 %v1145_v31 }
 0x54c   : > { %3187 = vpow2.f32 %v1607_v37 }
 0x551   : > { %v3186_v33 = vpop.eup %3185 }
 0x552   : > { %v1147_v35 = vmul.f32 %v3186_v33, %v1145_v31  ;;  %vm1153_vm10 = vweird.f32 %v3186_v33  ;;  %v3791_v7 = vpop.eup %3187 }
 0x553   : > { %vm1154_vm12 = vmor %vm1152_vm11, %vm1153_vm10  ;;  %v1626_v52 = vsel %vm759_vm3, %v3791_v7, 0.0 }
 0x554   : > { %v1148_v36 = vmul.f32 %v3186_v33, %v1147_v35 }
 0x556   : > { %v1149_v38 = vmul.f32 0.5, %v1148_v36 }
 0x558   : > { %v1150_v39 = vsub.f32 1.5, %v1149_v38 }
 0x559   : > { %v1418_v40 = vpop.f32.mrf.mxu1 }
 0x55a   : > { %v1151_v41 = vmul.f32 %v3186_v33, %v1150_v39  ;;  %v1563_v42 = vmul.f32 0.5, %v1418_v40 }
 0x55c   : > { %v1155_v45 = vsel %vm1154_vm12, %v3186_v33, %v1151_v41  ;;  %v1575_v46 = vsel %vm759_vm3, %v1563_v42, -inf }
 0x55d   : > { %v1156_v47 = vmul.f32 %v1155_v45, %v3724_v1  ;;  %1576 = vmax.xlane.f32.xlu1 %v1575_v46  ;;  %v1592_v1 = vpop.xlane.xlu0 %1591 }
 0x55e   : > { %v1450_v49 = vpop.permute.xlu1 %1449  ;;  %v1600_v6 = vsub.f32 %v3776_v26, %v1592_v1 }
 0x55f   : > { %v1161_v50 = vmul.f32 %v3129_v44, %v1156_v47 }
 0x560   : > { %v1615_v12 = vmul.f32 1.442695, %v1600_v6 }
 0x561   : > { %v3793_v51 = vadd.f32 %v3130_v48, %v1161_v50 }
 0x563   : > { %2947 = vmatmul.msk.f32.vlgmr.msra.gmra.mxu3 %vm495_vm0, %v3793_v51 }
 0x564   : > { %2967 = vmatpush.xpose.msk.msra.mxu3 %vm522_vm1, %v3729_v5 }
 0x565   : > { %1627 = vadd.xlane.f32.xlu1 %v1626_v52 }
 0x566   : > { %v1508_v4 = vpop.permute.xlu1 %1507 }
 0x567   : > { %2971 = vmatpush.xpose.msk.msrb.mxu1 %vm522_vm1, %v1508_v4 }
 0x56a   : > { %2972 = vmatmul.msk.f32.vlgmr.msrb.gmra.mxu1 %vm522_vm1, %v1506_v53 }
 0x56b   : > { %2962 = vmatmul.msk.f32.vlgmr.msrb.gmra.mxu3 %vm522_vm1, %v3702_v43  ;;  %v3131_v43 = vld [vmem:[%s4325_s9] ss:$0 sm:$0xff]  ;;  %s4336_s9 = smov 16  }
 0x573   : > { %2968 = vmatmul.msk.f32.vlgmr.msra.gmra.mxu3 %vm522_vm1, %v1450_v49 }
 0x591   : > { %v1571_v54 = vpop.xlane.xlu1 %1570 }
 0x592   : > { %v1593_v57 = vsub.f32 %v1561_v22, %v1571_v54 }
 0x594   : > { %v1601_v59 = vmul.f32 1.442695, %v1593_v57 }
 0x5d0   : > { %v1577_v55 = vpop.xlane.xlu1 %1576 }
 0x5d1   : > { %v1595_v56 = vsub.f32 %v1563_v42, %v1577_v55 }
 0x5d3   : > { %v1605_v58 = vmul.f32 1.442695, %v1595_v56 }
 0x5d5   : > { %3189 = vpow2.f32 %v1605_v58 }
 0x5d6   : > { %3191 = vpow2.f32 %v1601_v59 }
 0x5d7   : > { %3193 = vpow2.f32 %v1615_v12 }
 0x5d8   : > { %v1628_v47 = vpop.xlane.xlu1 %1627 }
 0x5db   : > { %v3806_v60 = vpop.eup %3189 }
 0x5dc   : > { %v1623_v61 = vsel %vm759_vm3, %v3806_v60, 0.0  ;;  %v3192_v63 = vpop.eup %3191 }
 0x5dd   : > { %1624 = vadd.xlane.f32.xlu0 %v1623_v61  ;;  %v1617_v0 = vsel %vm759_vm3, %v3192_v63, 0.0  ;;  %v3820_v16 = vpop.eup %3193 }
 0x5de   : > { %v1638_v20 = vsel %vm759_vm3, %v3820_v16, 0.0 }
 0x5e5   : > { %1618 = vadd.xlane.f32.xlu0 %v1617_v0 }
 0x5e6   : > { %v1195_v2 = vpop.f32.mrf.mxu3 }
 0x5e7   : > { %v1196_v3 = vadd.f32 %v3131_v43, %v1195_v2  ;;  %v1530_v5 = vpop.f32.mrf.mxu1 }
 0x5e8   : > { %v1567_v8 = vmul.f32 0.5, %v1530_v5 }
 0x5e9   : > { %v1198_v9 = vmax.f32 %v1196_v3, 0.0 }
 0x5ea   : > { %v1587_v11 = vsel %vm759_vm3, %v1567_v8, -inf }
 0x5eb   : > { %2948 = vmatmul.msk.f32.vlgmr.msrb.gmra.mxu0 %vm1211_vm13, %v1198_v9  ;;  %1588 = vmax.xlane.f32.xlu2 %v1587_v11 }
 0x5ee   : > { %v1390_v13 = vpop.f32.mrf.mxu3 }
 0x5ef   : > { %v1562_v14 = vmul.f32 0.5, %v1390_v13 }
 0x5f1   : > { %v1572_v15 = vsel %vm759_vm3, %v1562_v14, -inf }
 0x5f2   : > { %1573 = vmax.xlane.f32.xlu0 %v1572_v15 }
 0x5f3   : > { %2970 = vmatmul.msk.f32.vlgmr.msra.gmra.mxu0 %vm522_vm1, %v3780_v28 }
 0x5f6   : > { %v1474_v17 = vpop.f32.mrf.mxu3 }
 0x5f7   : > { %v1565_v18 = vmul.f32 0.5, %v1474_v17 }
 0x5f9   : > { %v1581_v19 = vsel %vm759_vm3, %v1565_v18, -inf }
 0x5fa   : > { %1582 = vmax.xlane.f32.xlu2 %v1581_v19  ;;  %1639 = vadd.xlane.f32.xlu0 %v1638_v20 }
 0x612   : > { %1657 = vrot.lane.b32.xlu2 %v3664_v25, %s4326_s13 }
 0x650   : > { %v3827_v21 = vpop.xlane.xlu0 %1624 }
 0x658   : > { %v1619_v22 = vpop.xlane.xlu0 %1618 }
 0x65e   : > { %v1589_v23 = vpop.xlane.xlu2 %1588 }
 0x65f   : > { %v1599_v24 = vsub.f32 %v1567_v8, %v1589_v23 }
 0x661   : > { %v1613_v26 = vmul.f32 1.442695, %v1599_v24  ;;  %v3132_v24 = vld [vmem:[%s4209_s11] ss:$0 sm:$0xff] }
 0x663   : > { %3195 = vpow2.f32 %v1613_v26 }
 0x665   : > { %v1574_v27 = vpop.xlane.xlu0 %1573 }
 0x666   : > { %v1594_v28 = vsub.f32 %v1562_v14, %v1574_v27 }
 0x668   : > { %v1603_v29 = vmul.f32 1.442695, %v1594_v28  ;;  %v3829_v30 = vpop.f32.mrf.mxu0 }
 0x669   : > { %v3831_v31 = vpop.eup %3195  ;;  %v1233_v26 = vadd.f32 %v3132_v24, %v3829_v30 }
 0x66a   : > { %3197 = vpow2.f32 %v1603_v29  ;;  %v1635_v32 = vsel %vm759_vm3, %v3831_v31, 0.0  ;;  %v2986_v29 = vld [vmem:[%s4202_s4 + $0x38] sm:$0xff] }
 0x66b   : > { %1636 = vadd.xlane.f32.xlu0 %v1635_v32  ;;  %3199 = vrcp.f32 %v1619_v22  ;;  %v1235_v27 = vadd.f32 %v1233_v26, %v3793_v51  ;;  %v2984_v32 = vld [vmem:[%s4202_s4 + $0x28] sm:$0xff]  ;;  %v2983_v51 = vld [vmem:[%s4202_s4 + $0x20] sm:$0xff] }
 0x66d   : > { %v1583_v33 = vpop.xlane.xlu2 %1582  ;;  %v1640_v57 = vpop.xlane.xlu0 %1639  ;;  %v1236_v28 = vsel %vm495_vm0, %v1235_v27, 0.0 }
 0x66e   : > { %v1597_v42 = vsub.f32 %v1565_v18, %v1583_v33 }
 0x670   : > { %v3198_v34 = vpop.eup %3197  ;;  %v1502_v35 = vpop.f32.mrf.mxu0  ;;  %v1609_v44 = vmul.f32 1.442695, %v1597_v42 }
 0x671   : > { %v1566_v36 = vmul.f32 0.5, %v1502_v35  ;;  %v1620_v37 = vsel %vm759_vm3, %v3198_v34, 0.0  ;;  %v3200_v38 = vpop.eup %3199 }
 0x672   : > { %1621 = vadd.xlane.f32.xlu2 %v1620_v37  ;;  %v1649_v40 = vmul.f32 %v3200_v38, %v3192_v63  ;;  %3201 = vpow2.f32 %v1609_v44 }
 0x673   : > { %v1584_v39 = vsel %vm759_vm3, %v1566_v36, -inf }
 0x674   : > { %1585 = vmax.xlane.f32.xlu1 %v1584_v39 }
 0x675   : > { %v1658_v41 = vpop.permute.xlu2 %1657 }
 0x676   : > { %1678 = vmatpush.msrb.mxu3 %v1658_v41 }
 0x677   : > { %2975 = vmatmul.msk.f32.vlgmr.msrb.gmra.mxu3 %vm759_vm3, %v1649_v40 }
 0x678   : > { %v3202_v45 = vpop.eup %3201 }
 0x679   : > { %v1629_v46 = vsel %vm759_vm3, %v3202_v45, 0.0 }
 0x68a   : > { %1683 = vrot.lane.b32.xlu2 %v3664_v25, %s4327_s23 }
 0x68d   : > { %1735 = vrot.lane.b32.xlu1 %v3664_v25, %s4328_s14 }
 0x692   : > { %1839 = vrot.lane.b32.xlu2 %v3664_v25, %s4329_s17 }
 0x69a   : > { %1813 = vrot.lane.b32.xlu2 %v3664_v25, %s4330_s12 }
 0x6b7   : > { %1630 = vadd.xlane.f32.xlu1 %v1629_v46 }
 0x6d0   : > { %1761 = vrot.lane.b32.xlu1 %v3664_v25, %s4331_s30 }
 0x6d8   : > { %1787 = vrot.lane.b32.xlu1 %v3664_v25, %s4332_s25 }
 0x6de   : > { %v1637_v6 = vpop.xlane.xlu0 %1636 }
 0x6e5   : > { %v1622_v48 = vpop.xlane.xlu2 %1621 }
 0x6e6   : > { %3203 = vrcp.f32 %v1622_v48 }
 0x6e7   : > { %v1586_v49 = vpop.xlane.xlu1 %1585 }
 0x6e8   : > { %v1598_v50 = vsub.f32 %v1566_v36, %v1586_v49 }
 0x6ea   : > { %v1611_v52 = vmul.f32 1.442695, %v1598_v50 }
 0x6ec   : > { %v3204_v4 = vpop.eup %3203  ;;  %3205 = vpow2.f32 %v1611_v52 }
 0x6ed   : > { %v1650_v53 = vmul.f32 %v3204_v4, %v3198_v34  ;;  %v1684_v54 = vpop.permute.xlu2 %1683  ;;  %3207 = vrcp.f32 %v1628_v47  ;;  %v3133_v4 = vld [vmem:[%s4203_s5 + $0x1] ss:$0 sm:$0xff] }
 0x6ee   : > { %1704 = vmatpush.msrb.mxu0 %v1684_v54  ;;  %3209 = vrcp.f32 %v1640_v57 }
 0x6ef   : > { %2976 = vmatmul.msk.f32.vlgmr.msrb.gmra.mxu0 %vm759_vm3, %v1650_v53 }
 0x6f2   : > { %v3206_v55 = vpop.eup %3205 }
 0x6f3   : > { %v1632_v56 = vsel %vm759_vm3, %v3206_v55, 0.0  ;;  %v3208_v58 = vpop.eup %3207 }
 0x6f4   : > { %1633 = vadd.xlane.f32.xlu0 %v1632_v56  ;;  %v1652_v59 = vmul.f32 %v3208_v58, %v3791_v7  ;;  %v3210_v43 = vpop.eup %3209 }
 0x6f5   : > { %v1840_v63 = vpop.permute.xlu2 %1839  ;;  %v1656_v0 = vmul.f32 %v3210_v43, %v3820_v16 }
 0x6fa   : > { %v1680_v19 = vpop.f32.mrf.mxu3 }
 0x6fd   : > { %v1814_v15 = vpop.permute.xlu2 %1813 }
 0x6ff   : > { %v1736_v61 = vpop.permute.xlu1 %1735 }
 0x700   : > { %1756 = vmatpush.msrb.mxu2 %v1736_v61 }
 0x701   : > { %2978 = vmatmul.msk.f32.vlgmr.msrb.gmra.mxu2 %vm759_vm3, %v1652_v59 }
 0x702   : > { %1860 = vmatpush.msra.mxu2 %v1840_v63 }
 0x708   : > { %1709 = vrot.lane.b32.xlu0 %v3664_v25, %s4333_s18  ;;  %s4340_s18 = smov 24  }
 0x709   : > { %2982 = vmatmul.msk.f32.vlgmr.msra.gmra.mxu2 %vm759_vm3, %v1656_v0 }
 0x72a   : > { %v1631_v1 = vpop.xlane.xlu1 %1630 }
 0x72b   : > { %3211 = vrcp.f32 %v1631_v1 }
 0x731   : > { %v3212_v2 = vpop.eup %3211 }
 0x732   : > { %v1653_v3 = vmul.f32 %v3212_v2, %v3202_v45 }
 0x742   : > { %v1762_v5 = vpop.permute.xlu1 %1761 }
 0x743   : > { %1782 = vmatpush.msra.mxu3 %v1762_v5 }
 0x744   : > { %2979 = vmatmul.msk.f32.vlgmr.msra.gmra.mxu3 %vm759_vm3, %v1653_v3 }
 0x745   : > { %1925 = vmatpush.msrb.mxu3 %v2986_v29 }
 0x74a   : > { %v1788_v7 = vpop.permute.xlu1 %1787 }
 0x74b   : > { %1808 = vmatpush.msra.mxu0 %v1788_v7  ;;  %v3135_v7 = vld [vmem:[%s4205_s7 + $0x1] ss:$0 sm:$0xff] }
 0x767   : > { %v1634_v8 = vpop.xlane.xlu0 %1633 }
 0x768   : > { %3213 = vrcp.f32 %v1634_v8 }
 0x769   : > { %3215 = vrcp.f32 %v3827_v21 }
 0x76a   : > { %3217 = vrcp.f32 %v1637_v6 }
 0x76c   : > { %v1706_v9 = vpop.f32.mrf.mxu0 }
 0x76d   : > { %1866 = vrot.lane.b32.xlu1 %v1706_v9, %s4334_s29  ;;  %s4339_s29 = smov 20  }
 0x76e   : > { %v3214_v11 = vpop.eup %3213 }
 0x76f   : > { %v1654_v25 = vmul.f32 %v3214_v11, %v3206_v55  ;;  %v3216_v12 = vpop.eup %3215 }
 0x770   : > { %v1651_v13 = vmul.f32 %v3216_v12, %v3806_v60  ;;  %v3218_v16 = vpop.eup %3217 }
 0x771   : > { %2980 = vmatmul.msk.f32.vlgmr.msra.gmra.mxu0 %vm759_vm3, %v1654_v25  ;;  %v1655_v17 = vmul.f32 %v3218_v16, %v3831_v31  ;;  %v2985_v31 = vld [vmem:[%s4202_s4 + $0x30] sm:$0xff] }
 0x772   : > { %1926 = vmatpush.msrb.mxu3 %v2985_v31 }
 0x774   : > { %1927 = vmatpush.msrb.mxu3 %v2984_v32 }
 0x776   : > { %1928 = vmatpush.msrb.mxu3 %v2983_v51 }
 0x77a   : > { %v1710_v14 = vpop.permute.xlu0 %1709 }
 0x77b   : > { %1730 = vmatpush.msra.mxu1 %v1710_v14 }
 0x77c   : > { %2977 = vmatmul.msk.f32.vlgmr.msra.gmra.mxu1 %vm759_vm3, %v1651_v13 }
 0x77d   : > { %1834 = vmatpush.msrb.mxu1 %v1814_v15 }
 0x784   : > { %v1758_v18 = vpop.f32.mrf.mxu2  ;;  %2981 = vmatmul.msk.f32.vlgmr.msrb.gmra.mxu1 %vm759_vm3, %v1655_v17 }
 0x785   : > { %1874 = vrot.lane.b32.xlu0 %v1758_v18, %s4335_s16 }
 0x78c   : > { %v1862_v21 = vpop.f32.mrf.mxu2 }
 0x7c7   : > { %v1784_v20 = vpop.f32.mrf.mxu3 }
 0x7c8   : > { %1878 = vrot.lane.b32.xlu1 %v1784_v20, %s4336_s9  ;;  %v2994_v20 = vld [vmem:[%s4200_s2 + $0x58] sm:$0xff]  ;;  %s4358_s9 = sld [smem:[#allocation19_spill]] }
 0x7c9   : > { %1993 = vmatpush.msrb.mxu0 %v2994_v20  ;;  %2016 = vmatpush.msra.mxu1 %v2994_v20 }
 0x7d0   : > { %1890 = vrot.lane.b32.xlu1 %v1862_v21, %s4337_s10  ;;  %v2993_v21 = vld [vmem:[%s4200_s2 + $0x50] sm:$0xff] }
 0x7d1   : > { %1994 = vmatpush.msrb.mxu0 %v2993_v21  ;;  %2017 = vmatpush.msra.mxu1 %v2993_v21 }
 0x7df   : > { %v1867_v30 = vpop.permute.xlu1 %1866 }
 0x7e0   : > { %v1893_v35 = vsel %vm522_vm1, %v1680_v19, %v1867_v30  ;;  %v3136_v30 = vld [vmem:[%s4204_s6 + $0x3] ss:$0 sm:$0xff] }
 0x7ee   : > { %v1810_v22 = vpop.f32.mrf.mxu0 }
 0x7f7   : > { %v1875_v36 = vpop.permute.xlu0 %1874 }
 0x7f9   : > { %v1732_v60 = vpop.f32.mrf.mxu1 }
 0x7fa   : > { %1870 = vrot.lane.b32.xlu2 %v1732_v60, %s4338_s8  ;;  %v2992_v60 = vld [vmem:[%s4200_s2 + $0x48] sm:$0xff]  ;;  %s4363_s8 = sld [smem:[#allocation20_spill]] }
 0x7fb   : > { %1995 = vmatpush.msrb.mxu0 %v2992_v60  ;;  %2018 = vmatpush.msra.mxu1 %v2992_v60 }
 0x801   : > { %v1836_v23 = vpop.f32.mrf.mxu1 }
 0x802   : > { %1882 = vrot.lane.b32.xlu2 %v1810_v22, %s4339_s29  ;;  %1886 = vrot.lane.b32.xlu0 %v1836_v23, %s4340_s18  ;;  %v2991_v22 = vld [vmem:[%s4200_s2 + $0x40] sm:$0xff] }
 0x803   : > { %1996 = vmatpush.msrb.mxu0 %v2991_v22  ;;  %2019 = vmatpush.msra.mxu1 %v2991_v22 }
 0x82b   : > { %1237 = vadd.xlane.f32.xlu2 %v1236_v28 }
 0x83a   : > { %v1879_v34 = vpop.permute.xlu1 %1878 }
 0x842   : > { %v1891_v44 = vpop.permute.xlu1 %1890 }
 0x854   : > { %v1871_v33 = vpop.permute.xlu2 %1870 }
 0x855   : > { %v1894_v37 = vsel %vm759_vm3, %v1893_v35, %v1871_v33  ;;  %v3137_v35 = vld [vmem:[%s4205_s7 + $0x3] ss:$0 sm:$0xff] }
 0x856   : > { %v1895_v38 = vsel %vm1086_vm4, %v1894_v37, %v1875_v36 }
 0x857   : > { %v1896_v40 = vsel %vm1088_vm5, %v1895_v38, %v1879_v34 }
 0x85c   : > { %v1883_v39 = vpop.permute.xlu2 %1882 }
 0x85d   : > { %v1897_v41 = vsel %vm1090_vm6, %v1896_v40, %v1883_v39 }
 0x874   : > { %v1887_v42 = vpop.permute.xlu0 %1886 }
 0x875   : > { %v1898_v45 = vsel %vm1092_vm7, %v1897_v41, %v1887_v42 }
 0x876   : > { %v1899_v46 = vsel %vm1094_vm8, %v1898_v45, %v1891_v44 }
 0x877   : > { %2988 = vmatmul.msk.f32.vlgmr.msrb.gmra.mxu3 %vm495_vm0, %v1899_v46 }
 0x89e   : > { %v1238_v47 = vpop.xlane.xlu2 %1237 }
 0x89f   : > { %v1239_v48 = vmul.f32 %v1238_v47, %v3721_v62 }
 0x8a1   : > { %v1240_v49 = vsub.f32 %v1235_v27, %v1239_v48  ;;  %v3138_v48 = vld [vmem:[%s4204_s6 + $0x2] ss:$0 sm:$0xff] }
 0x8a3   : > { %v1241_v50 = vmul.f32 %v1240_v49, %v1240_v49 }
 0x8a5   : > { %v1242_v52 = vsel %vm495_vm0, %v1241_v50, 0.0 }
 0x8a6   : > { %1243 = vadd.xlane.f32.xlu0 %v1242_v52  ;;  %v3139_v52 = vld [vmem:[%s4205_s7 + $0x2] ss:$0 sm:$0xff] }
 0x8fa   : > { %v1930_v53 = vpop.f32.mrf.mxu3 }
 0x8fb   : > { %v1931_v54 = vadd.f32 %v3133_v4, %v1930_v53 }
 0x8fd   : > { %v1933_v55 = vadd.f32 %v1931_v54, %v3638_v10  ;;  %v3134_v10 = vld [vmem:[%s4204_s6 + $0x1] ss:$0 sm:$0xff]  ;;  %v3140_v54 = vld [vmem:[%s4201_s3 + $0x2] ss:$0 sm:$0xff] }
 0x8ff   : > { %v1934_v56 = vsel %vm495_vm0, %v1933_v55, 0.0 }
 0x900   : > { %1935 = vadd.xlane.f32.xlu2 %v1934_v56 }
 0x919   : > { %v1244_v57 = vpop.xlane.xlu0 %1243 }
 0x91a   : > { %v1245_v58 = vmul.f32 %v1244_v57, %v3721_v62 }
 0x91c   : > { %v1246_v59 = vadd.f32 1e-05, %v1245_v58 }
 0x91e   : > { %3219 = vrsqrt.f32 %v1246_v59  ;;  %vm1253_vm15 = vweird.f32 %v1246_v59 }
 0x924   : > { %v3220_v61 = vpop.eup %3219 }
 0x925   : > { %v1248_v63 = vmul.f32 %v3220_v61, %v1246_v59  ;;  %vm1254_vm14 = vweird.f32 %v3220_v61 }
 0x926   : > { %vm1255_vm2 = vmor %vm1253_vm15, %vm1254_vm14 }
 0x927   : > { %v1249_v43 = vmul.f32 %v3220_v61, %v1248_v63 }
 0x929   : > { %v1250_v0 = vmul.f32 0.5, %v1249_v43 }
 0x92b   : > { %v1251_v1 = vsub.f32 1.5, %v1250_v0 }
 0x92d   : > { %v1252_v2 = vmul.f32 %v3220_v61, %v1251_v1 }
 0x92f   : > { %v1256_v3 = vsel %vm1255_vm2, %v3220_v61, %v1252_v2 }
 0x930   : > { %v1257_v5 = vmul.f32 %v1256_v3, %v1240_v49 }
 0x932   : > { %v1263_v6 = vmul.f32 %v3134_v10, %v1257_v5 }
 0x934   : > { %v1269_v8 = vadd.f32 %v3135_v7, %v1263_v6 }
 0x936   : > { %v1270_v9 = vsel %vm495_vm0, %v1269_v8, 0.0 }
 0x937   : > { %1271 = vadd.xlane.f32.xlu1 %v1270_v9 }
 0x973   : > { %v1936_v11 = vpop.xlane.xlu2 %1935 }
 0x974   : > { %v1937_v25 = vmul.f32 %v1936_v11, %v3721_v62 }
 0x976   : > { %v1938_v12 = vsub.f32 %v1933_v55, %v1937_v25 }
 0x978   : > { %v1939_v13 = vmul.f32 %v1938_v12, %v1938_v12 }
 0x97a   : > { %v1940_v14 = vsel %vm495_vm0, %v1939_v13, 0.0 }
 0x97b   : > { %1941 = vadd.xlane.f32.xlu1 %v1940_v14 }
 0x9aa   : > { %v1272_v15 = vpop.xlane.xlu1 %1271 }
 0x9ab   : > { %v1273_v16 = vmul.f32 %v1272_v15, %v3721_v62 }
 0x9ad   : > { %v1274_v17 = vsub.f32 %v1269_v8, %v1273_v16 }
 0x9af   : > { %v1275_v18 = vmul.f32 %v1274_v17, %v1274_v17 }
 0x9b1   : > { %v1276_v19 = vsel %vm495_vm0, %v1275_v18, 0.0 }
 0x9b2   : > { %1277 = vadd.xlane.f32.xlu0 %v1276_v19 }
 0x9ee   : > { %v1942_v23 = vpop.xlane.xlu1 %1941 }
 0x9ef   : > { %v1943_v24 = vmul.f32 %v1942_v23, %v3721_v62 }
 0x9f1   : > { %v1944_v26 = vadd.f32 1e-05, %v1943_v24 }
 0x9f3   : > { %3221 = vrsqrt.f32 %v1944_v26  ;;  %vm1951_vm10 = vweird.f32 %v1944_v26 }
 0x9f9   : > { %v3222_v27 = vpop.eup %3221 }
 0x9fa   : > { %v1946_v28 = vmul.f32 %v3222_v27, %v1944_v26  ;;  %vm1952_vm9 = vweird.f32 %v3222_v27 }
 0x9fb   : > { %vm1953_vm11 = vmor %vm1951_vm10, %vm1952_vm9 }
 0x9fc   : > { %v1947_v29 = vmul.f32 %v3222_v27, %v1946_v28 }
 0x9fe   : > { %v1948_v31 = vmul.f32 0.5, %v1947_v29 }
 0xa00   : > { %v1949_v32 = vsub.f32 1.5, %v1948_v31 }
 0xa02   : > { %v1950_v51 = vmul.f32 %v3222_v27, %v1949_v32 }
 0xa04   : > { %v1954_v33 = vsel %vm1953_vm11, %v3222_v27, %v1950_v51 }
 0xa05   : > { %v1955_v34 = vmul.f32 %v1954_v33, %v1938_v12 }
 0xa07   : > { %v1961_v36 = vmul.f32 %v3136_v30, %v1955_v34 }
 0xa09   : > { %v3937_v37 = vadd.f32 %v3137_v35, %v1961_v36 }
 0xa0b   : > { %2996 = vmatmul.msk.f32.vlgmr.msrb.gmra.mxu0 %vm495_vm0, %v3937_v37 }
 0xa25   : > { %v1278_v38 = vpop.xlane.xlu0 %1277 }
 0xa26   : > { %v1279_v39 = vmul.f32 %v1278_v38, %v3721_v62 }
 0xa28   : > { %v1280_v40 = vadd.f32 1e-05, %v1279_v39 }
 0xa2a   : > { %3223 = vrsqrt.f32 %v1280_v40  ;;  %vm1287_vm14 = vweird.f32 %v1280_v40 }
 0xa30   : > { %v3224_v41 = vpop.eup %3223 }
 0xa31   : > { %v1282_v42 = vmul.f32 %v3224_v41, %v1280_v40  ;;  %vm1288_vm12 = vweird.f32 %v3224_v41 }
 0xa32   : > { %vm1289_vm15 = vmor %vm1287_vm14, %vm1288_vm12 }
 0xa33   : > { %v1283_v44 = vmul.f32 %v3224_v41, %v1282_v42 }
 0xa35   : > { %v1284_v45 = vmul.f32 0.5, %v1283_v44 }
 0xa37   : > { %v1285_v46 = vsub.f32 1.5, %v1284_v45 }
 0xa39   : > { %v1286_v47 = vmul.f32 %v3224_v41, %v1285_v46 }
 0xa3b   : > { %v1290_v49 = vsel %vm1289_vm15, %v3224_v41, %v1286_v47 }
 0xa3c   : > { %v1291_v50 = vmul.f32 %v1290_v49, %v1274_v17 }
 0xa3e   : > { %v1297_v4 = vmul.f32 %v3138_v48, %v1291_v50 }
 0xa40   : > { %v1303_v53 = vadd.f32 %v3139_v52, %v1297_v4 }
 0xa42   : > { %2997 = vmatmul.msk.f32.vlgmr.msra.gmra.mxu1 %vm495_vm0, %v1303_v53 }
 0xa88   : > { %v1998_v55 = vpop.f32.mrf.mxu0 }
 0xa89   : > { %v1999_v56 = vadd.f32 %v3140_v54, %v1998_v55 }
 0xa8b   : > { %2052 = vrot.lane.b32.xlu1 %v1999_v56, %s4310_s19  ;;  %s4343_s19 = smov 72  }
 0xa93   : > { %2164 = vrot.lane.b32.xlu1 %v1999_v56, %s4320_s27  ;;  %s4351_s27 = smov 28  }
 0xa9b   : > { %2080 = vrot.lane.b32.xlu1 %v1999_v56, %s4319_s1  ;;  %s4350_s1 = smov 16  }
 0xabf   : > { %v2021_v57 = vpop.f32.mrf.mxu1 }
 0xac0   : > { %v3955_v58 = vadd.f32 %v3140_v54, %v2021_v57 }
 0xac2   : > { %2054 = vrot.lane.b32.xlu0 %v3955_v58, %s4309_s0  ;;  %2025 = vrot.lane.b32.xlu2 %v3955_v58, %s4308_s28  ;;  %s4341_s0 = smov 112   ;;  %s4342_s28 = smov 104  }
 0xac3   : > { %2222 = vrot.lane.b32.xlu1 %v3955_v58, %s4313_s26  ;;  %s4347_s26 = smov 56  }
 0xaca   : > { %2138 = vrot.lane.b32.xlu0 %v3955_v58, %s4318_s24  ;;  %2166 = vrot.lane.b32.xlu2 %v3955_v58, %s4316_s20  ;;  %s4344_s24 = smov 100   ;;  %s4349_s20 = smov 4  }
 0xad2   : > { %2110 = vrot.lane.b32.xlu0 %v3955_v58, %s4311_s21  ;;  %2082 = vrot.lane.b32.xlu2 %v3955_v58, %s4314_s15  ;;  %s4345_s21 = smov 40   ;;  %s4348_s15 = smov 12  }
 0xada   : > { %2108 = vrot.lane.b32.xlu2 %v1999_v56, %s4312_s22  ;;  %2136 = vrot.lane.b32.xlu0 %v1999_v56, %s4341_s0  ;;  %s4346_s22 = smov 36   ;;  %s4359_s0 = sld [smem:[#allocation6_spill]] }
 0xae2   : > { %2192 = vrot.lane.b32.xlu2 %v1999_v56, %s4342_s28  ;;  %2194 = vrot.lane.b32.xlu0 %v3955_v58, %s4343_s19  ;;  %s4355_s19 = sld [smem:[#allocation16_spill]] }
 0xae3   : > { %s4360_s28 = sld [smem:[#allocation9_spill]] }
 0xaea   : > { %2370 = vrot.lane.b32.xlu2 %v3955_v58, %s4327_s23  ;;  %2220 = vrot.lane.b32.xlu0 %v1999_v56, %s4344_s24  ;;  %s4353_s23 = smov 20  }
 0xaf2   : > { %2344 = vrot.lane.b32.xlu0 %v3955_v58, %s4326_s13  ;;  %s4352_s13 = smov 8  }
 0xafd   : > { %v2053_v59 = vpop.permute.xlu1 %2052 }
 0xb05   : > { %v2165_v43 = vpop.permute.xlu1 %2164 }
 0xb0d   : > { %v2081_v1 = vpop.permute.xlu1 %2080 }
 0xb1c   : > { %v2026_v61 = vpop.permute.xlu2 %2025 }
 0xb1d   : > { %2998 = vmatpush.xpose.msk.msrb.mxu2 %vm522_vm1, %v2026_v61 }
 0xb20   : > { %2999 = vmatmul.msk.f32.vlgmr.msrb.gmra.mxu2 %vm522_vm1, %v1999_v56 }
 0xb24   : > { %v2167_v63 = vpop.permute.xlu2 %2166 }
 0xb2c   : > { %v2083_v0 = vpop.permute.xlu2 %2082 }
 0xb2d   : > { %3002 = vmatpush.xpose.msk.msra.mxu0 %vm522_vm1, %v2083_v0 }
 0xb30   : > { %3003 = vmatmul.msk.f32.vlgmr.msra.gmra.mxu0 %vm522_vm1, %v2081_v1 }
 0xb34   : > { %v2055_v2 = vpop.permute.xlu0 %2054  ;;  %v2109_v10 = vpop.permute.xlu2 %2108 }
 0xb35   : > { %3000 = vmatpush.xpose.msk.msra.mxu3 %vm522_vm1, %v2055_v2  ;;  %v2223_v8 = vpop.permute.xlu1 %2222 }
 0xb38   : > { %3001 = vmatmul.msk.f32.vlgmr.msra.gmra.mxu3 %vm522_vm1, %v2053_v59 }
 0xb39   : > { %3008 = vmatpush.xpose.msk.msrb.mxu3 %vm522_vm1, %v2167_v63 }
 0xb3c   : > { %v2139_v3 = vpop.permute.xlu0 %2138  ;;  %v2193_v5 = vpop.permute.xlu2 %2192 }
 0xb3d   : > { %3006 = vmatpush.xpose.msk.msra.mxu2 %vm522_vm1, %v2139_v3 }
 0xb40   : > { %3009 = vmatmul.msk.f32.vlgmr.msrb.gmra.mxu3 %vm522_vm1, %v2165_v43 }
 0xb44   : > { %v2111_v7 = vpop.permute.xlu0 %2110  ;;  %v2371_v6 = vpop.permute.xlu2 %2370 }
 0xb45   : > { %3004 = vmatpush.xpose.msk.msrb.mxu1 %vm522_vm1, %v2111_v7  ;;  %2391 = vmatpush.msra.mxu3 %v2371_v6 }
 0xb48   : > { %3005 = vmatmul.msk.f32.vlgmr.msrb.gmra.mxu1 %vm522_vm1, %v2109_v10 }
 0xb49   : > { %3012 = vmatpush.xpose.msk.msra.mxu1 %vm522_vm1, %v2223_v8 }
 0xb4c   : > { %v2137_v9 = vpop.permute.xlu0 %2136 }
 0xb4d   : > { %3007 = vmatmul.msk.f32.vlgmr.msra.gmra.mxu2 %vm522_vm1, %v2137_v9 }
 0xb54   : > { %v2195_v11 = vpop.permute.xlu0 %2194 }
 0xb55   : > { %3010 = vmatpush.xpose.msk.msrb.mxu0 %vm522_vm1, %v2195_v11 }
 0xb58   : > { %3011 = vmatmul.msk.f32.vlgmr.msrb.gmra.mxu0 %vm522_vm1, %v2193_v5 }
 0xb5c   : > { %v2221_v25 = vpop.permute.xlu0 %2220 }
 0xb5d   : > { %3013 = vmatmul.msk.f32.vlgmr.msra.gmra.mxu1 %vm522_vm1, %v2221_v25 }
 0xb64   : > { %v2345_v12 = vpop.permute.xlu0 %2344 }
 0xb65   : > { %2365 = vmatpush.msrb.mxu2 %v2345_v12 }
 0xba3   : > { %v2049_v13 = vpop.f32.mrf.mxu2 }
 0xba4   : > { %v2248_v14 = vmul.f32 0.5, %v2049_v13 }
 0xba6   : > { %v2256_v15 = vsel %vm759_vm3, %v2248_v14, -inf }
 0xba7   : > { %2257 = vmax.xlane.f32.xlu1 %v2256_v15 }
 0xbad   : > { %v2105_v16 = vpop.f32.mrf.mxu0 }
 0xbae   : > { %v2250_v17 = vmul.f32 0.5, %v2105_v16 }
 0xbb0   : > { %v2262_v18 = vsel %vm759_vm3, %v2250_v17, -inf }
 0xbb1   : > { %2263 = vmax.xlane.f32.xlu0 %v2262_v18 }
 0xbbb   : > { %v2077_v19 = vpop.f32.mrf.mxu3 }
 0xbbc   : > { %v2249_v20 = vmul.f32 0.5, %v2077_v19 }
 0xbbe   : > { %v2259_v21 = vsel %vm759_vm3, %v2249_v20, -inf }
 0xbbf   : > { %2260 = vmax.xlane.f32.xlu2 %v2259_v21 }
 0xbc3   : > { %v2189_v60 = vpop.f32.mrf.mxu3 }
 0xbc4   : > { %v4000_v22 = vmul.f32 0.5, %v2189_v60 }
 0xbc5   : > { %v2133_v23 = vpop.f32.mrf.mxu1 }
 0xbc6   : > { %v2251_v24 = vmul.f32 0.5, %v2133_v23  ;;  %v2271_v26 = vsel %vm759_vm3, %v4000_v22, -inf }
 0xbc7   : > { %2272 = vmax.xlane.f32.xlu0 %v2271_v26 }
 0xbc8   : > { %v2265_v27 = vsel %vm759_vm3, %v2251_v24, -inf }
 0xbc9   : > { %2266 = vmax.xlane.f32.xlu1 %v2265_v27 }
 0xbd0   : > { %v2161_v28 = vpop.f32.mrf.mxu2 }
 0xbd1   : > { %v2252_v29 = vmul.f32 0.5, %v2161_v28 }
 0xbd3   : > { %v2268_v31 = vsel %vm759_vm3, %v2252_v29, -inf }
 0xbd4   : > { %2269 = vmax.xlane.f32.xlu2 %v2268_v31 }
 0xbd5   : > { %v2217_v32 = vpop.f32.mrf.mxu0 }
 0xbd6   : > { %v2254_v51 = vmul.f32 0.5, %v2217_v32 }
 0xbd8   : > { %v2274_v34 = vsel %vm759_vm3, %v2254_v51, -inf }
 0xbda   : > { %v2245_v30 = vpop.f32.mrf.mxu1 }
 0xbdb   : > { %v2255_v33 = vmul.f32 0.5, %v2245_v30 }
 0xbdc   : > { %2275 = vmax.xlane.f32.xlu2 %v2274_v34 }
 0xbdd   : > { %v2277_v35 = vsel %vm759_vm3, %v2255_v33, -inf }
 0xbde   : > { %2278 = vmax.xlane.f32.xlu1 %v2277_v35 }
 0xc1a   : > { %v2258_v36 = vpop.xlane.xlu1 %2257 }
 0xc1b   : > { %v2280_v38 = vsub.f32 %v2248_v14, %v2258_v36 }
 0xc1d   : > { %v2288_v39 = vmul.f32 1.442695, %v2280_v38 }
 0xc1f   : > { %3225 = vpow2.f32 %v2288_v39 }
 0xc24   : > { %v2264_v40 = vpop.xlane.xlu0 %2263 }
 0xc25   : > { %v3226_v41 = vpop.eup %3225  ;;  %v2282_v42 = vsub.f32 %v2250_v17, %v2264_v40 }
 0xc26   : > { %v2304_v44 = vsel %vm759_vm3, %v3226_v41, 0.0 }
 0xc27   : > { %v2292_v45 = vmul.f32 1.442695, %v2282_v42  ;;  %2305 = vadd.xlane.f32.xlu0 %v2304_v44 }
 0xc29   : > { %3227 = vpow2.f32 %v2292_v45 }
 0xc2f   : > { %v4009_v46 = vpop.eup %3227 }
 0xc30   : > { %v2310_v47 = vsel %vm759_vm3, %v4009_v46, 0.0 }
 0xc31   : > { %2311 = vadd.xlane.f32.xlu1 %v2310_v47 }
 0xc32   : > { %v2261_v48 = vpop.xlane.xlu2 %2260 }
 0xc33   : > { %v2281_v52 = vsub.f32 %v2249_v20, %v2261_v48 }
 0xc35   : > { %v2290_v53 = vmul.f32 1.442695, %v2281_v52 }
 0xc3a   : > { %v2273_v6 = vpop.xlane.xlu0 %2272 }
 0xc3b   : > { %v2285_v9 = vsub.f32 %v4000_v22, %v2273_v6 }
 0xc3c   : > { %v2267_v49 = vpop.xlane.xlu1 %2266 }
 0xc3d   : > { %v2283_v50 = vsub.f32 %v2251_v24, %v2267_v49  ;;  %v2298_v25 = vmul.f32 1.442695, %v2285_v9 }
 0xc3f   : > { %v2294_v4 = vmul.f32 1.442695, %v2283_v50 }
 0xc41   : > { %3229 = vpow2.f32 %v2294_v4 }
 0xc42   : > { %3231 = vpow2.f32 %v2290_v53 }
 0xc47   : > { %v3230_v54 = vpop.eup %3229  ;;  %v2270_v55 = vpop.xlane.xlu2 %2269 }
 0xc48   : > { %v2284_v56 = vsub.f32 %v2252_v29, %v2270_v55  ;;  %v2313_v57 = vsel %vm759_vm3, %v3230_v54, 0.0  ;;  %v3232_v61 = vpop.eup %3231  ;;  %v3024_v55 = vld [vmem:[%s4202_s4 + $0x50] sm:$0xff] }
 0xc49   : > { %2314 = vadd.xlane.f32.xlu2 %v2313_v57  ;;  %v2307_v0 = vsel %vm759_vm3, %v3232_v61, 0.0  ;;  %v3022_v57 = vld [vmem:[%s4202_s4 + $0x40] sm:$0xff] }
 0xc4a   : > { %v2296_v59 = vmul.f32 1.442695, %v2284_v56  ;;  %v3023_v56 = vld [vmem:[%s4202_s4 + $0x48] sm:$0xff] }
 0xc4c   : > { %3233 = vpow2.f32 %v2296_v59 }
 0xc4f   : > { %v2276_v63 = vpop.xlane.xlu2 %2275 }
 0xc50   : > { %v2286_v43 = vsub.f32 %v2254_v51, %v2276_v63 }
 0xc51   : > { %v2279_v1 = vpop.xlane.xlu1 %2278  ;;  %2308 = vadd.xlane.f32.xlu2 %v2307_v0 }
 0xc52   : > { %v3234_v2 = vpop.eup %3233  ;;  %v2300_v10 = vmul.f32 1.442695, %v2286_v43  ;;  %v2287_v3 = vsub.f32 %v2255_v33, %v2279_v1 }
 0xc53   : > { %v2316_v5 = vsel %vm759_vm3, %v3234_v2, 0.0 }
 0xc54   : > { %3235 = vpow2.f32 %v2300_v10  ;;  %2317 = vadd.xlane.f32.xlu0 %v2316_v5  ;;  %v2302_v7 = vmul.f32 1.442695, %v2287_v3 }
 0xc56   : > { %3237 = vpow2.f32 %v2302_v7 }
 0xc57   : > { %3239 = vpow2.f32 %v2298_v25 }
 0xc5a   : > { %v4016_v8 = vpop.eup %3235 }
 0xc5b   : > { %v2322_v11 = vsel %vm759_vm3, %v4016_v8, 0.0 }
 0xc5c   : > { %2323 = vadd.xlane.f32.xlu1 %v2322_v11  ;;  %v3238_v12 = vpop.eup %3237  ;;  %v3141_v11 = vld [vmem:[%s4203_s5 + $0x2] ss:$0 sm:$0xff] }
 0xc5d   : > { %v2325_v13 = vsel %vm759_vm3, %v3238_v12, 0.0  ;;  %v3240_v14 = vpop.eup %3239 }
 0xc5e   : > { %v2319_v15 = vsel %vm759_vm3, %v3240_v14, 0.0 }
 0xc64   : > { %2326 = vadd.xlane.f32.xlu1 %v2325_v13 }
 0xc68   : > { %2448 = vrot.lane.b32.xlu0 %v3955_v58, %s4331_s30 }
 0xc69   : > { %2422 = vrot.lane.b32.xlu2 %v3955_v58, %s4328_s14  ;;  %s4354_s14 = smov 24  }
 0xc6c   : > { %2320 = vadd.xlane.f32.xlu1 %v2319_v15 }
 0xc70   : > { %2474 = vrot.lane.b32.xlu0 %v3955_v58, %s4332_s25 }
 0xc71   : > { %2500 = vrot.lane.b32.xlu2 %v3955_v58, %s4345_s21 }
 0xc78   : > { %2526 = vrot.lane.b32.xlu0 %v3955_v58, %s4346_s22 }
 0xc85   : > { %2396 = vrot.lane.b32.xlu1 %v3955_v58, %s4347_s26  ;;  %s469_s26 = sand.u32 1, %s4359_s0  }
 0xc86   : > { %s2828_s16 = scalar_lea.sflag [#allocation3], %s469_s26 }
 0xc9a   : > { %v2306_v16 = vpop.xlane.xlu0 %2305 }
 0xc9b   : > { %3241 = vrcp.f32 %v2306_v16 }
 0xca1   : > { %v3242_v17 = vpop.eup %3241 }
 0xca2   : > { %v2336_v18 = vmul.f32 %v3242_v17, %v3226_v41 }
 0xca4   : > { %3014 = vmatmul.msk.f32.vlgmr.msrb.gmra.mxu2 %vm759_vm3, %v2336_v18  ;;  %v2312_v21 = vpop.xlane.xlu1 %2311 }
 0xcbc   : > { %v2315_v19 = vpop.xlane.xlu2 %2314 }
 0xcbd   : > { %3243 = vrcp.f32 %v2315_v19 }
 0xcc3   : > { %v3244_v60 = vpop.eup %3243 }
 0xcc4   : > { %v2309_v20 = vpop.xlane.xlu2 %2308  ;;  %v2339_v23 = vmul.f32 %v3244_v60, %v3230_v54  ;;  %v3025_v54 = vld [vmem:[%s4202_s4 + $0x58] sm:$0xff]  ;;  %v3030_v60 = vld [vmem:[%s4355_s19 + $0x20] sm:$0xff] }
 0xcc5   : > { %3245 = vrcp.f32 %v2309_v20  ;;  %v3033_v20 = vld [vmem:[%s4355_s19 + $0x38] sm:$0xff] }
 0xcc7   : > { %v2318_v27 = vpop.xlane.xlu0 %2317 }
 0xcc8   : > { %3247 = vrcp.f32 %v2318_v27 }
 0xccb   : > { %v3246_v22 = vpop.eup %3245 }
 0xccc   : > { %v2337_v24 = vmul.f32 %v3246_v22, %v3232_v61  ;;  %v2423_v26 = vpop.permute.xlu2 %2422 }
 0xccd   : > { %2443 = vmatpush.msrb.mxu1 %v2423_v26 }
 0xcce   : > { %3015 = vmatmul.msk.f32.vlgmr.msra.gmra.mxu3 %vm759_vm3, %v2337_v24  ;;  %3017 = vmatmul.msk.f32.vlgmr.msrb.gmra.mxu1 %vm759_vm3, %v2339_v23  ;;  %v3248_v28 = vpop.eup %3247 }
 0xccf   : > { %v2324_v58 = vpop.xlane.xlu1 %2323  ;;  %v2340_v31 = vmul.f32 %v3248_v28, %v3234_v2 }
 0xcd4   : > { %v2501_v42 = vpop.permute.xlu2 %2500 }
 0xcd7   : > { %v2327_v29 = vpop.xlane.xlu1 %2326 }
 0xcda   : > { %v2449_v32 = vpop.permute.xlu0 %2448 }
 0xcdb   : > { %2469 = vmatpush.msra.mxu2 %v2449_v32 }
 0xcdc   : > { %3018 = vmatmul.msk.f32.vlgmr.msra.gmra.mxu2 %vm759_vm3, %v2340_v31 }
 0xcdd   : > { %2612 = vmatpush.msrb.mxu2 %v3025_v54 }
 0xcdf   : > { %v2321_v51 = vpop.xlane.xlu1 %2320  ;;  %2613 = vmatpush.msrb.mxu2 %v3024_v55 }
 0xce0   : > { %3249 = vrcp.f32 %v2321_v51 }
 0xce1   : > { %3251 = vrcp.f32 %v2327_v29  ;;  %2614 = vmatpush.msrb.mxu2 %v3023_v56 }
 0xce2   : > { %v2475_v30 = vpop.permute.xlu0 %2474  ;;  %3253 = vrcp.f32 %v2312_v21  ;;  %v3031_v21 = vld [vmem:[%s4355_s19 + $0x28] sm:$0xff] }
 0xce3   : > { %2495 = vmatpush.msrb.mxu3 %v2475_v30  ;;  %3255 = vrcp.f32 %v2324_v58  ;;  %2615 = vmatpush.msrb.mxu2 %v3022_v57 }
 0xce5   : > { %2680 = vmatpush.msra.mxu3 %v3033_v20  ;;  %v2797_v20 = vld [vmem:[%s4358_s9 + $0x10] sm:$0xff] }
 0xce6   : > { %v3250_v33 = vpop.eup %3249 }
 0xce7   : > { %v3252_v34 = vpop.eup %3251  ;;  %v2341_v35 = vmul.f32 %v3250_v33, %v3240_v14 }
 0xce8   : > { %v2343_v36 = vmul.f32 %v3252_v34, %v3238_v12  ;;  %v3254_v39 = vpop.eup %3253 }
 0xce9   : > { %3019 = vmatmul.msk.f32.vlgmr.msrb.gmra.mxu3 %vm759_vm3, %v2341_v35  ;;  %v2338_v40 = vmul.f32 %v3254_v39, %v4009_v46  ;;  %v3256_v44 = vpop.eup %3255  ;;  %v3142_v35 = vld [vmem:[%s4204_s6 + $0x4] ss:$0 sm:$0xff] }
 0xcea   : > { %v2527_v38 = vpop.permute.xlu0 %2526  ;;  %v2342_v45 = vmul.f32 %v3256_v44, %v4016_v8  ;;  %v3143_v39 = vld [vmem:[%s4205_s7 + $0x4] ss:$0 sm:$0xff] }
 0xceb   : > { %2547 = vmatpush.msra.mxu1 %v2527_v38 }
 0xcec   : > { %3021 = vmatmul.msk.f32.vlgmr.msra.gmra.mxu1 %vm759_vm3, %v2343_v36 }
 0xcf7   : > { %v2397_v41 = vpop.permute.xlu1 %2396 }
 0xcf8   : > { %2417 = vmatpush.msra.mxu0 %v2397_v41 }
 0xcf9   : > { %3016 = vmatmul.msk.f32.vlgmr.msra.gmra.mxu0 %vm759_vm3, %v2338_v40 }
 0xcfa   : > { %2521 = vmatpush.msrb.mxu0 %v2501_v42 }
 0xd01   : > { %3020 = vmatmul.msk.f32.vlgmr.msrb.gmra.mxu0 %vm759_vm3, %v2342_v45 }
 0xd27   : > { %v2367_v49 = vpop.f32.mrf.mxu2 }
 0xd4b   : > { %v2445_v47 = vpop.f32.mrf.mxu1 }
 0xd4c   : > { %2561 = vrot.lane.b32.xlu0 %v2445_v47, %s4348_s15  ;;  %s2918_s15 = sshll.u32 %s469_s26, 3 }
 0xd4d   : > { %s471_s10 = scalar_lea.vmem [#allocation2], %s2918_s15 }
 0xd4e   : > { %s2840_s18 = sshll.u32 %s471_s10, 4  ;;  %s2841_s18 = int_to_ptr.vmem [resolvable:$true] %s2840_s18 }
 0xd51   : > { %v2393_v48 = vpop.f32.mrf.mxu3 }
 0xd52   : > { %2553 = vrot.lane.b32.xlu2 %v2393_v48, %s4349_s20  ;;  %s4357_s20 = sld [smem:[#allocation17_spill]] }
 0xd58   : > { %v3144_v47 = vld [vmem:[%s4357_s20 + $0x1] ss:$0 sm:$0xff]  ;;  %s3052_s20 = sshll.u32 %s4360_s28, 3 }
 0xd5f   : > { %v2471_v50 = vpop.f32.mrf.mxu2 }
 0xd60   : > { %2565 = vrot.lane.b32.xlu2 %v2471_v50, %s4350_s1 }
 0xd69   : > { %v2549_v46 = vpop.f32.mrf.mxu1 }
 0xd6a   : > { %2577 = vrot.lane.b32.xlu2 %v2549_v46, %s4351_s27  ;;  %v3145_v46 = vld [vmem:[%s4209_s11 + $0x1] ss:$0 sm:$0xff] }
 0xd6c   : > { %v2497_v4 = vpop.f32.mrf.mxu3 }
 0xd76   : > { %v2419_v52 = vpop.f32.mrf.mxu0 }
 0xd77   : > { %2557 = vrot.lane.b32.xlu1 %v2419_v52, %s4352_s13  ;;  %s4356_s13 = sld [smem:[#allocation18_spill]] }
 0xd7d   : > { %v3043_v22 = vld [vmem:[%s4356_s13 + $0x78] sm:$0xff]  ;;  %v3042_v23 = vld [vmem:[%s4356_s13 + $0x70] sm:$0xff]  ;;  %v3041_v24 = vld [vmem:[%s4356_s13 + $0x68] sm:$0xff] }
 0xd7e   : > { %v2523_v53 = vpop.f32.mrf.mxu0  ;;  %2714 = vmatpush.msra.mxu0 %v3043_v22  ;;  %v3040_v58 = vld [vmem:[%s4356_s13 + $0x60] sm:$0xff]  ;;  %v3039_v29 = vld [vmem:[%s4356_s13 + $0x58] sm:$0xff]  ;;  %v3038_v42 = vld [vmem:[%s4356_s13 + $0x50] sm:$0xff] }
 0xd7f   : > { %2569 = vrot.lane.b32.xlu1 %v2497_v4, %s4353_s23  ;;  %2573 = vrot.lane.b32.xlu0 %v2523_v53, %s4354_s14  ;;  %v3037_v44 = vld [vmem:[%s4356_s13 + $0x48] sm:$0xff]  ;;  %v3036_v45 = vld [vmem:[%s4356_s13 + $0x40] sm:$0xff]  ;;  %s4361_s13 = sld [smem:[#allocation21_spill]] }
 0xd80   : > { %2715 = vmatpush.msra.mxu0 %v3042_v23 }
 0xd82   : > { %2716 = vmatpush.msra.mxu0 %v3041_v24 }
 0xd84   : > { %2717 = vmatpush.msra.mxu0 %v3040_v58 }
 0xd85   : > { %s2838_s14 = scalar_lea.hbm %s4361_s13, %s3052_s20 }
 0xd86   : > { %2718 = vmatpush.msra.mxu0 %v3039_v29  ;;  %s2842_s29 = sshll.u32 %s2838_s14, 4  ;;  %s2843_s29 = int_to_ptr.hbm [resolvable:$true] %s2842_s29 }
 0xd87   : > { %s3277_s17 = sshra.s32 %s2843_s29, 4  ;;  %s3278_s17 = int_to_ptr.hbm [resolvable:$true] %s3277_s17 }
 0xd88   : > { %2719 = vmatpush.msra.mxu0 %v3038_v42  ;;  %s3279_s12 = scalar_lea.hbm %s3278_s17, 8  ;;  %p3284_p0 = scmp.lt.s32.totalorder %s3278_s17, %s4361_s13 }
 0xd89   : > { %p3280_p11 = scmp.ne.s32.totalorder %s3278_s17, %s3279_s12 }
 0xd8a   : > { %2720 = vmatpush.msra.mxu0 %v3037_v44 }
 0xd8b   : > { %p3281_p12 = pnand %p3280_p11, %p3472_p5 }
 0xd8c   : > { %2721 = vmatpush.msra.mxu0 %v3036_v45 }
 0xd8d   : > { %p3282_p13 = pneg %p3281_p12 }
 0xdac   : > { %v2554_v59 = vpop.permute.xlu2 %2553 }
 0xdad   : > { %v2580_v43 = vsel %vm522_vm1, %v2367_v49, %v2554_v59 }
 0xdba   : > { %v2566_v0 = vpop.permute.xlu2 %2565 }
 0xdbe   : > { %v2562_v61 = vpop.permute.xlu0 %2561 }
 0xdc4   : > { %v2578_v6 = vpop.permute.xlu2 %2577 }
 0xde9   : > { %v2558_v63 = vpop.permute.xlu1 %2557 }
 0xdea   : > { %v2581_v1 = vsel %vm759_vm3, %v2580_v43, %v2558_v63 }
 0xdeb   : > { %v2582_v2 = vsel %vm1086_vm4, %v2581_v1, %v2562_v61 }
 0xdec   : > { %v2583_v3 = vsel %vm1088_vm5, %v2582_v2, %v2566_v0 }
 0xdf1   : > { %v2570_v10 = vpop.permute.xlu1 %2569  ;;  %v2574_v5 = vpop.permute.xlu0 %2573 }
 0xdf2   : > { %v2584_v7 = vsel %vm1090_vm6, %v2583_v3, %v2570_v10 }
 0xdf3   : > { %v2585_v8 = vsel %vm1092_vm7, %v2584_v7, %v2574_v5 }
 0xdf4   : > { %v2586_v9 = vsel %vm1094_vm8, %v2585_v8, %v2578_v6  ;;  %v3146_v6 = vld [vmem:[%s4204_s6 + $0x5] ss:$0 sm:$0xff] }
 0xdf5   : > { %3027 = vmatmul.msk.f32.vlgmr.msrb.gmra.mxu2 %vm495_vm0, %v2586_v9 }
 0xe78   : > { %v2617_v25 = vpop.f32.mrf.mxu2 }
 0xe79   : > { %v2618_v12 = vadd.f32 %v3141_v11, %v2617_v25  ;;  %v3147_v11 = vld [vmem:[%s4205_s7 + $0x5] ss:$0 sm:$0xff] }
 0xe7b   : > { %v2620_v13 = vadd.f32 %v2618_v12, %v3937_v37  ;;  %v3032_v37 = vld [vmem:[%s4355_s19 + $0x30] sm:$0xff]  ;;  %s3283_s19 = scalar_lea.hbm %s4361_s13, 16 }
 0xe7c   : > { %2681 = vmatpush.msra.mxu3 %v3032_v37  ;;  %v2796_v37 = vld [vmem:[%s4358_s9 + $0x8] sm:$0xff]  ;;  %p3285_p1 = scmp.lt.s32.totalorder %s3283_s19, %s3279_s12 }
 0xe7d   : > { %v2621_v14 = vsel %vm495_vm0, %v2620_v13, 0.0 }
 0xe7e   : > { %2622 = vadd.xlane.f32.xlu1 %v2621_v14  ;;  %2682 = vmatpush.msra.mxu3 %v3031_v21  ;;  %v2795_v21 = vld [vmem:[%s4358_s9] sm:$0xff]  ;;  %p3286_p2 = por %p3285_p1, %p3284_p0 }
 0xe80   : > { %2683 = vmatpush.msra.mxu3 %v3030_v60  ;;  %p3287_p3 = pnand %p3286_p2, %p3282_p13 }
 0xef1   : > { %v2623_v15 = vpop.xlane.xlu1 %2622 }
 0xef2   : > { %v2624_v16 = vmul.f32 %v2623_v15, %v3721_v62 }
 0xef4   : > { %v2625_v17 = vsub.f32 %v2620_v13, %v2624_v16 }
 0xef6   : > { %v2626_v18 = vmul.f32 %v2625_v17, %v2625_v17 }
 0xef8   : > { %v2627_v19 = vsel %vm495_vm0, %v2626_v18, 0.0 }
 0xef9   : > { %2628 = vadd.xlane.f32.xlu0 %v2627_v19  ;;  %v2798_v19 = vld [vmem:[%s4358_s9 + $0x18] sm:$0xff] }
 0xefa   : > { %2818 = vmatpush.msrb.mxu1 %v2798_v19 }
 0xefc   : > { %2819 = vmatpush.msrb.mxu1 %v2797_v20 }
 0xefe   : > { %2820 = vmatpush.msrb.mxu1 %v2796_v37 }
 0xf00   : > { %2821 = vmatpush.msrb.mxu1 %v2795_v21 }
 0xf6c   : > { %v2629_v26 = vpop.xlane.xlu0 %2628 }
 0xf6d   : > { %v2630_v27 = vmul.f32 %v2629_v26, %v3721_v62 }
 0xf6f   : > { %v2631_v28 = vadd.f32 1e-05, %v2630_v27 }
 0xf71   : > { %3257 = vrsqrt.f32 %v2631_v28  ;;  %vm2638_vm3 = vweird.f32 %v2631_v28 }
 0xf77   : > { %v3258_v31 = vpop.eup %3257 }
 0xf78   : > { %v2633_v32 = vmul.f32 %v3258_v31, %v2631_v28  ;;  %vm2639_vm1 = vweird.f32 %v3258_v31 }
 0xf79   : > { %vm2640_vm4 = vmor %vm2638_vm3, %vm2639_vm1 }
 0xf7a   : > { %v2634_v51 = vmul.f32 %v3258_v31, %v2633_v32 }
 0xf7c   : > { %v2635_v30 = vmul.f32 0.5, %v2634_v51 }
 0xf7e   : > { %v2636_v33 = vsub.f32 1.5, %v2635_v30 }
 0xf80   : > { %v2637_v34 = vmul.f32 %v3258_v31, %v2636_v33 }
 0xf82   : > { %v2641_v36 = vsel %vm2640_vm4, %v3258_v31, %v2637_v34  ;;  %v3148_v31 = vld [vmem:[%s4204_s6 + $0x6] ss:$0 sm:$0xff]  ;;  %v3150_v34 = vld [vmem:[%s4363_s8] ss:$0 sm:$0xff] }
 0xf83   : > { %v2642_v38 = vmul.f32 %v2641_v36, %v2625_v17 }
 0xf85   : > { %v2648_v40 = vmul.f32 %v3142_v35, %v2642_v38 }
 0xf87   : > { %v2654_v41 = vadd.f32 %v3143_v39, %v2648_v40 }
 0xf89   : > { %3035 = vmatmul.msk.f32.vlgmr.msra.gmra.mxu3 %vm495_vm0, %v2654_v41 }
0x100c   : > { %v2685_v48 = vpop.f32.mrf.mxu3 }
0x100d   : > { %v2686_v49 = vadd.f32 %v3144_v47, %v2685_v48 }
0x100f   : > { %v2688_v50 = vmax.f32 %v2686_v49, 0.0 }
0x1011   : > { %3045 = vmatmul.msk.f32.vlgmr.msra.gmra.mxu0 %vm1211_vm13, %v2688_v50 }
0x108e   : > { %v2723_v52 = vpop.f32.mrf.mxu0 }
0x108f   : > { %v2724_v4 = vadd.f32 %v3145_v46, %v2723_v52 }
0x1091   : > { %v2726_v53 = vadd.f32 %v2724_v4, %v2654_v41 }
0x1093   : > { %v2727_v54 = vsel %vm495_vm0, %v2726_v53, 0.0 }
0x1094   : > { %2728 = vadd.xlane.f32.xlu2 %v2727_v54 }
0x1107   : > { %v2729_v55 = vpop.xlane.xlu2 %2728 }
0x1108   : > { %v2730_v56 = vmul.f32 %v2729_v55, %v3721_v62 }
0x110a   : > { %v2731_v57 = vsub.f32 %v2726_v53, %v2730_v56 }
0x110c   : > { %v2732_v59 = vmul.f32 %v2731_v57, %v2731_v57 }
0x110e   : > { %v2733_v61 = vsel %vm495_vm0, %v2732_v59, 0.0 }
0x110f   : > { %2734 = vadd.xlane.f32.xlu1 %v2733_v61 }
0x1182   : > { %v2735_v63 = vpop.xlane.xlu1 %2734 }
0x1183   : > { %v2736_v43 = vmul.f32 %v2735_v63, %v3721_v62 }
0x1185   : > { %v2737_v0 = vadd.f32 1e-05, %v2736_v43 }
0x1187   : > { %3259 = vrsqrt.f32 %v2737_v0  ;;  %vm2744_vm6 = vweird.f32 %v2737_v0 }
0x118d   : > { %v3260_v1 = vpop.eup %3259 }
0x118e   : > { %v2739_v2 = vmul.f32 %v3260_v1, %v2737_v0  ;;  %vm2745_vm5 = vweird.f32 %v3260_v1 }
0x118f   : > { %vm2746_vm7 = vmor %vm2744_vm6, %vm2745_vm5 }
0x1190   : > { %v2740_v10 = vmul.f32 %v3260_v1, %v2739_v2 }
0x1192   : > { %v2741_v3 = vmul.f32 0.5, %v2740_v10 }
0x1194   : > { %v2742_v5 = vsub.f32 1.5, %v2741_v3 }
0x1196   : > { %v2743_v7 = vmul.f32 %v3260_v1, %v2742_v5 }
0x1198   : > { %v2747_v8 = vsel %vm2746_vm7, %v3260_v1, %v2743_v7 }
0x1199   : > { %v2748_v9 = vmul.f32 %v2747_v8, %v2731_v57 }
0x119b   : > { %v2754_v25 = vmul.f32 %v3146_v6, %v2748_v9 }
0x119d   : > { %v2760_v12 = vadd.f32 %v3147_v11, %v2754_v25 }
0x119f   : > { %v2761_v13 = vsel %vm495_vm0, %v2760_v12, 0.0 }
0x11a0   : > { %2762 = vadd.xlane.f32.xlu0 %v2761_v13 }
0x1213   : > { %v2763_v14 = vpop.xlane.xlu0 %2762 }
0x1214   : > { %v2764_v15 = vmul.f32 %v2763_v14, %v3721_v62 }
0x1216   : > { %v2765_v16 = vsub.f32 %v2760_v12, %v2764_v15 }
0x1218   : > { %v2766_v17 = vmul.f32 %v2765_v16, %v2765_v16 }
0x121a   : > { %v2767_v18 = vsel %vm495_vm0, %v2766_v17, 0.0 }
0x121b   : > { %2768 = vadd.xlane.f32.xlu2 %v2767_v18 }
0x128e   : > { %v2769_v60 = vpop.xlane.xlu2 %2768 }
0x128f   : > { %v2770_v22 = vmul.f32 %v2769_v60, %v3721_v62  ;;  %v3149_v62 = vld [vmem:[%s4205_s7 + $0x6] ss:$0 sm:$0xff] }
0x1291   : > { %v2771_v23 = vadd.f32 1e-05, %v2770_v22 }
0x1293   : > { %3261 = vrsqrt.f32 %v2771_v23  ;;  %vm2778_vm13 = vweird.f32 %v2771_v23 }
0x1299   : > { %v3262_v24 = vpop.eup %3261 }
0x129a   : > { %v2773_v26 = vmul.f32 %v3262_v24, %v2771_v23  ;;  %vm2779_vm8 = vweird.f32 %v3262_v24 }
0x129b   : > { %vm2780_vm2 = vmor %vm2778_vm13, %vm2779_vm8 }
0x129c   : > { %v2774_v27 = vmul.f32 %v3262_v24, %v2773_v26 }
0x129e   : > { %v2775_v58 = vmul.f32 0.5, %v2774_v27 }
0x12a0   : > { %v2776_v28 = vsub.f32 1.5, %v2775_v58 }
0x12a2   : > { %v2777_v29 = vmul.f32 %v3262_v24, %v2776_v28 }
0x12a4   : > { %v2781_v32 = vsel %vm2780_vm2, %v3262_v24, %v2777_v29 }
0x12a5   : > { %v2782_v51 = vmul.f32 %v2781_v32, %v2765_v16 }
0x12a7   : > { %v2788_v30 = vmul.f32 %v3148_v31, %v2782_v51 }
0x12a9   : > { %v2794_v33 = vadd.f32 %v3149_v62, %v2788_v30 }
0x12ab   : > { %3050 = vmatmul.msk.f32.vlgmr.msrb.gmra.mxu1 %vm495_vm0, %v2794_v33 }
0x1328   : > { %v2823_v35 = vpop.f32.mrf.mxu1 }
0x1329   : > { %v2824_v36 = vadd.f32 %v3150_v34, %v2823_v35 }
0x132b   : > { %2826 = vst [vmem:[%s471_s10] sm:$0xff] %v2824_v36 }
0x132c   : > { %3290 = shalt.err (!%p3287_p3)
}
0x132d   : > { %3055 = dma.vmem_to_hbm [thread:$0]  (%p3472_p5), %s2841_s18, 128, %s2843_s29, %s2828_s16  }
0x132e PF: > { %s4364_s22 = sld [smem:[#allocation8_spill]] }
0x132f   : > { %s4365_s26 = sld [smem:[#allocation5_spill]] }
0x1334   : > { %p3061_p4 = scmp.ge.s32.totalorder %s4364_s22, 2 }
0x1335   : > { %s2854_s20 = sand.u32 1, %s4365_s26  }
0x1336   : > { %p3058_p7 = pnand %p3061_p4, %p3476_p6  ;;  %s2855_s1 = scalar_lea.sflag [#allocation3], %s2854_s20 }
0x1338   : > { %p3059_p8 = pneg %p3058_p7 }
0x133a   : > { %3308 = dma.done.wait (%p3059_p8), %s2855_s1, 128  }
0x133b   : > { %3310 = vsyncadd (%p3059_p8), %s2855_s1, 4294967168  ;;  %s4367_s16 = sld [smem:[#allocation10_spill]] }
0x133c   : > { %s4368_s29 = sld [smem:[#allocation6_spill]] }
0x133d   : > { %s4369_s30 = sld [smem:[#allocation7_spill]] }
0x133e   : > { %s4370_s15 = sld [smem:[#allocation11_spill]] }
0x1341   : > { %p24_p9 = scmp.ge.s32.totalorder %s4367_s16, 4  }
0x1343   :  { %26 = sbr.rel (!%p24_p9) target bundleno = 12 (0xc), region = 138 }
0x1348   :  { %2861 = vsyncpa [#allocation3], 1 }
0x1349   :  { %2863 = vsyncpa [#allocation3 + $0x1], 1 }

</bundles_post_ra>
